<compile_context>
chip_gen: v5e
topology: v5e:2x2
jax: 0.10.0
libtpu: 0.0.40
codegen_flags: <defaults>
</compile_context>

<pallas_src>
import functools

import jax
import jax.numpy as jnp
from jax.experimental import pallas as pl
from jax.experimental.pallas import tpu as pltpu

_LANES = 128  # atoms padded to one full lane register per action


def _round_up(x, m):
    return ((x + m - 1) // m) * m


def _c51_kernel(x_ref, w1_ref, b1_ref, w2_ref, b2_ref, w3_ref, b3_ref,
                msup_ref, mone_ref, out_ref, *, n_actions, vectorized_head):
    """One batch tile of the forward pass (weights resident in VMEM)."""
    x = x_ref[...]                                                   # (TB, F)

    # fc1 + relu (matmul-dtype inputs, f32 accumulation / elementwise math)
    h1 = jnp.dot(x, w1_ref[...], preferred_element_type=jnp.float32)
    h1 = jnp.maximum(h1 + b1_ref[...], 0.0)                          # (TB, H) f32

    # fc2 + relu
    h2 = jnp.dot(h1.astype(w2_ref.dtype), w2_ref[...],
                 preferred_element_type=jnp.float32)
    h2 = jnp.maximum(h2 + b2_ref[...], 0.0)                          # (TB, H) f32

    # fc3: logits for all action/atom pairs; atoms lane-padded to 128 per action.
    # b3 is f32 with -1e30 on padded atoms -> they vanish from the softmax.
    logits = jnp.dot(h2.astype(w3_ref.dtype), w3_ref[...],
                     preferred_element_type=jnp.float32) + b3_ref[...]   # (TB, A*128)

    tb = logits.shape[0]
    if vectorized_head:
        # One stable-softmax max/exp for every action at once (last dim stays 128).
        l3 = logits.reshape(tb, n_actions, _LANES)
        m = jnp.max(l3, axis=-1, keepdims=True)                      # (TB, A, 1)
        e = jnp.exp(l3 - m).reshape(tb, n_actions * _LANES)          # (TB, A*128)
    else:
        # Fallback: small static unroll over lane-aligned 128-wide action slices.
        blocks = []
        for a in range(n_actions):
            la = logits[:, a * _LANES:(a + 1) * _LANES]              # (TB, 128)
            m = jnp.max(la, axis=-1, keepdims=True)
            blocks.append(jnp.exp(la - m))
        e = jnp.concatenate(blocks, axis=-1)                         # (TB, A*128)

    # Per-action numerator / denominator via block-diagonal MXU matmuls; results
    # land lane-contiguous in lanes 0..A-1 of a 128-wide register.
    num = jnp.dot(e, msup_ref[...], preferred_element_type=jnp.float32)  # (TB, 128)
    den = jnp.dot(e, mone_ref[...], preferred_element_type=jnp.float32)  # (TB, 128)

    # Padded lanes (>= n_actions) have den == 0; set them to 1 to avoid inf/NaN.
    lane = jax.lax.broadcasted_iota(jnp.int32, (1, _LANES), 1)
    den = den + (lane >= n_actions).astype(jnp.float32)

    # Exact divide (tiny tile) so near-tied Q values keep their argmax;
    # single lane-dense, unmasked store of the whole (TB, 128) block.
    out_ref[...] = num / den


def c51_forward(x, params, support, n_actions, n_atoms,
                block_batch=1024, min_grid=1, matmul_dtype=jnp.bfloat16):
    """Runs the Pallas kernel. x: (B, n_features) f32 -> (B, n_actions) f32."""
    assert n_actions <= _LANES, "Q head is packed into a single 128-lane register"
    w1, b1, w2, b2, w3, b3 = params
    batch, n_features = x.shape
    n_neurons = w1.shape[1]
    head = n_actions * _LANES
    pad_atoms = _LANES - n_atoms

    # --- head padding: atoms n_atoms -> 128 per action (lane aligned) ---
    w3p = jnp.pad(w3.reshape(n_neurons, n_actions, n_atoms),
                  ((0, 0), (0, 0), (0, pad_atoms))).reshape(n_neurons, head)
    b3p = jnp.pad(b3.reshape(1, n_actions, n_atoms),
                  ((0, 0), (0, 0), (0, pad_atoms)),
                  constant_values=-1e30).reshape(1, head)        # stays f32!
    sup_pad = jnp.pad(support.astype(jnp.float32), (0, pad_atoms))        # (128,)
    atom_mask = (jnp.arange(_LANES) < n_atoms).astype(jnp.float32)        # (128,)

    # Block-diagonal reduction matrices (f32 for precision):
    #   (e @ msup)[:, a] = sum_k e[:, a*128+k] * support[k]
    #   (e @ mone)[:, a] = sum_k e[:, a*128+k]           (k < n_atoms only)
    eye_a = jnp.eye(n_actions, _LANES, dtype=jnp.float32)                 # (A, 128)
    msup = (sup_pad[None, :, None] * eye_a[:, None, :]).reshape(head, _LANES)
    mone = (atom_mask[None, :, None] * eye_a[:, None, :]).reshape(head, _LANES)

    # bf16 matmul inputs (halves weight DMA / MXU passes); biases stay f32.
    xm = x.astype(matmul_dtype)
    w1m = w1.astype(matmul_dtype)
    w2m = w2.astype(matmul_dtype)
    w3m = w3p.astype(matmul_dtype)

    # --- VMEM limit: ~75% of physical, capped at 100 MiB.
    #     v5e/v6e: 128 MiB phys -> 96 MiB; v7x: 64 MiB phys -> 48 MiB. ---
    try:
        vmem_phys = int(getattr(pltpu.get_tpu_info(), "vmem_capacity_bytes",
                                64 * 1024 * 1024))
    except Exception:
        vmem_phys = 64 * 1024 * 1024
    vmem_limit = min(100 * 1024 * 1024, (vmem_phys * 3) // 4)

    # --- balanced, 16-aligned batch tiling, budgeted against f32 temporaries ---
    bytes_per_row = 4 * (2 * n_neurons + 2 * head + 3 * _LANES) + 2 * n_features
    tb_cap = max(16, (((vmem_limit // 3) // bytes_per_row) // 16) * 16)
    block_batch = min(block_batch, tb_cap)
    n_tiles = max(min_grid, pl.cdiv(batch, block_batch))
    if n_tiles > 1:                 # v7x megacore: keep grid a multiple of 2 TCs
        n_tiles = _round_up(n_tiles, 2)
    tb = _round_up(pl.cdiv(batch, n_tiles), 16)
    b_pad = n_tiles * tb
    if b_pad != batch:
        xm = jnp.pad(xm, ((0, b_pad - batch), (0, 0)))

    def _resident(shape, single_buffer):
        kwargs = {"pipeline_mode": pl.Buffered(1)} if single_buffer else {}
        return pl.BlockSpec(shape, lambda i, s=len(shape): (0,) * s, **kwargs)

    def _build(vectorized_head, single_buffer):
        kernel = functools.partial(_c51_kernel, n_actions=n_actions,
                                   vectorized_head=vectorized_head)
        return pl.pallas_call(
            kernel,
            out_shape=jax.ShapeDtypeStruct((b_pad, _LANES), jnp.float32),
            grid_spec=pltpu.PrefetchScalarGridSpec(
                num_scalar_prefetch=0,
                grid=(n_tiles,),
                in_specs=[
                    pl.BlockSpec((tb, n_features), lambda i: (i, 0)),     # x tile
                    _resident((n_features, n_neurons), single_buffer),    # w1
                    _resident((1, n_neurons), single_buffer),             # b1
                    _resident((n_neurons, n_neurons), single_buffer),     # w2
                    _resident((1, n_neurons), single_buffer),             # b2
                    _resident((n_neurons, head), single_buffer),          # w3
                    _resident((1, head), single_buffer),                  # b3 (f32)
                    _resident((head, _LANES), single_buffer),             # msup
                    _resident((head, _LANES), single_buffer),             # mone
                ],
                # Lane-dense 128-wide output block -> one unmasked store per tile.
                out_specs=pl.BlockSpec((tb, _LANES), lambda i: (i, 0)),
            ),
            compiler_params=pltpu.CompilerParams(
                dimension_semantics=("parallel",),   # shard batch tiles across TCs
                vmem_limit_bytes=vmem_limit,
            ),
        )

    args = (xm, w1m, b1, w2m, b2, w3m, b3p, msup, mone)
    # Prefer the fully vectorized head + single-buffered weights; fall back
    # gracefully if a particular jax/Mosaic version rejects either feature.
    attempts = [(True, True), (True, False), (False, True), (False, False)]
    last_err = None
    out = None
    for vec_head, single_buf in attempts:
        try:
            out = _build(vec_head, single_buf)(*args)
            break
        except Exception as err:  # noqa: BLE001 - fall back to a safer variant
            last_err = err
    if out is None:
        raise last_err

    return out[:batch, :n_actions]


def init_params(key, n_features, n_actions, n_neurons, n_atoms):
    """Deterministic init mimicking PyTorch's default Linear init (uniform)."""
    def linear(k, fan_in, fan_out):
        kw, kb = jax.random.split(k)
        bound = 1.0 / jnp.sqrt(fan_in)
        w = jax.random.uniform(kw, (fan_in, fan_out), jnp.float32, -bound, bound)
        b = jax.random.uniform(kb, (1, fan_out), jnp.float32, -bound, bound)
        return w, b

    k1, k2, k3 = jax.random.split(key, 3)
    w1, b1 = linear(k1, n_features, n_neurons)
    w2, b2 = linear(k2, n_neurons, n_neurons)
    w3, b3 = linear(k3, n_neurons, n_actions * n_atoms)
    return (w1, b1, w2, b2, w3, b3)


def reference_forward(x, params, support, n_actions, n_atoms,
                      matmul_dtype=jnp.bfloat16):
    """Pure-JAX reference matching the PyTorch module, at the same matmul
    precision as the kernel (bf16 inputs / f32 accumulation by default)."""
    w1, b1, w2, b2, w3, b3 = params
    xm = x.astype(matmul_dtype)
    h1 = jax.nn.relu(jnp.dot(xm, w1.astype(matmul_dtype),
                             preferred_element_type=jnp.float32) + b1)
    h2 = jax.nn.relu(jnp.dot(h1.astype(matmul_dtype), w2.astype(matmul_dtype),
                             preferred_element_type=jnp.float32) + b2)
    logits = jnp.dot(h2.astype(matmul_dtype), w3.astype(matmul_dtype),
                     preferred_element_type=jnp.float32) + b3
    logits = logits.reshape(-1, n_actions, n_atoms)
    dist = jax.nn.softmax(logits, axis=2)
    return jnp.sum(support.reshape(1, 1, n_atoms) * dist, axis=2)


if __name__ == "__main__":
    # Small shapes consistent with a classic-control C51 net.
    batch = 2
    n_features = 4
    n_actions = 2
    n_neurons = 16
    n_atoms = 51
    v_min, v_max = -10.0, 10.0

    key = jax.random.PRNGKey(0)
    kx, kp = jax.random.split(key)

    x = jax.random.normal(kx, (batch, n_features), jnp.float32)
    params = init_params(kp, n_features, n_actions, n_neurons, n_atoms)
    support = jnp.linspace(v_min, v_max, n_atoms, dtype=jnp.float32)

    out = c51_forward(x, params, support, n_actions, n_atoms)
    out = jax.block_until_ready(out)

    ref = reference_forward(x, params, support, n_actions, n_atoms)
    assert out.shape == (batch, n_actions), out.shape
    assert bool(jnp.all(jnp.isfinite(out))), out
    # Kernel and reference use the same matmul precision; divide is exact now,
    # so differences are only accumulation-order level.
    assert jnp.allclose(out, ref, atol=1e-2, rtol=1e-2), (out, ref)

    print("KERNEL_OK")
</pallas_src>

<mosaic_0001>
module attributes {stable_mosaic.version = 11 : i64} {
  func.func @_c51_kernel(%arg0: i32, %arg1: memref<16x4xbf16, #tpu.memory_space<vmem>>, %arg2: memref<4x16xbf16, #tpu.memory_space<vmem>>, %arg3: memref<1x16xf32, #tpu.memory_space<vmem>>, %arg4: memref<16x16xbf16, #tpu.memory_space<vmem>>, %arg5: memref<1x16xf32, #tpu.memory_space<vmem>>, %arg6: memref<16x256xbf16, #tpu.memory_space<vmem>>, %arg7: memref<1x256xf32, #tpu.memory_space<vmem>>, %arg8: memref<256x128xf32, #tpu.memory_space<vmem>>, %arg9: memref<256x128xf32, #tpu.memory_space<vmem>>, %arg10: memref<16x128xf32, #tpu.memory_space<vmem>>) attributes {dimension_semantics = [#tpu.dimension_semantics<parallel>], iteration_bounds = array<i64: 1>, scalar_prefetch = 0 : i64, scratch_operands = 0 : i64, tpu.core_type = #tpu.core_type<tc>, window_params = [{transform_indices = @transform_0, window_bounds = array<i64: 16, 4>}, {pipeline_mode = #tpu.pipeline_mode<synchronous>, transform_indices = @transform_1, window_bounds = array<i64: 4, 16>}, {pipeline_mode = #tpu.pipeline_mode<synchronous>, transform_indices = @transform_2, window_bounds = array<i64: 1, 16>}, {pipeline_mode = #tpu.pipeline_mode<synchronous>, transform_indices = @transform_3, window_bounds = array<i64: 16, 16>}, {pipeline_mode = #tpu.pipeline_mode<synchronous>, transform_indices = @transform_4, window_bounds = array<i64: 1, 16>}, {pipeline_mode = #tpu.pipeline_mode<synchronous>, transform_indices = @transform_5, window_bounds = array<i64: 16, 256>}, {pipeline_mode = #tpu.pipeline_mode<synchronous>, transform_indices = @transform_6, window_bounds = array<i64: 1, 256>}, {pipeline_mode = #tpu.pipeline_mode<synchronous>, transform_indices = @transform_7, window_bounds = array<i64: 256, 128>}, {pipeline_mode = #tpu.pipeline_mode<synchronous>, transform_indices = @transform_8, window_bounds = array<i64: 256, 128>}, {transform_indices = @transform_9, window_bounds = array<i64: 16, 128>}]} {
    %c0 = arith.constant 0 : index
    %c0_0 = arith.constant 0 : index
    %0 = vector.load %arg1[%c0, %c0_0] : memref<16x4xbf16, #tpu.memory_space<vmem>>, vector<16x4xbf16>
    %c0_1 = arith.constant 0 : index
    %c0_2 = arith.constant 0 : index
    %1 = vector.load %arg2[%c0_1, %c0_2] : memref<4x16xbf16, #tpu.memory_space<vmem>>, vector<4x16xbf16>
    %cst = arith.constant dense<0.000000e+00> : vector<16x16xf32>
    %2 = tpu.matmul %0, %1, %cst {dimension_numbers = #tpu.dot_dimension_numbers<[1], [0], [0], [1], [0, 0, 1, 1], [], []>} : vector<16x4xbf16>, vector<4x16xbf16>, vector<16x16xf32> -> vector<16x16xf32>
    %c0_3 = arith.constant 0 : index
    %c0_4 = arith.constant 0 : index
    %3 = vector.load %arg3[%c0_3, %c0_4] : memref<1x16xf32, #tpu.memory_space<vmem>>, vector<1x16xf32>
    %4 = vector.broadcast %3 : vector<1x16xf32> to vector<16x16xf32>
    %5 = arith.addf %2, %4 : vector<16x16xf32>
    %cst_5 = arith.constant 0.000000e+00 : f32
    %6 = vector.broadcast %cst_5 : f32 to vector<16x16xf32>
    %7 = arith.maximumf %5, %6 : vector<16x16xf32>
    %8 = arith.truncf %7 : vector<16x16xf32> to vector<16x16xbf16>
    %c0_6 = arith.constant 0 : index
    %c0_7 = arith.constant 0 : index
    %9 = vector.load %arg4[%c0_6, %c0_7] : memref<16x16xbf16, #tpu.memory_space<vmem>>, vector<16x16xbf16>
    %cst_8 = arith.constant dense<0.000000e+00> : vector<16x16xf32>
    %10 = tpu.matmul %8, %9, %cst_8 {dimension_numbers = #tpu.dot_dimension_numbers<[1], [0], [0], [1], [0, 0, 1, 1], [], []>} : vector<16x16xbf16>, vector<16x16xbf16>, vector<16x16xf32> -> vector<16x16xf32>
    %c0_9 = arith.constant 0 : index
    %c0_10 = arith.constant 0 : index
    %11 = vector.load %arg5[%c0_9, %c0_10] : memref<1x16xf32, #tpu.memory_space<vmem>>, vector<1x16xf32>
    %12 = vector.broadcast %11 : vector<1x16xf32> to vector<16x16xf32>
    %13 = arith.addf %10, %12 : vector<16x16xf32>
    %cst_11 = arith.constant 0.000000e+00 : f32
    %14 = vector.broadcast %cst_11 : f32 to vector<16x16xf32>
    %15 = arith.maximumf %13, %14 : vector<16x16xf32>
    %16 = arith.truncf %15 : vector<16x16xf32> to vector<16x16xbf16>
    %c0_12 = arith.constant 0 : index
    %c0_13 = arith.constant 0 : index
    %17 = vector.load %arg6[%c0_12, %c0_13] : memref<16x256xbf16, #tpu.memory_space<vmem>>, vector<16x256xbf16>
    %cst_14 = arith.constant dense<0.000000e+00> : vector<16x256xf32>
    %18 = tpu.matmul %16, %17, %cst_14 {dimension_numbers = #tpu.dot_dimension_numbers<[1], [0], [0], [1], [0, 0, 1, 1], [], []>} : vector<16x16xbf16>, vector<16x256xbf16>, vector<16x256xf32> -> vector<16x256xf32>
    %c0_15 = arith.constant 0 : index
    %c0_16 = arith.constant 0 : index
    %19 = vector.load %arg7[%c0_15, %c0_16] : memref<1x256xf32, #tpu.memory_space<vmem>>, vector<1x256xf32>
    %20 = vector.broadcast %19 : vector<1x256xf32> to vector<16x256xf32>
    %21 = arith.addf %18, %20 : vector<16x256xf32>
    %22 = vector.shape_cast %21 : vector<16x256xf32> to vector<16x2x128xf32>
    %cst_17 = arith.constant dense<0xFF800000> : vector<16x2xf32>
    %23 = vector.multi_reduction <maximumf>, %22, %cst_17 [2] : vector<16x2x128xf32> to vector<16x2xf32>
    %24 = vector.shape_cast %23 : vector<16x2xf32> to vector<16x2x1xf32>
    %25 = vector.broadcast %24 : vector<16x2x1xf32> to vector<16x2x128xf32>
    %26 = arith.subf %22, %25 : vector<16x2x128xf32>
    %27 = math.exp %26 : vector<16x2x128xf32>
    %28 = vector.shape_cast %27 : vector<16x2x128xf32> to vector<16x256xf32>
    %c0_18 = arith.constant 0 : index
    %c0_19 = arith.constant 0 : index
    %29 = vector.load %arg8[%c0_18, %c0_19] : memref<256x128xf32, #tpu.memory_space<vmem>>, vector<256x128xf32>
    %cst_20 = arith.constant dense<0.000000e+00> : vector<16x128xf32>
    %30 = tpu.matmul %28, %29, %cst_20 {dimension_numbers = #tpu.dot_dimension_numbers<[1], [0], [0], [1], [0, 0, 1, 1], [], []>} : vector<16x256xf32>, vector<256x128xf32>, vector<16x128xf32> -> vector<16x128xf32>
    %c0_21 = arith.constant 0 : index
    %c0_22 = arith.constant 0 : index
    %31 = vector.load %arg9[%c0_21, %c0_22] : memref<256x128xf32, #tpu.memory_space<vmem>>, vector<256x128xf32>
    %cst_23 = arith.constant dense<0.000000e+00> : vector<16x128xf32>
    %32 = tpu.matmul %28, %31, %cst_23 {dimension_numbers = #tpu.dot_dimension_numbers<[1], [0], [0], [1], [0, 0, 1, 1], [], []>} : vector<16x256xf32>, vector<256x128xf32>, vector<16x128xf32> -> vector<16x128xf32>
    %33 = tpu.iota {dimensions = array<i32: 1>} : vector<1x128xi32>
    %c2_i32 = arith.constant 2 : i32
    %34 = vector.broadcast %c2_i32 : i32 to vector<1x128xi32>
    %35 = arith.cmpi sge, %33, %34 : vector<1x128xi32>
    %36 = arith.extui %35 : vector<1x128xi1> to vector<1x128xi32>
    %37 = arith.sitofp %36 : vector<1x128xi32> to vector<1x128xf32>
    %38 = vector.broadcast %37 : vector<1x128xf32> to vector<16x128xf32>
    %39 = arith.addf %32, %38 : vector<16x128xf32>
    %40 = arith.divf %30, %39 : vector<16x128xf32>
    %c0_24 = arith.constant 0 : index
    %c0_25 = arith.constant 0 : index
    %41 = vector.load %arg10[%c0_24, %c0_25] : memref<16x128xf32, #tpu.memory_space<vmem>>, vector<16x128xf32>
    tpu.vector_store %arg10[%c0_24, %c0_25], %40 {strides = array<i32>} : memref<16x128xf32, #tpu.memory_space<vmem>>, vector<16x128xf32>,
    return
  }
  func.func @transform_0(%arg0: i32) -> (i32, i32) {
    %c0_i32 = arith.constant 0 : i32
    %c0_i32_0 = arith.constant 0 : i32
    return %arg0, %c0_i32 : i32, i32
  }
  func.func @transform_1(%arg0: i32) -> (i32, i32) {
    %c0_i32 = arith.constant 0 : i32
    %c0_i32_0 = arith.constant 0 : i32
    %c0_i32_1 = arith.constant 0 : i32
    return %c0_i32, %c0_i32_0 : i32, i32
  }
  func.func @transform_2(%arg0: i32) -> (i32, i32) {
    %c0_i32 = arith.constant 0 : i32
    %c0_i32_0 = arith.constant 0 : i32
    %c0_i32_1 = arith.constant 0 : i32
    return %c0_i32, %c0_i32_0 : i32, i32
  }
  func.func @transform_3(%arg0: i32) -> (i32, i32) {
    %c0_i32 = arith.constant 0 : i32
    %c0_i32_0 = arith.constant 0 : i32
    %c0_i32_1 = arith.constant 0 : i32
    return %c0_i32, %c0_i32_0 : i32, i32
  }
  func.func @transform_4(%arg0: i32) -> (i32, i32) {
    %c0_i32 = arith.constant 0 : i32
    %c0_i32_0 = arith.constant 0 : i32
    %c0_i32_1 = arith.constant 0 : i32
    return %c0_i32, %c0_i32_0 : i32, i32
  }
  func.func @transform_5(%arg0: i32) -> (i32, i32) {
    %c0_i32 = arith.constant 0 : i32
    %c0_i32_0 = arith.constant 0 : i32
    %c0_i32_1 = arith.constant 0 : i32
    return %c0_i32, %c0_i32_0 : i32, i32
  }
  func.func @transform_6(%arg0: i32) -> (i32, i32) {
    %c0_i32 = arith.constant 0 : i32
    %c0_i32_0 = arith.constant 0 : i32
    %c0_i32_1 = arith.constant 0 : i32
    return %c0_i32, %c0_i32_0 : i32, i32
  }
  func.func @transform_7(%arg0: i32) -> (i32, i32) {
    %c0_i32 = arith.constant 0 : i32
    %c0_i32_0 = arith.constant 0 : i32
    %c0_i32_1 = arith.constant 0 : i32
    return %c0_i32, %c0_i32_0 : i32, i32
  }
  func.func @transform_8(%arg0: i32) -> (i32, i32) {
    %c0_i32 = arith.constant 0 : i32
    %c0_i32_0 = arith.constant 0 : i32
    %c0_i32_1 = arith.constant 0 : i32
    return %c0_i32, %c0_i32_0 : i32, i32
  }
  func.func @transform_9(%arg0: i32) -> (i32, i32) {
    %c0_i32 = arith.constant 0 : i32
    %c0_i32_0 = arith.constant 0 : i32
    return %arg0, %c0_i32 : i32, i32
  }
}

module attributes {stable_mosaic.version = 11 : i64} {
  func.func @_c51_kernel(%arg0: i32, %arg1: memref<16x4xbf16, #tpu.memory_space<vmem>>, %arg2: memref<4x16xbf16, #tpu.memory_space<vmem>>, %arg3: memref<1x16xf32, #tpu.memory_space<vmem>>, %arg4: memref<16x16xbf16, #tpu.memory_space<vmem>>, %arg5: memref<1x16xf32, #tpu.memory_space<vmem>>, %arg6: memref<16x256xbf16, #tpu.memory_space<vmem>>, %arg7: memref<1x256xf32, #tpu.memory_space<vmem>>, %arg8: memref<256x128xf32, #tpu.memory_space<vmem>>, %arg9: memref<256x128xf32, #tpu.memory_space<vmem>>, %arg10: memref<16x128xf32, #tpu.memory_space<vmem>>) attributes {dimension_semantics = [#tpu.dimension_semantics<parallel>], iteration_bounds = array<i64: 1>, scalar_prefetch = 0 : i64, scratch_operands = 0 : i64, tpu.core_type = #tpu.core_type<tc>, window_params = [{transform_indices = @transform_0, window_bounds = array<i64: 16, 4>}, {pipeline_mode = #tpu.pipeline_mode<synchronous>, transform_indices = @transform_1, window_bounds = array<i64: 4, 16>}, {pipeline_mode = #tpu.pipeline_mode<synchronous>, transform_indices = @transform_2, window_bounds = array<i64: 1, 16>}, {pipeline_mode = #tpu.pipeline_mode<synchronous>, transform_indices = @transform_3, window_bounds = array<i64: 16, 16>}, {pipeline_mode = #tpu.pipeline_mode<synchronous>, transform_indices = @transform_4, window_bounds = array<i64: 1, 16>}, {pipeline_mode = #tpu.pipeline_mode<synchronous>, transform_indices = @transform_5, window_bounds = array<i64: 16, 256>}, {pipeline_mode = #tpu.pipeline_mode<synchronous>, transform_indices = @transform_6, window_bounds = array<i64: 1, 256>}, {pipeline_mode = #tpu.pipeline_mode<synchronous>, transform_indices = @transform_7, window_bounds = array<i64: 256, 128>}, {pipeline_mode = #tpu.pipeline_mode<synchronous>, transform_indices = @transform_8, window_bounds = array<i64: 256, 128>}, {transform_indices = @transform_9, window_bounds = array<i64: 16, 128>}]} {
    %c0 = arith.constant 0 : index
    %c0_0 = arith.constant 0 : index
    %0 = vector.load %arg1[%c0, %c0_0] : memref<16x4xbf16, #tpu.memory_space<vmem>>, vector<16x4xbf16>
    %c0_1 = arith.constant 0 : index
    %c0_2 = arith.constant 0 : index
    %1 = vector.load %arg2[%c0_1, %c0_2] : memref<4x16xbf16, #tpu.memory_space<vmem>>, vector<4x16xbf16>
    %cst = arith.constant dense<0.000000e+00> : vector<16x16xf32>
    %2 = tpu.matmul %0, %1, %cst {dimension_numbers = #tpu.dot_dimension_numbers<[1], [0], [0], [1], [0, 0, 1, 1], [], []>} : vector<16x4xbf16>, vector<4x16xbf16>, vector<16x16xf32> -> vector<16x16xf32>
    %c0_3 = arith.constant 0 : index
    %c0_4 = arith.constant 0 : index
    %3 = vector.load %arg3[%c0_3, %c0_4] : memref<1x16xf32, #tpu.memory_space<vmem>>, vector<1x16xf32>
    %4 = vector.broadcast %3 : vector<1x16xf32> to vector<16x16xf32>
    %5 = arith.addf %2, %4 : vector<16x16xf32>
    %cst_5 = arith.constant 0.000000e+00 : f32
    %6 = vector.broadcast %cst_5 : f32 to vector<16x16xf32>
    %7 = arith.maximumf %5, %6 : vector<16x16xf32>
    %8 = arith.truncf %7 : vector<16x16xf32> to vector<16x16xbf16>
    %c0_6 = arith.constant 0 : index
    %c0_7 = arith.constant 0 : index
    %9 = vector.load %arg4[%c0_6, %c0_7] : memref<16x16xbf16, #tpu.memory_space<vmem>>, vector<16x16xbf16>
    %cst_8 = arith.constant dense<0.000000e+00> : vector<16x16xf32>
    %10 = tpu.matmul %8, %9, %cst_8 {dimension_numbers = #tpu.dot_dimension_numbers<[1], [0], [0], [1], [0, 0, 1, 1], [], []>} : vector<16x16xbf16>, vector<16x16xbf16>, vector<16x16xf32> -> vector<16x16xf32>
    %c0_9 = arith.constant 0 : index
    %c0_10 = arith.constant 0 : index
    %11 = vector.load %arg5[%c0_9, %c0_10] : memref<1x16xf32, #tpu.memory_space<vmem>>, vector<1x16xf32>
    %12 = vector.broadcast %11 : vector<1x16xf32> to vector<16x16xf32>
    %13 = arith.addf %10, %12 : vector<16x16xf32>
    %cst_11 = arith.constant 0.000000e+00 : f32
    %14 = vector.broadcast %cst_11 : f32 to vector<16x16xf32>
    %15 = arith.maximumf %13, %14 : vector<16x16xf32>
    %16 = arith.truncf %15 : vector<16x16xf32> to vector<16x16xbf16>
    %c0_12 = arith.constant 0 : index
    %c0_13 = arith.constant 0 : index
    %17 = vector.load %arg6[%c0_12, %c0_13] : memref<16x256xbf16, #tpu.memory_space<vmem>>, vector<16x256xbf16>
    %cst_14 = arith.constant dense<0.000000e+00> : vector<16x256xf32>
    %18 = tpu.matmul %16, %17, %cst_14 {dimension_numbers = #tpu.dot_dimension_numbers<[1], [0], [0], [1], [0, 0, 1, 1], [], []>} : vector<16x16xbf16>, vector<16x256xbf16>, vector<16x256xf32> -> vector<16x256xf32>
    %c0_15 = arith.constant 0 : index
    %c0_16 = arith.constant 0 : index
    %19 = vector.load %arg7[%c0_15, %c0_16] : memref<1x256xf32, #tpu.memory_space<vmem>>, vector<1x256xf32>
    %20 = vector.broadcast %19 : vector<1x256xf32> to vector<16x256xf32>
    %21 = arith.addf %18, %20 : vector<16x256xf32>
    %22 = vector.shape_cast %21 : vector<16x256xf32> to vector<16x2x128xf32>
    %cst_17 = arith.constant dense<0xFF800000> : vector<16x2xf32>
    %23 = vector.multi_reduction <maximumf>, %22, %cst_17 [2] : vector<16x2x128xf32> to vector<16x2xf32>
    %24 = vector.shape_cast %23 : vector<16x2xf32> to vector<16x2x1xf32>
    %25 = vector.broadcast %24 : vector<16x2x1xf32> to vector<16x2x128xf32>
    %26 = arith.subf %22, %25 : vector<16x2x128xf32>
    %27 = math.exp %26 : vector<16x2x128xf32>
    %28 = vector.shape_cast %27 : vector<16x2x128xf32> to vector<16x256xf32>
    %c0_18 = arith.constant 0 : index
    %c0_19 = arith.constant 0 : index
    %29 = vector.load %arg8[%c0_18, %c0_19] : memref<256x128xf32, #tpu.memory_space<vmem>>, vector<256x128xf32>
    %cst_20 = arith.constant dense<0.000000e+00> : vector<16x128xf32>
    %30 = tpu.matmul %28, %29, %cst_20 {dimension_numbers = #tpu.dot_dimension_numbers<[1], [0], [0], [1], [0, 0, 1, 1], [], []>} : vector<16x256xf32>, vector<256x128xf32>, vector<16x128xf32> -> vector<16x128xf32>
    %c0_21 = arith.constant 0 : index
    %c0_22 = arith.constant 0 : index
    %31 = vector.load %arg9[%c0_21, %c0_22] : memref<256x128xf32, #tpu.memory_space<vmem>>, vector<256x128xf32>
    %cst_23 = arith.constant dense<0.000000e+00> : vector<16x128xf32>
    %32 = tpu.matmul %28, %31, %cst_23 {dimension_numbers = #tpu.dot_dimension_numbers<[1], [0], [0], [1], [0, 0, 1, 1], [], []>} : vector<16x256xf32>, vector<256x128xf32>, vector<16x128xf32> -> vector<16x128xf32>
    %33 = tpu.iota {dimensions = array<i32: 1>} : vector<1x128xi32>
    %c2_i32 = arith.constant 2 : i32
    %34 = vector.broadcast %c2_i32 : i32 to vector<1x128xi32>
    %35 = arith.cmpi sge, %33, %34 : vector<1x128xi32>
    %36 = arith.extui %35 : vector<1x128xi1> to vector<1x128xi32>
    %37 = arith.sitofp %36 : vector<1x128xi32> to vector<1x128xf32>
    %38 = vector.broadcast %37 : vector<1x128xf32> to vector<16x128xf32>
    %39 = arith.addf %32, %38 : vector<16x128xf32>
    %40 = arith.divf %30, %39 : vector<16x128xf32>
    %c0_24 = arith.constant 0 : index
    %c0_25 = arith.constant 0 : index
    %41 = vector.load %arg10[%c0_24, %c0_25] : memref<16x128xf32, #tpu.memory_space<vmem>>, vector<16x128xf32>
    tpu.vector_store %arg10[%c0_24, %c0_25], %40 {strides = array<i32>} : memref<16x128xf32, #tpu.memory_space<vmem>>, vector<16x128xf32>,
    return
  }
  func.func @transform_0(%arg0: i32) -> (i32, i32) {
    %c0_i32 = arith.constant 0 : i32
    %c0_i32_0 = arith.constant 0 : i32
    return %arg0, %c0_i32 : i32, i32
  }
  func.func @transform_1(%arg0: i32) -> (i32, i32) {
    %c0_i32 = arith.constant 0 : i32
    %c0_i32_0 = arith.constant 0 : i32
    %c0_i32_1 = arith.constant 0 : i32
    return %c0_i32, %c0_i32_0 : i32, i32
  }
  func.func @transform_2(%arg0: i32) -> (i32, i32) {
    %c0_i32 = arith.constant 0 : i32
    %c0_i32_0 = arith.constant 0 : i32
    %c0_i32_1 = arith.constant 0 : i32
    return %c0_i32, %c0_i32_0 : i32, i32
  }
  func.func @transform_3(%arg0: i32) -> (i32, i32) {
    %c0_i32 = arith.constant 0 : i32
    %c0_i32_0 = arith.constant 0 : i32
    %c0_i32_1 = arith.constant 0 : i32
    return %c0_i32, %c0_i32_0 : i32, i32
  }
  func.func @transform_4(%arg0: i32) -> (i32, i32) {
    %c0_i32 = arith.constant 0 : i32
    %c0_i32_0 = arith.constant 0 : i32
    %c0_i32_1 = arith.constant 0 : i32
    return %c0_i32, %c0_i32_0 : i32, i32
  }
  func.func @transform_5(%arg0: i32) -> (i32, i32) {
    %c0_i32 = arith.constant 0 : i32
    %c0_i32_0 = arith.constant 0 : i32
    %c0_i32_1 = arith.constant 0 : i32
    return %c0_i32, %c0_i32_0 : i32, i32
  }
  func.func @transform_6(%arg0: i32) -> (i32, i32) {
    %c0_i32 = arith.constant 0 : i32
    %c0_i32_0 = arith.constant 0 : i32
    %c0_i32_1 = arith.constant 0 : i32
    return %c0_i32, %c0_i32_0 : i32, i32
  }
  func.func @transform_7(%arg0: i32) -> (i32, i32) {
    %c0_i32 = arith.constant 0 : i32
    %c0_i32_0 = arith.constant 0 : i32
    %c0_i32_1 = arith.constant 0 : i32
    return %c0_i32, %c0_i32_0 : i32, i32
  }
  func.func @transform_8(%arg0: i32) -> (i32, i32) {
    %c0_i32 = arith.constant 0 : i32
    %c0_i32_0 = arith.constant 0 : i32
    %c0_i32_1 = arith.constant 0 : i32
    return %c0_i32, %c0_i32_0 : i32, i32
  }
  func.func @transform_9(%arg0: i32) -> (i32, i32) {
    %c0_i32 = arith.constant 0 : i32
    %c0_i32_0 = arith.constant 0 : i32
    return %arg0, %c0_i32 : i32, i32
  }
}

module attributes {stable_mosaic.version = 11 : i64} {
  func.func @_c51_kernel(%arg0: i32, %arg1: memref<16x4xbf16, #tpu.memory_space<vmem>>, %arg2: memref<4x16xbf16, #tpu.memory_space<vmem>>, %arg3: memref<1x16xf32, #tpu.memory_space<vmem>>, %arg4: memref<16x16xbf16, #tpu.memory_space<vmem>>, %arg5: memref<1x16xf32, #tpu.memory_space<vmem>>, %arg6: memref<16x256xbf16, #tpu.memory_space<vmem>>, %arg7: memref<1x256xf32, #tpu.memory_space<vmem>>, %arg8: memref<256x128xf32, #tpu.memory_space<vmem>>, %arg9: memref<256x128xf32, #tpu.memory_space<vmem>>, %arg10: memref<16x128xf32, #tpu.memory_space<vmem>>) attributes {dimension_semantics = [#tpu.dimension_semantics<parallel>], iteration_bounds = array<i64: 1>, scalar_prefetch = 0 : i64, scratch_operands = 0 : i64, tpu.core_type = #tpu.core_type<tc>, window_params = [{transform_indices = @transform_0, window_bounds = array<i64: 16, 4>}, {pipeline_mode = #tpu.pipeline_mode<synchronous>, transform_indices = @transform_1, window_bounds = array<i64: 4, 16>}, {pipeline_mode = #tpu.pipeline_mode<synchronous>, transform_indices = @transform_2, window_bounds = array<i64: 1, 16>}, {pipeline_mode = #tpu.pipeline_mode<synchronous>, transform_indices = @transform_3, window_bounds = array<i64: 16, 16>}, {pipeline_mode = #tpu.pipeline_mode<synchronous>, transform_indices = @transform_4, window_bounds = array<i64: 1, 16>}, {pipeline_mode = #tpu.pipeline_mode<synchronous>, transform_indices = @transform_5, window_bounds = array<i64: 16, 256>}, {pipeline_mode = #tpu.pipeline_mode<synchronous>, transform_indices = @transform_6, window_bounds = array<i64: 1, 256>}, {pipeline_mode = #tpu.pipeline_mode<synchronous>, transform_indices = @transform_7, window_bounds = array<i64: 256, 128>}, {pipeline_mode = #tpu.pipeline_mode<synchronous>, transform_indices = @transform_8, window_bounds = array<i64: 256, 128>}, {transform_indices = @transform_9, window_bounds = array<i64: 16, 128>}]} {
    %c0 = arith.constant 0 : index
    %c0_0 = arith.constant 0 : index
    %0 = vector.load %arg1[%c0, %c0_0] : memref<16x4xbf16, #tpu.memory_space<vmem>>, vector<16x4xbf16>
    %c0_1 = arith.constant 0 : index
    %c0_2 = arith.constant 0 : index
    %1 = vector.load %arg2[%c0_1, %c0_2] : memref<4x16xbf16, #tpu.memory_space<vmem>>, vector<4x16xbf16>
    %cst = arith.constant dense<0.000000e+00> : vector<16x16xf32>
    %2 = tpu.matmul %0, %1, %cst {dimension_numbers = #tpu.dot_dimension_numbers<[1], [0], [0], [1], [0, 0, 1, 1], [], []>} : vector<16x4xbf16>, vector<4x16xbf16>, vector<16x16xf32> -> vector<16x16xf32>
    %c0_3 = arith.constant 0 : index
    %c0_4 = arith.constant 0 : index
    %3 = vector.load %arg3[%c0_3, %c0_4] : memref<1x16xf32, #tpu.memory_space<vmem>>, vector<1x16xf32>
    %4 = vector.broadcast %3 : vector<1x16xf32> to vector<16x16xf32>
    %5 = arith.addf %2, %4 : vector<16x16xf32>
    %cst_5 = arith.constant 0.000000e+00 : f32
    %6 = vector.broadcast %cst_5 : f32 to vector<16x16xf32>
    %7 = arith.maximumf %5, %6 : vector<16x16xf32>
    %8 = arith.truncf %7 : vector<16x16xf32> to vector<16x16xbf16>
    %c0_6 = arith.constant 0 : index
    %c0_7 = arith.constant 0 : index
    %9 = vector.load %arg4[%c0_6, %c0_7] : memref<16x16xbf16, #tpu.memory_space<vmem>>, vector<16x16xbf16>
    %cst_8 = arith.constant dense<0.000000e+00> : vector<16x16xf32>
    %10 = tpu.matmul %8, %9, %cst_8 {dimension_numbers = #tpu.dot_dimension_numbers<[1], [0], [0], [1], [0, 0, 1, 1], [], []>} : vector<16x16xbf16>, vector<16x16xbf16>, vector<16x16xf32> -> vector<16x16xf32>
    %c0_9 = arith.constant 0 : index
    %c0_10 = arith.constant 0 : index
    %11 = vector.load %arg5[%c0_9, %c0_10] : memref<1x16xf32, #tpu.memory_space<vmem>>, vector<1x16xf32>
    %12 = vector.broadcast %11 : vector<1x16xf32> to vector<16x16xf32>
    %13 = arith.addf %10, %12 : vector<16x16xf32>
    %cst_11 = arith.constant 0.000000e+00 : f32
    %14 = vector.broadcast %cst_11 : f32 to vector<16x16xf32>
    %15 = arith.maximumf %13, %14 : vector<16x16xf32>
    %16 = arith.truncf %15 : vector<16x16xf32> to vector<16x16xbf16>
    %c0_12 = arith.constant 0 : index
    %c0_13 = arith.constant 0 : index
    %17 = vector.load %arg6[%c0_12, %c0_13] : memref<16x256xbf16, #tpu.memory_space<vmem>>, vector<16x256xbf16>
    %cst_14 = arith.constant dense<0.000000e+00> : vector<16x256xf32>
    %18 = tpu.matmul %16, %17, %cst_14 {dimension_numbers = #tpu.dot_dimension_numbers<[1], [0], [0], [1], [0, 0, 1, 1], [], []>} : vector<16x16xbf16>, vector<16x256xbf16>, vector<16x256xf32> -> vector<16x256xf32>
    %c0_15 = arith.constant 0 : index
    %c0_16 = arith.constant 0 : index
    %19 = vector.load %arg7[%c0_15, %c0_16] : memref<1x256xf32, #tpu.memory_space<vmem>>, vector<1x256xf32>
    %20 = vector.broadcast %19 : vector<1x256xf32> to vector<16x256xf32>
    %21 = arith.addf %18, %20 : vector<16x256xf32>
    %22 = vector.extract_strided_slice %21 {offsets = [0, 0], sizes = [16, 128], strides = [1, 1]} : vector<16x256xf32> to vector<16x128xf32>
    %cst_17 = arith.constant dense<0xFF800000> : vector<16xf32>
    %23 = vector.multi_reduction <maximumf>, %22, %cst_17 [1] : vector<16x128xf32> to vector<16xf32>
    %24 = vector.shape_cast %23 : vector<16xf32> to vector<16x1xf32>
    %25 = vector.broadcast %24 : vector<16x1xf32> to vector<16x128xf32>
    %26 = arith.subf %22, %25 : vector<16x128xf32>
    %27 = math.exp %26 : vector<16x128xf32>
    %28 = vector.extract_strided_slice %21 {offsets = [0, 128], sizes = [16, 128], strides = [1, 1]} : vector<16x256xf32> to vector<16x128xf32>
    %cst_18 = arith.constant dense<0xFF800000> : vector<16xf32>
    %29 = vector.multi_reduction <maximumf>, %28, %cst_18 [1] : vector<16x128xf32> to vector<16xf32>
    %30 = vector.shape_cast %29 : vector<16xf32> to vector<16x1xf32>
    %31 = vector.broadcast %30 : vector<16x1xf32> to vector<16x128xf32>
    %32 = arith.subf %28, %31 : vector<16x128xf32>
    %33 = math.exp %32 : vector<16x128xf32>
    %34 = tpu.concatenate %27, %33 in 1 : vector<16x128xf32>, vector<16x128xf32> -> vector<16x256xf32>
    %c0_19 = arith.constant 0 : index
    %c0_20 = arith.constant 0 : index
    %35 = vector.load %arg8[%c0_19, %c0_20] : memref<256x128xf32, #tpu.memory_space<vmem>>, vector<256x128xf32>
    %cst_21 = arith.constant dense<0.000000e+00> : vector<16x128xf32>
    %36 = tpu.matmul %34, %35, %cst_21 {dimension_numbers = #tpu.dot_dimension_numbers<[1], [0], [0], [1], [0, 0, 1, 1], [], []>} : vector<16x256xf32>, vector<256x128xf32>, vector<16x128xf32> -> vector<16x128xf32>
    %c0_22 = arith.constant 0 : index
    %c0_23 = arith.constant 0 : index
    %37 = vector.load %arg9[%c0_22, %c0_23] : memref<256x128xf32, #tpu.memory_space<vmem>>, vector<256x128xf32>
    %cst_24 = arith.constant dense<0.000000e+00> : vector<16x128xf32>
    %38 = tpu.matmul %34, %37, %cst_24 {dimension_numbers = #tpu.dot_dimension_numbers<[1], [0], [0], [1], [0, 0, 1, 1], [], []>} : vector<16x256xf32>, vector<256x128xf32>, vector<16x128xf32> -> vector<16x128xf32>
    %39 = tpu.iota {dimensions = array<i32: 1>} : vector<1x128xi32>
    %c2_i32 = arith.constant 2 : i32
    %40 = vector.broadcast %c2_i32 : i32 to vector<1x128xi32>
    %41 = arith.cmpi sge, %39, %40 : vector<1x128xi32>
    %42 = arith.extui %41 : vector<1x128xi1> to vector<1x128xi32>
    %43 = arith.sitofp %42 : vector<1x128xi32> to vector<1x128xf32>
    %44 = vector.broadcast %43 : vector<1x128xf32> to vector<16x128xf32>
    %45 = arith.addf %38, %44 : vector<16x128xf32>
    %46 = arith.divf %36, %45 : vector<16x128xf32>
    %c0_25 = arith.constant 0 : index
    %c0_26 = arith.constant 0 : index
    %47 = vector.load %arg10[%c0_25, %c0_26] : memref<16x128xf32, #tpu.memory_space<vmem>>, vector<16x128xf32>
    tpu.vector_store %arg10[%c0_25, %c0_26], %46 {strides = array<i32>} : memref<16x128xf32, #tpu.memory_space<vmem>>, vector<16x128xf32>,
    return
  }
  func.func @transform_0(%arg0: i32) -> (i32, i32) {
    %c0_i32 = arith.constant 0 : i32
    %c0_i32_0 = arith.constant 0 : i32
    return %arg0, %c0_i32 : i32, i32
  }
  func.func @transform_1(%arg0: i32) -> (i32, i32) {
    %c0_i32 = arith.constant 0 : i32
    %c0_i32_0 = arith.constant 0 : i32
    %c0_i32_1 = arith.constant 0 : i32
    return %c0_i32, %c0_i32_0 : i32, i32
  }
  func.func @transform_2(%arg0: i32) -> (i32, i32) {
    %c0_i32 = arith.constant 0 : i32
    %c0_i32_0 = arith.constant 0 : i32
    %c0_i32_1 = arith.constant 0 : i32
    return %c0_i32, %c0_i32_0 : i32, i32
  }
  func.func @transform_3(%arg0: i32) -> (i32, i32) {
    %c0_i32 = arith.constant 0 : i32
    %c0_i32_0 = arith.constant 0 : i32
    %c0_i32_1 = arith.constant 0 : i32
    return %c0_i32, %c0_i32_0 : i32, i32
  }
  func.func @transform_4(%arg0: i32) -> (i32, i32) {
    %c0_i32 = arith.constant 0 : i32
    %c0_i32_0 = arith.constant 0 : i32
    %c0_i32_1 = arith.constant 0 : i32
    return %c0_i32, %c0_i32_0 : i32, i32
  }
  func.func @transform_5(%arg0: i32) -> (i32, i32) {
    %c0_i32 = arith.constant 0 : i32
    %c0_i32_0 = arith.constant 0 : i32
    %c0_i32_1 = arith.constant 0 : i32
    return %c0_i32, %c0_i32_0 : i32, i32
  }
  func.func @transform_6(%arg0: i32) -> (i32, i32) {
    %c0_i32 = arith.constant 0 : i32
    %c0_i32_0 = arith.constant 0 : i32
    %c0_i32_1 = arith.constant 0 : i32
    return %c0_i32, %c0_i32_0 : i32, i32
  }
  func.func @transform_7(%arg0: i32) -> (i32, i32) {
    %c0_i32 = arith.constant 0 : i32
    %c0_i32_0 = arith.constant 0 : i32
    %c0_i32_1 = arith.constant 0 : i32
    return %c0_i32, %c0_i32_0 : i32, i32
  }
  func.func @transform_8(%arg0: i32) -> (i32, i32) {
    %c0_i32 = arith.constant 0 : i32
    %c0_i32_0 = arith.constant 0 : i32
    %c0_i32_1 = arith.constant 0 : i32
    return %c0_i32, %c0_i32_0 : i32, i32
  }
  func.func @transform_9(%arg0: i32) -> (i32, i32) {
    %c0_i32 = arith.constant 0 : i32
    %c0_i32_0 = arith.constant 0 : i32
    return %arg0, %c0_i32 : i32, i32
  }
}

module attributes {stable_mosaic.version = 11 : i64} {
  func.func @_c51_kernel(%arg0: i32, %arg1: memref<16x4xbf16, #tpu.memory_space<vmem>>, %arg2: memref<4x16xbf16, #tpu.memory_space<vmem>>, %arg3: memref<1x16xf32, #tpu.memory_space<vmem>>, %arg4: memref<16x16xbf16, #tpu.memory_space<vmem>>, %arg5: memref<1x16xf32, #tpu.memory_space<vmem>>, %arg6: memref<16x256xbf16, #tpu.memory_space<vmem>>, %arg7: memref<1x256xf32, #tpu.memory_space<vmem>>, %arg8: memref<256x128xf32, #tpu.memory_space<vmem>>, %arg9: memref<256x128xf32, #tpu.memory_space<vmem>>, %arg10: memref<16x128xf32, #tpu.memory_space<vmem>>) attributes {dimension_semantics = [#tpu.dimension_semantics<parallel>], iteration_bounds = array<i64: 1>, scalar_prefetch = 0 : i64, scratch_operands = 0 : i64, tpu.core_type = #tpu.core_type<tc>, window_params = [{transform_indices = @transform_0, window_bounds = array<i64: 16, 4>}, {pipeline_mode = #tpu.pipeline_mode<synchronous>, transform_indices = @transform_1, window_bounds = array<i64: 4, 16>}, {pipeline_mode = #tpu.pipeline_mode<synchronous>, transform_indices = @transform_2, window_bounds = array<i64: 1, 16>}, {pipeline_mode = #tpu.pipeline_mode<synchronous>, transform_indices = @transform_3, window_bounds = array<i64: 16, 16>}, {pipeline_mode = #tpu.pipeline_mode<synchronous>, transform_indices = @transform_4, window_bounds = array<i64: 1, 16>}, {pipeline_mode = #tpu.pipeline_mode<synchronous>, transform_indices = @transform_5, window_bounds = array<i64: 16, 256>}, {pipeline_mode = #tpu.pipeline_mode<synchronous>, transform_indices = @transform_6, window_bounds = array<i64: 1, 256>}, {pipeline_mode = #tpu.pipeline_mode<synchronous>, transform_indices = @transform_7, window_bounds = array<i64: 256, 128>}, {pipeline_mode = #tpu.pipeline_mode<synchronous>, transform_indices = @transform_8, window_bounds = array<i64: 256, 128>}, {transform_indices = @transform_9, window_bounds = array<i64: 16, 128>}]} {
    %c0 = arith.constant 0 : index
    %c0_0 = arith.constant 0 : index
    %0 = vector.load %arg1[%c0, %c0_0] : memref<16x4xbf16, #tpu.memory_space<vmem>>, vector<16x4xbf16>
    %c0_1 = arith.constant 0 : index
    %c0_2 = arith.constant 0 : index
    %1 = vector.load %arg2[%c0_1, %c0_2] : memref<4x16xbf16, #tpu.memory_space<vmem>>, vector<4x16xbf16>
    %cst = arith.constant dense<0.000000e+00> : vector<16x16xf32>
    %2 = tpu.matmul %0, %1, %cst {dimension_numbers = #tpu.dot_dimension_numbers<[1], [0], [0], [1], [0, 0, 1, 1], [], []>} : vector<16x4xbf16>, vector<4x16xbf16>, vector<16x16xf32> -> vector<16x16xf32>
    %c0_3 = arith.constant 0 : index
    %c0_4 = arith.constant 0 : index
    %3 = vector.load %arg3[%c0_3, %c0_4] : memref<1x16xf32, #tpu.memory_space<vmem>>, vector<1x16xf32>
    %4 = vector.broadcast %3 : vector<1x16xf32> to vector<16x16xf32>
    %5 = arith.addf %2, %4 : vector<16x16xf32>
    %cst_5 = arith.constant 0.000000e+00 : f32
    %6 = vector.broadcast %cst_5 : f32 to vector<16x16xf32>
    %7 = arith.maximumf %5, %6 : vector<16x16xf32>
    %8 = arith.truncf %7 : vector<16x16xf32> to vector<16x16xbf16>
    %c0_6 = arith.constant 0 : index
    %c0_7 = arith.constant 0 : index
    %9 = vector.load %arg4[%c0_6, %c0_7] : memref<16x16xbf16, #tpu.memory_space<vmem>>, vector<16x16xbf16>
    %cst_8 = arith.constant dense<0.000000e+00> : vector<16x16xf32>
    %10 = tpu.matmul %8, %9, %cst_8 {dimension_numbers = #tpu.dot_dimension_numbers<[1], [0], [0], [1], [0, 0, 1, 1], [], []>} : vector<16x16xbf16>, vector<16x16xbf16>, vector<16x16xf32> -> vector<16x16xf32>
    %c0_9 = arith.constant 0 : index
    %c0_10 = arith.constant 0 : index
    %11 = vector.load %arg5[%c0_9, %c0_10] : memref<1x16xf32, #tpu.memory_space<vmem>>, vector<1x16xf32>
    %12 = vector.broadcast %11 : vector<1x16xf32> to vector<16x16xf32>
    %13 = arith.addf %10, %12 : vector<16x16xf32>
    %cst_11 = arith.constant 0.000000e+00 : f32
    %14 = vector.broadcast %cst_11 : f32 to vector<16x16xf32>
    %15 = arith.maximumf %13, %14 : vector<16x16xf32>
    %16 = arith.truncf %15 : vector<16x16xf32> to vector<16x16xbf16>
    %c0_12 = arith.constant 0 : index
    %c0_13 = arith.constant 0 : index
    %17 = vector.load %arg6[%c0_12, %c0_13] : memref<16x256xbf16, #tpu.memory_space<vmem>>, vector<16x256xbf16>
    %cst_14 = arith.constant dense<0.000000e+00> : vector<16x256xf32>
    %18 = tpu.matmul %16, %17, %cst_14 {dimension_numbers = #tpu.dot_dimension_numbers<[1], [0], [0], [1], [0, 0, 1, 1], [], []>} : vector<16x16xbf16>, vector<16x256xbf16>, vector<16x256xf32> -> vector<16x256xf32>
    %c0_15 = arith.constant 0 : index
    %c0_16 = arith.constant 0 : index
    %19 = vector.load %arg7[%c0_15, %c0_16] : memref<1x256xf32, #tpu.memory_space<vmem>>, vector<1x256xf32>
    %20 = vector.broadcast %19 : vector<1x256xf32> to vector<16x256xf32>
    %21 = arith.addf %18, %20 : vector<16x256xf32>
    %22 = vector.extract_strided_slice %21 {offsets = [0, 0], sizes = [16, 128], strides = [1, 1]} : vector<16x256xf32> to vector<16x128xf32>
    %cst_17 = arith.constant dense<0xFF800000> : vector<16xf32>
    %23 = vector.multi_reduction <maximumf>, %22, %cst_17 [1] : vector<16x128xf32> to vector<16xf32>
    %24 = vector.shape_cast %23 : vector<16xf32> to vector<16x1xf32>
    %25 = vector.broadcast %24 : vector<16x1xf32> to vector<16x128xf32>
    %26 = arith.subf %22, %25 : vector<16x128xf32>
    %27 = math.exp %26 : vector<16x128xf32>
    %28 = vector.extract_strided_slice %21 {offsets = [0, 128], sizes = [16, 128], strides = [1, 1]} : vector<16x256xf32> to vector<16x128xf32>
    %cst_18 = arith.constant dense<0xFF800000> : vector<16xf32>
    %29 = vector.multi_reduction <maximumf>, %28, %cst_18 [1] : vector<16x128xf32> to vector<16xf32>
    %30 = vector.shape_cast %29 : vector<16xf32> to vector<16x1xf32>
    %31 = vector.broadcast %30 : vector<16x1xf32> to vector<16x128xf32>
    %32 = arith.subf %28, %31 : vector<16x128xf32>
    %33 = math.exp %32 : vector<16x128xf32>
    %34 = tpu.concatenate %27, %33 in 1 : vector<16x128xf32>, vector<16x128xf32> -> vector<16x256xf32>
    %c0_19 = arith.constant 0 : index
    %c0_20 = arith.constant 0 : index
    %35 = vector.load %arg8[%c0_19, %c0_20] : memref<256x128xf32, #tpu.memory_space<vmem>>, vector<256x128xf32>
    %cst_21 = arith.constant dense<0.000000e+00> : vector<16x128xf32>
    %36 = tpu.matmul %34, %35, %cst_21 {dimension_numbers = #tpu.dot_dimension_numbers<[1], [0], [0], [1], [0, 0, 1, 1], [], []>} : vector<16x256xf32>, vector<256x128xf32>, vector<16x128xf32> -> vector<16x128xf32>
    %c0_22 = arith.constant 0 : index
    %c0_23 = arith.constant 0 : index
    %37 = vector.load %arg9[%c0_22, %c0_23] : memref<256x128xf32, #tpu.memory_space<vmem>>, vector<256x128xf32>
    %cst_24 = arith.constant dense<0.000000e+00> : vector<16x128xf32>
    %38 = tpu.matmul %34, %37, %cst_24 {dimension_numbers = #tpu.dot_dimension_numbers<[1], [0], [0], [1], [0, 0, 1, 1], [], []>} : vector<16x256xf32>, vector<256x128xf32>, vector<16x128xf32> -> vector<16x128xf32>
    %39 = tpu.iota {dimensions = array<i32: 1>} : vector<1x128xi32>
    %c2_i32 = arith.constant 2 : i32
    %40 = vector.broadcast %c2_i32 : i32 to vector<1x128xi32>
    %41 = arith.cmpi sge, %39, %40 : vector<1x128xi32>
    %42 = arith.extui %41 : vector<1x128xi1> to vector<1x128xi32>
    %43 = arith.sitofp %42 : vector<1x128xi32> to vector<1x128xf32>
    %44 = vector.broadcast %43 : vector<1x128xf32> to vector<16x128xf32>
    %45 = arith.addf %38, %44 : vector<16x128xf32>
    %46 = arith.divf %36, %45 : vector<16x128xf32>
    %c0_25 = arith.constant 0 : index
    %c0_26 = arith.constant 0 : index
    %47 = vector.load %arg10[%c0_25, %c0_26] : memref<16x128xf32, #tpu.memory_space<vmem>>, vector<16x128xf32>
    tpu.vector_store %arg10[%c0_25, %c0_26], %46 {strides = array<i32>} : memref<16x128xf32, #tpu.memory_space<vmem>>, vector<16x128xf32>,
    return
  }
  func.func @transform_0(%arg0: i32) -> (i32, i32) {
    %c0_i32 = arith.constant 0 : i32
    %c0_i32_0 = arith.constant 0 : i32
    return %arg0, %c0_i32 : i32, i32
  }
  func.func @transform_1(%arg0: i32) -> (i32, i32) {
    %c0_i32 = arith.constant 0 : i32
    %c0_i32_0 = arith.constant 0 : i32
    %c0_i32_1 = arith.constant 0 : i32
    return %c0_i32, %c0_i32_0 : i32, i32
  }
  func.func @transform_2(%arg0: i32) -> (i32, i32) {
    %c0_i32 = arith.constant 0 : i32
    %c0_i32_0 = arith.constant 0 : i32
    %c0_i32_1 = arith.constant 0 : i32
    return %c0_i32, %c0_i32_0 : i32, i32
  }
  func.func @transform_3(%arg0: i32) -> (i32, i32) {
    %c0_i32 = arith.constant 0 : i32
    %c0_i32_0 = arith.constant 0 : i32
    %c0_i32_1 = arith.constant 0 : i32
    return %c0_i32, %c0_i32_0 : i32, i32
  }
  func.func @transform_4(%arg0: i32) -> (i32, i32) {
    %c0_i32 = arith.constant 0 : i32
    %c0_i32_0 = arith.constant 0 : i32
    %c0_i32_1 = arith.constant 0 : i32
    return %c0_i32, %c0_i32_0 : i32, i32
  }
  func.func @transform_5(%arg0: i32) -> (i32, i32) {
    %c0_i32 = arith.constant 0 : i32
    %c0_i32_0 = arith.constant 0 : i32
    %c0_i32_1 = arith.constant 0 : i32
    return %c0_i32, %c0_i32_0 : i32, i32
  }
  func.func @transform_6(%arg0: i32) -> (i32, i32) {
    %c0_i32 = arith.constant 0 : i32
    %c0_i32_0 = arith.constant 0 : i32
    %c0_i32_1 = arith.constant 0 : i32
    return %c0_i32, %c0_i32_0 : i32, i32
  }
  func.func @transform_7(%arg0: i32) -> (i32, i32) {
    %c0_i32 = arith.constant 0 : i32
    %c0_i32_0 = arith.constant 0 : i32
    %c0_i32_1 = arith.constant 0 : i32
    return %c0_i32, %c0_i32_0 : i32, i32
  }
  func.func @transform_8(%arg0: i32) -> (i32, i32) {
    %c0_i32 = arith.constant 0 : i32
    %c0_i32_0 = arith.constant 0 : i32
    %c0_i32_1 = arith.constant 0 : i32
    return %c0_i32, %c0_i32_0 : i32, i32
  }
  func.func @transform_9(%arg0: i32) -> (i32, i32) {
    %c0_i32 = arith.constant 0 : i32
    %c0_i32_0 = arith.constant 0 : i32
    return %arg0, %c0_i32 : i32, i32
  }
}

</mosaic_0001>

<bundles_post_ra>
// kernel: tpu_custom_call.1
= control target key start
LH: loop header
LB: loop body
LE: loop exit
PB: predicated region body
PF: predicated region fallthrough
CT: control target
= control target key end

     0   :  { %14 = vsyncpa [#allocation3], 0  ;;  %s1175_s0 = inlined_call_operand.vmem [shape: bf16[16,4], index: 0, kind: input, shape index: {}]   ;;  %s1176_s1 = inlined_call_operand.vmem [shape: bf16[4,16], index: 1, kind: input, shape index: {}]   ;;  %s1177_s2 = inlined_call_operand.hbm [shape: f32[1,16], index: 2, kind: input, shape index: {}]   ;;  %s1178_s3 = inlined_call_operand.vmem [shape: bf16[16,16], index: 3, kind: input, shape index: {}]   ;;  %s1179_s4 = inlined_call_operand.vmem [shape: f32[1,16], index: 4, kind: input, shape index: {}]   ;;  %s1180_s5 = inlined_call_operand.hbm [shape: bf16[16,256], index: 5, kind: input, shape index: {}]   ;;  %s1181_s6 = inlined_call_operand.vmem [shape: f32[1,256], index: 6, kind: input, shape index: {}]   ;;  %s1182_s7 = inlined_call_operand.hbm [shape: f32[256,128], index: 7, kind: input, shape index: {}]   ;;  %s1183_s8 = inlined_call_operand.hbm [shape: f32[256,128], index: 8, kind: input, shape index: {}]   ;;  %s1184_s9 = inlined_call_operand.hbm [shape: f32[16,128], index: 9, kind: output, shape index: {}]  }
   0x1   :  { %15 = vsyncpa [#allocation6], 0 }
   0x2   :  { %16 = vsyncpa [#allocation9], 0  ;;  %s41_s11 = sshll.u32 %s1180_s5, 4  ;;  %s42_s11 = int_to_ptr.hbm [resolvable:$true] %s41_s11 }
   0x3   :  { %17 = vsyncpa [#allocation4], 0  ;;  %s910_s12 = smov [#allocation5]   ;;  %s27_s16 = sshll.u32 %s1177_s2, 4  ;;  %s28_s16 = int_to_ptr.hbm [resolvable:$true] %s27_s16 }
   0x4   :  { %s43_s13 = sshll.u32 %s910_s12, 4  ;;  %s911_s17 = smov 128   ;;  %s44_s13 = int_to_ptr.vmem [resolvable:$true] %s43_s13 }
   0x5   :  { %s912_s18 = smov 8   ;;  %s913_s19 = smov [#allocation2]  }
   0x6   :  { %49 = dma.hbm_to_vmem [thread:$0]  %s42_s11, 256, %s44_s13, [#allocation6], %s911_s17, %s911_s17, %s912_s18  }
   0x7   :  { %s29_s20 = sshll.u32 %s913_s19, 4  ;;  %s56_s22 = sshll.u32 %s1182_s7, 4  ;;  %s30_s20 = int_to_ptr.vmem [resolvable:$true] %s29_s20  ;;  %s57_s22 = int_to_ptr.hbm [resolvable:$true] %s56_s22 }
   0x8   :  { %32 = dma.hbm_to_vmem [thread:$0]  %s28_s16, 16, %s30_s20, [#allocation3]  }
   0x9   :  { %s69_s2 = sshll.u32 %s1183_s8, 4  ;;  %s914_s25 = smov [#allocation7]   ;;  %s70_s2 = int_to_ptr.hbm [resolvable:$true] %s69_s2 }
   0xa   :  { %s58_s26 = sshll.u32 %s914_s25, 4  ;;  %s915_s27 = smov [#allocation8]   ;;  %s59_s26 = int_to_ptr.vmem [resolvable:$true] %s58_s26 }
   0xb   :  { %64 = dma.hbm_to_vmem [thread:$0]  %s57_s22, 4096, %s59_s26, [#allocation6], %s911_s17, %s911_s17, %s912_s18  }
   0xc   :  { %s71_s28 = sshll.u32 %s915_s27, 4  ;;  %s72_s28 = int_to_ptr.vmem [resolvable:$true] %s71_s28 }
   0xd   :  { %77 = dma.hbm_to_vmem [thread:$0]  %s70_s2, 4096, %s72_s28, [#allocation9], %s911_s17, %s911_s17, %s912_s18  }
   0xe   :  { %902 = dma.done.wait [#allocation3], 16  }
   0xf   :  { %903 = vsyncadd [#allocation3], 4294967280 }
  0x10   :  { %904 = dma.done.wait [#allocation6], 4352  }
  0x11   :  { %905 = vsyncadd [#allocation6], 4294962944 }
  0x12   :  { %906 = dma.done.wait [#allocation9], 4096  }
  0x13   :  { %907 = vsyncadd [#allocation9], 4294963200  ;;  %vm111_vm0 = vcmask 1041408   ;;  %v97_v0 = vld [vmem:[%s1176_s1] sm:$0x3]  ;;  %vm107_vm1 = vcmask 31744  }
  0x14   :  { %v113_v1 = vsel %vm111_vm0, %v97_v0, 0  ;;  %v730_v2 = vld [vmem:[%s1175_s0] sm:$0xff]  ;;  %vm144_vm2 = vcmask 130048   ;;  %v733_v13 = vld [vmem:[#allocation5 + $0x4] sm:$0xf0]  ;;  %vm215_vm3 = vcmask 1047556  }
  0x15   :  { %122 = vmatpush.bf16.msra.mxu0 %v113_v1  ;;  %v731_v3 = vld [vmem:[%s1178_s3] sm:$0xff]  ;;  %v723_v16 = vld [vmem:[#allocation5 + $0x8] sm:$0xf0]  ;;  %v916_v27 = vmov 1983009808   ;;  %s694_s15 = sshll.u32 %s1184_s9, 4  ;;  %s695_s15 = int_to_ptr.hbm [resolvable:$true] %s694_s15 }
  0x16   :  { %155 = vmatpush.bf16.msra.mxu1 %v731_v3  ;;  %v744_v5 = vld [vmem:[#allocation2] ss:$0 sm:$0xff]  ;;  %v721_v12 = vld [vmem:[#allocation5] sm:$0xf]  ;;  %v732_v14 = vld [vmem:[#allocation5 + $0x4] sm:$0xf]  ;;  %v218_v28 = vunpack.c.l.s4 %v916_v27 }
  0x17   :  { %v722_v15 = vor.u32 %v733_v13, %v721_v12  ;;  %v726_v17 = vor.u32 %v732_v14, %v723_v16  ;;  %v745_v19 = vld [vmem:[%s1179_s4] ss:$0 sm:$0xff]  ;;  %v917_v34 = vmov 1934713408   ;;  %s919_s4 = smov [#allocation10]  }
  0x18   :  { %713 = vmatmul.msk.bf16.vlgmr.msra.gmra.mxu0 %vm107_vm1, %v730_v2  ;;  %v167_v26 = vld [vmem:[%s1181_s6] sm:$0x3]  ;;  %v1010_v31 = vunpack.c.0.s8 %v218_v28  ;;  %v240_v35 = vunpack.c.l.s4 %v917_v34  ;;  %s692_s6 = sshll.u32 %s919_s4, 4  ;;  %s693_s6 = int_to_ptr.vmem [resolvable:$true] %s692_s6 }
  0x19   :  { %193 = vmatpush.bf16.msra.mxu2 %v722_v15  ;;  %207 = vmatpush.bf16.msra.mxu3 %v726_v17  ;;  %v169_v29 = vperm.slane %v167_v26, 0  ;;  %v170_v30 = vperm.slane %v167_v26, 1 }
  0x1a   :  { %v1014_v42 = vunpack.c.0.s8 %v240_v35 }
  0x95   :  { %v124_v4 = vpop.f32.mrf.mxu0 }
  0x96   :  { %v125_v6 = vadd.f32 %v744_v5, %v124_v4 }
  0x98   :  { %v129_v9 = vmax.f32 %v125_v6, 0.0 }
  0x9d   :  { %v126_v7 = vpop.f32.mrf.mxu0 }
  0x9e   :  { %v127_v8 = vadd.f32 %v744_v5, %v126_v7 }
  0xa0   :  { %v130_v10 = vmax.f32 %v127_v8, 0.0 }
  0xa2   :  { %v131_v11 = vpack.c.bf16 %v130_v10, %v129_v9 }
  0xa4   :  { %718 = vmatmul.msk.bf16.vlgmr.msra.gmra.mxu1 %vm144_vm2, %v131_v11 }
 0x121   :  { %v157_v18 = vpop.f32.mrf.mxu1 }
 0x122   :  { %v158_v20 = vadd.f32 %v745_v19, %v157_v18 }
 0x124   :  { %v162_v23 = vmax.f32 %v158_v20, 0.0 }
 0x129   :  { %v159_v21 = vpop.f32.mrf.mxu1 }
 0x12a   :  { %v160_v22 = vadd.f32 %v745_v19, %v159_v21 }
 0x12c   :  { %v163_v24 = vmax.f32 %v160_v22, 0.0 }
 0x12e   :  { %v164_v25 = vpack.c.bf16 %v163_v24, %v162_v23 }
 0x130   :  { %727 = vmatmul.msk.bf16.vlgmr.msra.gmra.mxu2 %vm144_vm2, %v164_v25  ;;  %728 = vmatmul.msk.bf16.vlgmr.msra.gmra.mxu3 %vm144_vm2, %v164_v25 }
 0x1b3   :  { %v195_v32 = vpop.f32.mrf.mxu2  ;;  %v209_v33 = vpop.f32.mrf.mxu3 }
 0x1b4   :  { %v196_v36 = vadd.f32 %v195_v32, %v169_v29  ;;  %v210_v37 = vadd.f32 %v209_v33, %v170_v30 }
 0x1b6   :  { %v214_v38 = vrot.slane %v196_v36, 4  ;;  %v220_v39 = vperm.slane %v196_v36, %v1010_v31  ;;  %v225_v40 = vrot.slane %v210_v37, 4  ;;  %v230_v41 = vperm.slane %v210_v37, %v1010_v31 }
 0x1b8   :  { %v216_v43 = vsel %vm215_vm3, 0.0, %v214_v38  ;;  %v237_v44 = vrot.slane %v220_v39, 4  ;;  %v226_v45 = vsel %vm215_vm3, 0.0, %v225_v40  ;;  %v235_v46 = vrot.slane %v230_v41, 4 }
 0x1b9   :  { %v224_v47 = vperm.slane %v216_v43, %v1010_v31  ;;  %v234_v48 = vperm.slane %v226_v45, %v1010_v31 }
 0x1ba   :  { %v238_v49 = vsel %vm215_vm3, %v230_v41, %v237_v44  ;;  %v236_v50 = vsel %vm215_vm3, %v235_v46, %v220_v39 }
 0x1bb   :  { %v249_v51 = vrot.slane %v224_v47, 4  ;;  %v247_v52 = vrot.slane %v234_v48, 4  ;;  %v197_v53 = vpop.f32.mrf.mxu2  ;;  %v211_v54 = vpop.f32.mrf.mxu3  ;;  %v1023_v55 = vperm.slane %v238_v49, %v1014_v42  ;;  %v1026_v56 = vperm.slane %v236_v50, %v1014_v42 }
 0x1bc   :  { %v198_v57 = vadd.f32 %v197_v53, %v169_v29  ;;  %v212_v58 = vadd.f32 %v211_v54, %v170_v30  ;;  %v526_v53 = vld [vmem:[#allocation7 + $0xf8] sm:$0xff] }
 0x1bd   :  { %v325_v59 = vsel %vm111_vm0, %v1023_v55, -inf  ;;  %v319_v60 = vsel %vm111_vm0, %v1026_v56, -inf  ;;  %v261_v61 = vrot.slane %v1023_v55, 4  ;;  %v259_v0 = vrot.slane %v1026_v56, 4  ;;  %v604_v54 = vld [vmem:[#allocation8 + $0xf8] sm:$0xff]  ;;  %550 = vmatpush.msrb.mxu1 %v526_v53  ;;  %v515_v53 = vld [vmem:[#allocation7 + $0xa0] sm:$0xff] }
 0x1be   :  { %v267_v62 = vrot.slane %v198_v57, 4  ;;  %v277_v63 = vrot.slane %v212_v58, 4  ;;  %326 = vmax.xlane.f32.xlu2 %v325_v59  ;;  %320 = vmax.xlane.f32.xlu1 %v319_v60  ;;  %v250_v2 = vsel %vm215_vm3, %v234_v48, %v249_v51  ;;  %v248_v3 = vsel %vm215_vm3, %v247_v52, %v224_v47  ;;  %v588_v59 = vld [vmem:[#allocation8 + $0x78] sm:$0xff]  ;;  %v603_v60 = vld [vmem:[#allocation8 + $0xf0] sm:$0xff] }
 0x1bf   :  { %v1035_v1 = vsel %vm215_vm3, 0.0, %v261_v61  ;;  %v1046_v9 = vsel %vm215_vm3, 0.0, %v259_v0  ;;  %v1049_v10 = vperm.slane %v250_v2, %v1014_v42  ;;  %v1052_v11 = vperm.slane %v248_v3, %v1014_v42  ;;  %633 = vmatpush.msrb.mxu3 %v604_v54  ;;  %610 = vmatpush.msrb.mxu2 %v588_v59  ;;  %v509_v61 = vld [vmem:[#allocation7 + $0x70] sm:$0xff]  ;;  %v602_v0 = vld [vmem:[#allocation8 + $0xe8] sm:$0xff]  ;;  %v523_v3 = vld [vmem:[#allocation7 + $0xe0] sm:$0xff] }
 0x1c0   :  { %v268_v4 = vsel %vm215_vm3, 0.0, %v267_v62  ;;  %v278_v5 = vsel %vm215_vm3, 0.0, %v277_v63  ;;  %v328_v8 = vsel %vm111_vm0, %v1035_v1, -inf  ;;  %v272_v12 = vperm.slane %v198_v57, %v1010_v31  ;;  %v510_v57 = vld [vmem:[#allocation7 + $0x78] sm:$0xff]  ;;  %v524_v62 = vld [vmem:[#allocation7 + $0xe8] sm:$0xff]  ;;  %v587_v63 = vld [vmem:[#allocation8 + $0x70] sm:$0xff] }
 0x1c1   :  { %v276_v6 = vperm.slane %v268_v4, %v1010_v31  ;;  %v286_v7 = vperm.slane %v278_v5, %v1010_v31  ;;  %329 = vmax.xlane.f32.xlu0 %v328_v8  ;;  %v322_v15 = vsel %vm111_vm0, %v1046_v9, -inf  ;;  %v337_v16 = vsel %vm111_vm0, %v1049_v10, -inf  ;;  %527 = vmatpush.msrb.mxu0 %v510_v57  ;;  %v508_v2 = vld [vmem:[#allocation7 + $0x68] sm:$0xff]  ;;  %v601_v5 = vld [vmem:[#allocation8 + $0xe0] sm:$0xff] }
 0x1c2   :  { %v263_v18 = vrot.slane %v1052_v11, 4  ;;  %v289_v19 = vrot.slane %v272_v12, 4  ;;  %v282_v21 = vperm.slane %v212_v58, %v1010_v31  ;;  %v331_v22 = vsel %vm111_vm0, %v1052_v11, -inf  ;;  %v525_v58 = vld [vmem:[#allocation7 + $0xf0] sm:$0xff]  ;;  %634 = vmatpush.msrb.mxu3 %v603_v60  ;;  %611 = vmatpush.msrb.mxu2 %v587_v63  ;;  %v586_v4 = vld [vmem:[#allocation8 + $0x68] sm:$0xff]  ;;  %v585_v8 = vld [vmem:[#allocation8 + $0x60] sm:$0xff] }
 0x1c3   :  { %v301_v13 = vrot.slane %v276_v6, 4  ;;  %v299_v14 = vrot.slane %v286_v7, 4  ;;  %v265_v25 = vrot.slane %v1049_v10, 4  ;;  %551 = vmatpush.msrb.mxu1 %v525_v58  ;;  %528 = vmatpush.msrb.mxu0 %v509_v61  ;;  %v578_v54 = vld [vmem:[#allocation8 + $0x28] sm:$0xff]  ;;  %v593_v58 = vld [vmem:[#allocation8 + $0xa0] sm:$0xff]  ;;  %v514_v60 = vld [vmem:[#allocation7 + $0x98] sm:$0xff] }
 0x1c4   :  { %v1069_v24 = vsel %vm215_vm3, 0.0, %v263_v18  ;;  %v290_v27 = vsel %vm215_vm3, %v282_v21, %v289_v19  ;;  %v287_v35 = vrot.slane %v282_v21, 4  ;;  %635 = vmatpush.msrb.mxu3 %v602_v0  ;;  %612 = vmatpush.msrb.mxu2 %v586_v4  ;;  %v520_v18 = vld [vmem:[#allocation7 + $0xc8] sm:$0xff]  ;;  %v583_v19 = vld [vmem:[#allocation8 + $0x50] sm:$0xff]  ;;  %v499_v59 = vld [vmem:[#allocation7 + $0x20] sm:$0xff] }
 0x1c5   :  { %v302_v17 = vsel %vm215_vm3, %v286_v7, %v301_v13  ;;  %v300_v20 = vsel %vm215_vm3, %v299_v14, %v276_v6  ;;  %v334_v29 = vsel %vm111_vm0, %v1069_v24, -inf  ;;  %v1081_v30 = vsel %vm215_vm3, 0.0, %v265_v25  ;;  %552 = vmatpush.msrb.mxu1 %v524_v62  ;;  %529 = vmatpush.msrb.mxu0 %v508_v2  ;;  %v507_v6 = vld [vmem:[#allocation7 + $0x60] sm:$0xff]  ;;  %v522_v7 = vld [vmem:[#allocation7 + $0xd8] sm:$0xff]  ;;  %v521_v14 = vld [vmem:[#allocation7 + $0xd0] sm:$0xff] }
 0x1c6   :  { %323 = vmax.xlane.f32.xlu2 %v322_v15  ;;  %338 = vmax.xlane.f32.xlu1 %v337_v16  ;;  %v1066_v23 = vperm.slane %v302_v17, %v1014_v42  ;;  %v1073_v26 = vperm.slane %v300_v20, %v1014_v42  ;;  %v1086_v34 = vperm.slane %v290_v27, %v1014_v42  ;;  %v340_v36 = vsel %vm111_vm0, %v1081_v30, -inf  ;;  %v506_v13 = vld [vmem:[#allocation7 + $0x58] sm:$0xff]  ;;  %v599_v16 = vld [vmem:[#allocation8 + $0xd0] sm:$0xff]  ;;  %v598_v20 = vld [vmem:[#allocation8 + $0xc8] sm:$0xff] }
 0x1c7   :  { %v288_v40 = vsel %vm215_vm3, %v287_v35, %v272_v12  ;;  %553 = vmatpush.msrb.mxu1 %v523_v3  ;;  %636 = vmatpush.msrb.mxu3 %v601_v5  ;;  %v600_v12 = vld [vmem:[#allocation8 + $0xd8] sm:$0xff]  ;;  %v505_v17 = vld [vmem:[#allocation7 + $0x50] sm:$0xff]  ;;  %v504_v21 = vld [vmem:[#allocation7 + $0x48] sm:$0xff] }
 0x1c8   :  { %v361_v28 = vsel %vm111_vm0, %v1066_v23, -inf  ;;  %v317_v32 = vrot.slane %v1066_v23, 4  ;;  %v315_v33 = vrot.slane %v1073_v26, 4  ;;  %v313_v39 = vrot.slane %v1086_v34, 4  ;;  %530 = vmatpush.msrb.mxu0 %v507_v6  ;;  %613 = vmatpush.msrb.mxu2 %v585_v8  ;;  %v584_v15 = vld [vmem:[#allocation8 + $0x58] sm:$0xff]  ;;  %v582_v25 = vld [vmem:[#allocation8 + $0x48] sm:$0xff] }
 0x1c9   :  { %332 = vmax.xlane.f32.xlu0 %v331_v22  ;;  %v1106_v45 = vperm.slane %v288_v40, %v1014_v42  ;;  %v355_v48 = vsel %vm111_vm0, %v1073_v26, -inf  ;;  %v349_v49 = vsel %vm111_vm0, %v1086_v34, -inf  ;;  %554 = vmatpush.msrb.mxu1 %v522_v7  ;;  %v519_v22 = vld [vmem:[#allocation7 + $0xc0] sm:$0xff]  ;;  %v517_v40 = vld [vmem:[#allocation7 + $0xb0] sm:$0xff]  ;;  %v592_v0 = vld [vmem:[#allocation8 + $0x98] sm:$0xff] }
 0x1ca   :  { %v1091_v37 = vsel %vm215_vm3, 0.0, %v317_v32  ;;  %v1094_v38 = vsel %vm215_vm3, 0.0, %v315_v33  ;;  %v1103_v44 = vsel %vm215_vm3, 0.0, %v313_v39  ;;  %637 = vmatpush.msrb.mxu3 %v600_v12  ;;  %531 = vmatpush.msrb.mxu0 %v506_v13  ;;  %v597_v27 = vld [vmem:[#allocation8 + $0xc0] sm:$0xff]  ;;  %v596_v33 = vld [vmem:[#allocation8 + $0xb8] sm:$0xff]  ;;  %v591_v7 = vld [vmem:[#allocation8 + $0x90] sm:$0xff] }
 0x1cb   :  { %v364_v41 = vsel %vm111_vm0, %v1091_v37, -inf  ;;  %v358_v43 = vsel %vm111_vm0, %v1094_v38, -inf  ;;  %v352_v46 = vsel %vm111_vm0, %v1103_v44, -inf  ;;  %v311_v47 = vrot.slane %v1106_v45, 4  ;;  %555 = vmatpush.msrb.mxu1 %v521_v14  ;;  %614 = vmatpush.msrb.mxu2 %v584_v15  ;;  %v581_v32 = vld [vmem:[#allocation8 + $0x40] sm:$0xff]  ;;  %v502_v39 = vld [vmem:[#allocation7 + $0x38] sm:$0xff] }
 0x1cc   :  { %v343_v52 = vsel %vm111_vm0, %v1106_v45, -inf  ;;  %638 = vmatpush.msrb.mxu3 %v599_v16  ;;  %532 = vmatpush.msrb.mxu0 %v505_v17  ;;  %v577_v61 = vld [vmem:[#allocation8 + $0x20] sm:$0xff]  ;;  %v498_v4 = vld [vmem:[#allocation7 + $0x18] sm:$0xff]  ;;  %v497_v8 = vld [vmem:[#allocation7 + $0x10] sm:$0xff] }
 0x1cd   :  { %v1116_v50 = vsel %vm215_vm3, 0.0, %v311_v47  ;;  %556 = vmatpush.msrb.mxu1 %v520_v18  ;;  %615 = vmatpush.msrb.mxu2 %v583_v19  ;;  %v516_v47 = vld [vmem:[#allocation7 + $0xa8] sm:$0xff]  ;;  %v576_v5 = vld [vmem:[#allocation8 + $0x18] sm:$0xff]  ;;  %v575_v12 = vld [vmem:[#allocation8 + $0x10] sm:$0xff] }
 0x1ce   :  { %362 = vmax.xlane.f32.xlu2 %v361_v28  ;;  %335 = vmax.xlane.f32.xlu1 %v334_v29  ;;  %v346_v51 = vsel %vm111_vm0, %v1116_v50, -inf  ;;  %v503_v28 = vld [vmem:[#allocation7 + $0x40] sm:$0xff]  ;;  %v518_v29 = vld [vmem:[#allocation7 + $0xb8] sm:$0xff]  ;;  %v590_v15 = vld [vmem:[#allocation8 + $0x88] sm:$0xff] }
 0x1cf   :  { %639 = vmatpush.msrb.mxu3 %v598_v20  ;;  %533 = vmatpush.msrb.mxu0 %v504_v21  ;;  %v511_v18 = vld [vmem:[#allocation7 + $0x80] sm:$0xff]  ;;  %v574_v19 = vld [vmem:[#allocation8 + $0x8] sm:$0xff] }
 0x1d0   :  { %557 = vmatpush.msrb.mxu1 %v519_v22  ;;  %616 = vmatpush.msrb.mxu2 %v582_v25  ;;  %v589_v21 = vld [vmem:[#allocation8 + $0x80] sm:$0xff] }
 0x1d1   :  { %341 = vmax.xlane.f32.xlu0 %v340_v36  ;;  %640 = vmatpush.msrb.mxu3 %v597_v27  ;;  %v495_v22 = vld [vmem:[#allocation7] sm:$0xff] }
 0x1d2   :  { %534 = vmatpush.msrb.mxu0 %v503_v28  ;;  %558 = vmatpush.msrb.mxu1 %v518_v29  ;;  %v573_v25 = vld [vmem:[#allocation8] sm:$0xff] }
 0x1d3   :  { %617 = vmatpush.msrb.mxu2 %v581_v32  ;;  %641 = vmatpush.msrb.mxu3 %v596_v33 }
 0x1d4   :  { %535 = vmatpush.msrb.mxu0 %v502_v39  ;;  %559 = vmatpush.msrb.mxu1 %v517_v40 }
 0x1d6   :  { %365 = vmax.xlane.f32.xlu2 %v364_v41  ;;  %359 = vmax.xlane.f32.xlu1 %v358_v43  ;;  %v580_v41 = vld [vmem:[#allocation8 + $0x38] sm:$0xff]  ;;  %v595_v43 = vld [vmem:[#allocation8 + $0xb0] sm:$0xff] }
 0x1d7   :  { %618 = vmatpush.msrb.mxu2 %v580_v41  ;;  %642 = vmatpush.msrb.mxu3 %v595_v43 }
 0x1d8   :  { %560 = vmatpush.msrb.mxu1 %v516_v47 }
 0x1d9   :  { %353 = vmax.xlane.f32.xlu0 %v352_v46  ;;  %v501_v46 = vld [vmem:[#allocation7 + $0x30] sm:$0xff] }
 0x1da   :  { %536 = vmatpush.msrb.mxu0 %v501_v46  ;;  %561 = vmatpush.msrb.mxu1 %v515_v53 }
 0x1dc   :  { %562 = vmatpush.msrb.mxu1 %v514_v60 }
 0x1de   :  { %356 = vmax.xlane.f32.xlu2 %v355_v48  ;;  %350 = vmax.xlane.f32.xlu1 %v349_v49  ;;  %v579_v48 = vld [vmem:[#allocation8 + $0x30] sm:$0xff]  ;;  %v594_v49 = vld [vmem:[#allocation8 + $0xa8] sm:$0xff] }
 0x1df   :  { %619 = vmatpush.msrb.mxu2 %v579_v48  ;;  %643 = vmatpush.msrb.mxu3 %v594_v49 }
 0x1e1   :  { %347 = vmax.xlane.f32.xlu0 %v346_v51  ;;  %620 = vmatpush.msrb.mxu2 %v578_v54 }
 0x1e2   :  { %644 = vmatpush.msrb.mxu3 %v593_v58 }
 0x1e3   :  { %621 = vmatpush.msrb.mxu2 %v577_v61 }
 0x1e4   :  { %645 = vmatpush.msrb.mxu3 %v592_v0 }
 0x1e5   :  { %622 = vmatpush.msrb.mxu2 %v576_v5 }
 0x1e6   :  { %646 = vmatpush.msrb.mxu3 %v591_v7 }
 0x1e7   :  { %623 = vmatpush.msrb.mxu2 %v575_v12 }
 0x1e8   :  { %647 = vmatpush.msrb.mxu3 %v590_v15 }
 0x1e9   :  { %344 = vmax.xlane.f32.xlu0 %v343_v52  ;;  %v500_v52 = vld [vmem:[#allocation7 + $0x28] sm:$0xff]  ;;  %624 = vmatpush.msrb.mxu2 %v574_v19 }
 0x1ea   :  { %537 = vmatpush.msrb.mxu0 %v500_v52  ;;  %648 = vmatpush.msrb.mxu3 %v589_v21 }
 0x1eb   :  { %625 = vmatpush.msrb.mxu2 %v573_v25 }
 0x1ec   :  { %538 = vmatpush.msrb.mxu0 %v499_v59 }
 0x1ee   :  { %539 = vmatpush.msrb.mxu0 %v498_v4 }
 0x1f0   :  { %540 = vmatpush.msrb.mxu0 %v497_v8 }
 0x231   :  { %v327_v35 = vpop.xlane.xlu2 %326  ;;  %v1122_v36 = vpop.xlane.xlu1 %320 }
 0x232   :  { %v369_v62 = vsub.f32 %v1023_v55, %v327_v35  ;;  %v512_v55 = vld [vmem:[#allocation7 + $0x88] sm:$0xff]  ;;  %v367_v20 = vsub.f32 %v1026_v56, %v1122_v36 }
 0x234   :  { %v330_v51 = vpop.xlane.xlu0 %329  ;;  %v387_v13 = vmul.f32 1.442695, %v369_v62  ;;  %v383_v33 = vmul.f32 1.442695, %v367_v20 }
 0x235   :  { %v370_v57 = vsub.f32 %v1035_v1, %v330_v51  ;;  %v513_v1 = vld [vmem:[#allocation7 + $0x90] sm:$0xff] }
 0x236   :  { %563 = vmatpush.msrb.mxu1 %v513_v1 }
 0x237   :  { %v389_v63 = vmul.f32 1.442695, %v370_v57 }
 0x238   :  { %564 = vmatpush.msrb.mxu1 %v512_v55 }
 0x239   :  { %v324_v2 = vpop.xlane.xlu2 %323  ;;  %v339_v3 = vpop.xlane.xlu1 %338  ;;  %746 = vpow2.f32 %v389_v63 }
 0x23a   :  { %v368_v6 = vsub.f32 %v1046_v9, %v324_v2  ;;  %v373_v16 = vsub.f32 %v1049_v10, %v339_v3  ;;  %v496_v9 = vld [vmem:[#allocation7 + $0x8] sm:$0xff]  ;;  %565 = vmatpush.msrb.mxu1 %v511_v18 }
 0x23b   :  { %541 = vmatpush.msrb.mxu0 %v496_v9 }
 0x23c   :  { %v385_v14 = vmul.f32 1.442695, %v368_v6  ;;  %v333_v17 = vpop.xlane.xlu0 %332  ;;  %v395_v10 = vmul.f32 1.442695, %v373_v16 }
 0x23d   :  { %542 = vmatpush.msrb.mxu0 %v495_v22  ;;  %v371_v27 = vsub.f32 %v1052_v11, %v333_v17 }
 0x23e   :  { %748 = vpow2.f32 %v385_v14 }
 0x23f   :  { %750 = vpow2.f32 %v387_v13  ;;  %v747_v32 = vpop.eup %746  ;;  %v391_v39 = vmul.f32 1.442695, %v371_v27 }
 0x240   :  { %v421_v36 = vrot.slane %v747_v32, 4  ;;  %752 = vpow2.f32 %v395_v10 }
 0x241   :  { %v363_v28 = vpop.xlane.xlu2 %362  ;;  %v336_v29 = vpop.xlane.xlu1 %335  ;;  %754 = vpow2.f32 %v383_v33 }
 0x242   :  { %v372_v56 = vsub.f32 %v1069_v24, %v336_v29  ;;  %756 = vpow2.f32 %v391_v39  ;;  %v381_v57 = vsub.f32 %v1066_v23, %v363_v28 }
 0x244   :  { %v749_v35 = vpop.eup %748  ;;  %v342_v40 = vpop.xlane.xlu0 %341  ;;  %v393_v47 = vmul.f32 1.442695, %v372_v56  ;;  %v411_v2 = vmul.f32 1.442695, %v381_v57 }
 0x245   :  { %v751_v41 = vpop.eup %750  ;;  %v374_v43 = vsub.f32 %v1081_v30, %v342_v40  ;;  %v422_v46 = vsel %vm215_vm3, %v421_v36, %v749_v35 }
 0x246   :  { %v415_v48 = vrot.slane %v751_v41, 4  ;;  %v426_v24 = vperm.slane %v422_v46, %v1010_v31  ;;  %v753_v53 = vpop.eup %752 }
 0x247   :  { %v397_v11 = vmul.f32 1.442695, %v374_v43  ;;  %v755_v54 = vpop.eup %754  ;;  %v427_v61 = vrot.slane %v753_v53, 4 }
 0x248   :  { %v416_v60 = vsel %vm215_vm3, %v415_v48, %v755_v54  ;;  %v439_v62 = vrot.slane %v426_v24, 4  ;;  %v757_v63 = vpop.eup %756 }
 0x249   :  { %v366_v49 = vpop.xlane.xlu2 %365  ;;  %v360_v51 = vpop.xlane.xlu1 %359  ;;  %758 = vpow2.f32 %v397_v11  ;;  %v420_v3 = vperm.slane %v416_v60, %v1010_v31 }
 0x24a   :  { %v382_v52 = vsub.f32 %v1091_v37, %v366_v49  ;;  %760 = vpow2.f32 %v393_v47  ;;  %v380_v30 = vsub.f32 %v1094_v38, %v360_v51  ;;  %v428_v38 = vsel %vm215_vm3, %v427_v61, %v757_v63 }
 0x24b   :  { %v440_v7 = vsel %vm215_vm3, %v439_v62, %v420_v3  ;;  %v432_v15 = vperm.slane %v428_v38, %v1010_v31  ;;  %v918_v3 = vmov 0.0  }
 0x24c   :  { %v413_v58 = vmul.f32 1.442695, %v382_v52  ;;  %v354_v59 = vpop.xlane.xlu0 %353  ;;  %v409_v1 = vmul.f32 1.442695, %v380_v30  ;;  %v444_v16 = vperm.slane %v440_v7, %v1014_v42 }
 0x24d   :  { %v378_v37 = vsub.f32 %v1103_v44, %v354_v59 }
 0x24e   :  { %762 = vpow2.f32 %v413_v58  ;;  %v453_v25 = vrot.slane %v444_v16, 4 }
 0x24f   :  { %v759_v0 = vpop.eup %758  ;;  %764 = vpow2.f32 %v411_v2  ;;  %v405_v13 = vmul.f32 1.442695, %v378_v37  ;;  %v605_v2 = vlaneseq }
 0x250   :  { %v433_v4 = vrot.slane %v759_v0, 4  ;;  %v761_v5 = vpop.eup %760  ;;  %766 = vpow2.f32 %v409_v1 }
 0x251   :  { %v357_v23 = vpop.xlane.xlu2 %356  ;;  %v351_v55 = vpop.xlane.xlu1 %350  ;;  %v606_v37 = vand.u32 127, %v605_v2 }
 0x252   :  { %v379_v6 = vsub.f32 %v1073_v26, %v357_v23  ;;  %v434_v8 = vsel %vm215_vm3, %v433_v4, %v761_v5  ;;  %v377_v9 = vsub.f32 %v1086_v34, %v351_v55 }
 0x253   :  { %v438_v12 = vperm.slane %v434_v8, %v1010_v31  ;;  %vm607_vm4 = vcmp.ge.s32.totalorder %v606_v37, 2 }
 0x254   :  { %v407_v44 = vmul.f32 1.442695, %v379_v6  ;;  %v348_v14 = vpop.xlane.xlu0 %347  ;;  %v763_v17 = vpop.eup %762  ;;  %v403_v27 = vmul.f32 1.442695, %v377_v9 }
 0x255   :  { %v445_v26 = vrot.slane %v438_v12, 4  ;;  %v376_v18 = vsub.f32 %v1116_v50, %v348_v14  ;;  %v473_v21 = vrot.slane %v763_v17, 4  ;;  %v765_v10 = vpop.eup %764 }
 0x256   :  { %768 = vpow2.f32 %v407_v44  ;;  %v767_v28 = vpop.eup %766  ;;  %v467_v34 = vrot.slane %v765_v10, 4 }
 0x257   :  { %770 = vpow2.f32 %v405_v13  ;;  %v401_v19 = vmul.f32 1.442695, %v376_v18  ;;  %v446_v20 = vsel %vm215_vm3, %v445_v26, %v432_v15  ;;  %v474_v56 = vsel %vm215_vm3, %v473_v21, %v767_v28 }
 0x258   :  { %v450_v22 = vperm.slane %v446_v20, %v1014_v42  ;;  %v478_v46 = vperm.slane %v474_v56, %v1010_v31 }
 0x259   :  { %772 = vpow2.f32 %v401_v19 }
 0x25a   :  { %v454_v29 = vsel %vm215_vm3, %v450_v22, %v453_v25  ;;  %v451_v32 = vrot.slane %v450_v22, 4  ;;  %774 = vpow2.f32 %v403_v27  ;;  %v485_v51 = vrot.slane %v478_v46, 4 }
 0x25b   :  { %566 = vmatmul.f32.vlgmr.msrb.gmra.mxu1 %v454_v29  ;;  %649 = vmatmul.f32.vlgmr.msrb.gmra.mxu3 %v454_v29 }
 0x25c   :  { %v769_v33 = vpop.eup %768  ;;  %v345_v50 = vpop.xlane.xlu0 %344  ;;  %v452_v35 = vsel %vm215_vm3, %v451_v32, %v444_v16 }
 0x25d   :  { %v771_v36 = vpop.eup %770  ;;  %v375_v39 = vsub.f32 %v1106_v45, %v345_v50  ;;  %543 = vmatmul.f32.vlgmr.msrb.gmra.mxu0 %v452_v35  ;;  %626 = vmatmul.f32.vlgmr.msrb.gmra.mxu2 %v452_v35  ;;  %v468_v40 = vsel %vm215_vm3, %v467_v34, %v769_v33 }
 0x25e   :  { %v461_v47 = vrot.slane %v771_v36, 4  ;;  %v472_v11 = vperm.slane %v468_v40, %v1010_v31 }
 0x25f   :  { %v773_v41 = vpop.eup %772  ;;  %v399_v43 = vmul.f32 1.442695, %v375_v39 }
 0x260   :  { %v462_v48 = vsel %vm215_vm3, %v461_v47, %v773_v41  ;;  %v775_v49 = vpop.eup %774  ;;  %v486_v45 = vsel %vm215_vm3, %v485_v51, %v472_v11 }
 0x261   :  { %776 = vpow2.f32 %v399_v43  ;;  %v466_v52 = vperm.slane %v462_v48, %v1010_v31  ;;  %v455_v24 = vrot.slane %v775_v49, 4  ;;  %v490_v57 = vperm.slane %v486_v45, %v1014_v42 }
 0x263   :  { %v479_v30 = vrot.slane %v466_v52, 4  ;;  %v491_v61 = vrot.slane %v490_v57, 4 }
 0x267   :  { %v777_v53 = vpop.eup %776 }
 0x268   :  { %v456_v54 = vsel %vm215_vm3, %v455_v24, %v777_v53 }
 0x269   :  { %v460_v58 = vperm.slane %v456_v54, %v1010_v31  ;;  %v729_v31 = vsel %vm607_vm4, 1.0, %v918_v3 }
 0x26b   :  { %v480_v59 = vsel %vm215_vm3, %v479_v30, %v460_v58 }
 0x26c   :  { %v484_v60 = vperm.slane %v480_v59, %v1014_v42 }
 0x26e   :  { %v492_v62 = vsel %vm215_vm3, %v491_v61, %v484_v60  ;;  %v493_v63 = vrot.slane %v484_v60, 4 }
 0x26f   :  { %546 = vmatmul.f32.gmra.mxu0 %v492_v62  ;;  %629 = vmatmul.f32.gmra.mxu2 %v492_v62 }
 0x270   :  { %v494_v0 = vsel %vm215_vm3, %v490_v57, %v493_v63 }
 0x271   :  { %569 = vmatmul.f32.gmra.mxu1 %v494_v0  ;;  %652 = vmatmul.f32.gmra.mxu3 %v494_v0 }
 0x2d8   :  { %v567_v14 = vpop.f32.mrf.mxu1 }
 0x2da   :  { %v544_v12 = vpop.f32.mrf.mxu0 }
 0x2db   :  { %v568_v17 = vadd.f32 %v567_v14, %v544_v12 }
 0x2de   :  { %v650_v23 = vpop.f32.mrf.mxu3 }
 0x2e0   :  { %v627_v4 = vpop.f32.mrf.mxu2 }
 0x2e1   :  { %v628_v1 = vadd.f32 %v729_v31, %v627_v4 }
 0x2e3   :  { %v651_v5 = vadd.f32 %v650_v23, %v628_v1 }
 0x2e5   :  { %778 = vrcp.f32 %v651_v5  ;;  %v667_v7 = vand.u32 2147483648, %v651_v5  ;;  %v665_v55 = vand.u32 2147483647, %v651_v5  ;;  %vm661_vm6 = vweird.f32 %v651_v5 }
 0x2e7   :  { %v668_v16 = vor.u32 1.1754944e-38, %v667_v7  ;;  %vm666_vm8 = vcmp.eq.f32.partialorder %v665_v55, 8.507059e+37 }
 0x2eb   :  { %v779_v42 = vpop.eup %778 }
 0x2ec   :  { %v657_v6 = vmul.f32 %v779_v42, %v651_v5  ;;  %vm662_vm5 = vweird.f32 %v779_v42  ;;  %v547_v33 = vpop.f32.mrf.mxu0 }
 0x2ed   :  { %vm663_vm7 = vmor %vm661_vm6, %vm662_vm5 }
 0x2ee   :  { %v658_v38 = vsub.f32 1.0, %v657_v6  ;;  %v570_v29 = vpop.f32.mrf.mxu1 }
 0x2ef   :  { %v571_v50 = vadd.f32 %v570_v29, %v547_v33 }
 0x2f0   :  { %v659_v8 = vmul.f32 %v779_v42, %v658_v38 }
 0x2f2   :  { %v630_v13 = vpop.f32.mrf.mxu2  ;;  %v660_v44 = vadd.f32 %v779_v42, %v659_v8 }
 0x2f3   :  { %v631_v15 = vadd.f32 %v729_v31, %v630_v13 }
 0x2f4   :  { %v653_v26 = vpop.f32.mrf.mxu3  ;;  %v664_v9 = vsel %vm663_vm7, %v779_v42, %v660_v44 }
 0x2f5   :  { %v654_v18 = vadd.f32 %v653_v26, %v631_v15  ;;  %v669_v19 = vsel %vm666_vm8, %v668_v16, %v664_v9 }
 0x2f6   :  { %v670_v20 = vmul.f32 %v669_v19, %v568_v17 }
 0x2f7   :  { %780 = vrcp.f32 %v654_v18  ;;  %v682_v10 = vand.u32 2147483648, %v654_v18  ;;  %v680_v28 = vand.u32 2147483647, %v654_v18  ;;  %vm676_vm10 = vweird.f32 %v654_v18 }
 0x2f8   :  { %686 = vst [vmem:[#allocation10] sm:$0xff] %v670_v20 }
 0x2f9   :  { %v683_v34 = vor.u32 1.1754944e-38, %v682_v10  ;;  %vm681_vm12 = vcmp.eq.f32.partialorder %v680_v28, 8.507059e+37 }
 0x2fd   :  { %v781_v21 = vpop.eup %780 }
 0x2fe   :  { %v672_v22 = vmul.f32 %v781_v21, %v654_v18  ;;  %vm677_vm9 = vweird.f32 %v781_v21 }
 0x2ff   :  { %vm678_vm11 = vmor %vm676_vm10, %vm677_vm9 }
 0x300   :  { %v673_v25 = vsub.f32 1.0, %v672_v22 }
 0x302   :  { %v674_v27 = vmul.f32 %v781_v21, %v673_v25 }
 0x304   :  { %v675_v32 = vadd.f32 %v781_v21, %v674_v27 }
 0x306   :  { %v679_v35 = vsel %vm678_vm11, %v781_v21, %v675_v32 }
 0x307   :  { %v684_v56 = vsel %vm681_vm12, %v683_v34, %v679_v35 }
 0x308   :  { %v685_v36 = vmul.f32 %v684_v56, %v571_v50 }
 0x30a   :  { %687 = vst [vmem:[#allocation10 + $0x8] sm:$0xff] %v685_v36 }
 0x30b   :  { %700 = dma.vmem_to_hbm [thread:$0]  %s693_s6, 256, %s695_s15, [#allocation4], %s911_s17, %s911_s17, %s912_s18  }
 0x30c   :  { %908 = dma.done.wait [#allocation4], 256  }
 0x30d   :  { %909 = vsyncadd [#allocation4], 4294967040 }
 0x30e   :  { %705 = vsyncpa [#allocation3], 1 }
 0x30f   :  { %706 = vsyncpa [#allocation6], 1 }
 0x310   :  { %707 = vsyncpa [#allocation9], 1 }
 0x311   :  { %708 = vsyncpa [#allocation4], 1 }

// kernel: tpu_custom_call.1
= control target key start
LH: loop header
LB: loop body
LE: loop exit
PB: predicated region body
PF: predicated region fallthrough
CT: control target
= control target key end

     0   :  { %14 = vsyncpa [#allocation3], 0  ;;  %s1175_s0 = inlined_call_operand.vmem [shape: bf16[16,4], index: 0, kind: input, shape index: {}]   ;;  %s1176_s1 = inlined_call_operand.vmem [shape: bf16[4,16], index: 1, kind: input, shape index: {}]   ;;  %s1177_s2 = inlined_call_operand.hbm [shape: f32[1,16], index: 2, kind: input, shape index: {}]   ;;  %s1178_s3 = inlined_call_operand.vmem [shape: bf16[16,16], index: 3, kind: input, shape index: {}]   ;;  %s1179_s4 = inlined_call_operand.vmem [shape: f32[1,16], index: 4, kind: input, shape index: {}]   ;;  %s1180_s5 = inlined_call_operand.hbm [shape: bf16[16,256], index: 5, kind: input, shape index: {}]   ;;  %s1181_s6 = inlined_call_operand.vmem [shape: f32[1,256], index: 6, kind: input, shape index: {}]   ;;  %s1182_s7 = inlined_call_operand.hbm [shape: f32[256,128], index: 7, kind: input, shape index: {}]   ;;  %s1183_s8 = inlined_call_operand.hbm [shape: f32[256,128], index: 8, kind: input, shape index: {}]   ;;  %s1184_s9 = inlined_call_operand.hbm [shape: f32[16,128], index: 9, kind: output, shape index: {}]  }
   0x1   :  { %15 = vsyncpa [#allocation6], 0 }
   0x2   :  { %16 = vsyncpa [#allocation9], 0  ;;  %s41_s11 = sshll.u32 %s1180_s5, 4  ;;  %s42_s11 = int_to_ptr.hbm [resolvable:$true] %s41_s11 }
   0x3   :  { %17 = vsyncpa [#allocation4], 0  ;;  %s910_s12 = smov [#allocation5]   ;;  %s27_s16 = sshll.u32 %s1177_s2, 4  ;;  %s28_s16 = int_to_ptr.hbm [resolvable:$true] %s27_s16 }
   0x4   :  { %s43_s13 = sshll.u32 %s910_s12, 4  ;;  %s911_s17 = smov 128   ;;  %s44_s13 = int_to_ptr.vmem [resolvable:$true] %s43_s13 }
   0x5   :  { %s912_s18 = smov 8   ;;  %s913_s19 = smov [#allocation2]  }
   0x6   :  { %49 = dma.hbm_to_vmem [thread:$0]  %s42_s11, 256, %s44_s13, [#allocation6], %s911_s17, %s911_s17, %s912_s18  }
   0x7   :  { %s29_s20 = sshll.u32 %s913_s19, 4  ;;  %s56_s22 = sshll.u32 %s1182_s7, 4  ;;  %s30_s20 = int_to_ptr.vmem [resolvable:$true] %s29_s20  ;;  %s57_s22 = int_to_ptr.hbm [resolvable:$true] %s56_s22 }
   0x8   :  { %32 = dma.hbm_to_vmem [thread:$0]  %s28_s16, 16, %s30_s20, [#allocation3]  }
   0x9   :  { %s69_s2 = sshll.u32 %s1183_s8, 4  ;;  %s914_s25 = smov [#allocation7]   ;;  %s70_s2 = int_to_ptr.hbm [resolvable:$true] %s69_s2 }
   0xa   :  { %s58_s26 = sshll.u32 %s914_s25, 4  ;;  %s915_s27 = smov [#allocation8]   ;;  %s59_s26 = int_to_ptr.vmem [resolvable:$true] %s58_s26 }
   0xb   :  { %64 = dma.hbm_to_vmem [thread:$0]  %s57_s22, 4096, %s59_s26, [#allocation6], %s911_s17, %s911_s17, %s912_s18  }
   0xc   :  { %s71_s28 = sshll.u32 %s915_s27, 4  ;;  %s72_s28 = int_to_ptr.vmem [resolvable:$true] %s71_s28 }
   0xd   :  { %77 = dma.hbm_to_vmem [thread:$0]  %s70_s2, 4096, %s72_s28, [#allocation9], %s911_s17, %s911_s17, %s912_s18  }
   0xe   :  { %902 = dma.done.wait [#allocation3], 16  }
   0xf   :  { %903 = vsyncadd [#allocation3], 4294967280 }
  0x10   :  { %904 = dma.done.wait [#allocation6], 4352  }
  0x11   :  { %905 = vsyncadd [#allocation6], 4294962944 }
  0x12   :  { %906 = dma.done.wait [#allocation9], 4096  }
  0x13   :  { %907 = vsyncadd [#allocation9], 4294963200  ;;  %vm111_vm0 = vcmask 1041408   ;;  %v97_v0 = vld [vmem:[%s1176_s1] sm:$0x3]  ;;  %vm107_vm1 = vcmask 31744  }
  0x14   :  { %v113_v1 = vsel %vm111_vm0, %v97_v0, 0  ;;  %v730_v2 = vld [vmem:[%s1175_s0] sm:$0xff]  ;;  %vm144_vm2 = vcmask 130048   ;;  %v733_v13 = vld [vmem:[#allocation5 + $0x4] sm:$0xf0]  ;;  %vm215_vm3 = vcmask 1047556  }
  0x15   :  { %122 = vmatpush.bf16.msra.mxu0 %v113_v1  ;;  %v731_v3 = vld [vmem:[%s1178_s3] sm:$0xff]  ;;  %v723_v16 = vld [vmem:[#allocation5 + $0x8] sm:$0xf0]  ;;  %v916_v27 = vmov 1983009808   ;;  %s694_s15 = sshll.u32 %s1184_s9, 4  ;;  %s695_s15 = int_to_ptr.hbm [resolvable:$true] %s694_s15 }
  0x16   :  { %155 = vmatpush.bf16.msra.mxu1 %v731_v3  ;;  %v744_v5 = vld [vmem:[#allocation2] ss:$0 sm:$0xff]  ;;  %v721_v12 = vld [vmem:[#allocation5] sm:$0xf]  ;;  %v732_v14 = vld [vmem:[#allocation5 + $0x4] sm:$0xf]  ;;  %v218_v28 = vunpack.c.l.s4 %v916_v27 }
  0x17   :  { %v722_v15 = vor.u32 %v733_v13, %v721_v12  ;;  %v726_v17 = vor.u32 %v732_v14, %v723_v16  ;;  %v745_v19 = vld [vmem:[%s1179_s4] ss:$0 sm:$0xff]  ;;  %v917_v34 = vmov 1934713408   ;;  %s919_s4 = smov [#allocation10]  }
  0x18   :  { %713 = vmatmul.msk.bf16.vlgmr.msra.gmra.mxu0 %vm107_vm1, %v730_v2  ;;  %v167_v26 = vld [vmem:[%s1181_s6] sm:$0x3]  ;;  %v1010_v31 = vunpack.c.0.s8 %v218_v28  ;;  %v240_v35 = vunpack.c.l.s4 %v917_v34  ;;  %s692_s6 = sshll.u32 %s919_s4, 4  ;;  %s693_s6 = int_to_ptr.vmem [resolvable:$true] %s692_s6 }
  0x19   :  { %193 = vmatpush.bf16.msra.mxu2 %v722_v15  ;;  %207 = vmatpush.bf16.msra.mxu3 %v726_v17  ;;  %v169_v29 = vperm.slane %v167_v26, 0  ;;  %v170_v30 = vperm.slane %v167_v26, 1 }
  0x1a   :  { %v1014_v42 = vunpack.c.0.s8 %v240_v35 }
  0x95   :  { %v124_v4 = vpop.f32.mrf.mxu0 }
  0x96   :  { %v125_v6 = vadd.f32 %v744_v5, %v124_v4 }
  0x98   :  { %v129_v9 = vmax.f32 %v125_v6, 0.0 }
  0x9d   :  { %v126_v7 = vpop.f32.mrf.mxu0 }
  0x9e   :  { %v127_v8 = vadd.f32 %v744_v5, %v126_v7 }
  0xa0   :  { %v130_v10 = vmax.f32 %v127_v8, 0.0 }
  0xa2   :  { %v131_v11 = vpack.c.bf16 %v130_v10, %v129_v9 }
  0xa4   :  { %718 = vmatmul.msk.bf16.vlgmr.msra.gmra.mxu1 %vm144_vm2, %v131_v11 }
 0x121   :  { %v157_v18 = vpop.f32.mrf.mxu1 }
 0x122   :  { %v158_v20 = vadd.f32 %v745_v19, %v157_v18 }
 0x124   :  { %v162_v23 = vmax.f32 %v158_v20, 0.0 }
 0x129   :  { %v159_v21 = vpop.f32.mrf.mxu1 }
 0x12a   :  { %v160_v22 = vadd.f32 %v745_v19, %v159_v21 }
 0x12c   :  { %v163_v24 = vmax.f32 %v160_v22, 0.0 }
 0x12e   :  { %v164_v25 = vpack.c.bf16 %v163_v24, %v162_v23 }
 0x130   :  { %727 = vmatmul.msk.bf16.vlgmr.msra.gmra.mxu2 %vm144_vm2, %v164_v25  ;;  %728 = vmatmul.msk.bf16.vlgmr.msra.gmra.mxu3 %vm144_vm2, %v164_v25 }
 0x1b3   :  { %v195_v32 = vpop.f32.mrf.mxu2  ;;  %v209_v33 = vpop.f32.mrf.mxu3 }
 0x1b4   :  { %v196_v36 = vadd.f32 %v195_v32, %v169_v29  ;;  %v210_v37 = vadd.f32 %v209_v33, %v170_v30 }
 0x1b6   :  { %v214_v38 = vrot.slane %v196_v36, 4  ;;  %v220_v39 = vperm.slane %v196_v36, %v1010_v31  ;;  %v225_v40 = vrot.slane %v210_v37, 4  ;;  %v230_v41 = vperm.slane %v210_v37, %v1010_v31 }
 0x1b8   :  { %v216_v43 = vsel %vm215_vm3, 0.0, %v214_v38  ;;  %v237_v44 = vrot.slane %v220_v39, 4  ;;  %v226_v45 = vsel %vm215_vm3, 0.0, %v225_v40  ;;  %v235_v46 = vrot.slane %v230_v41, 4 }
 0x1b9   :  { %v224_v47 = vperm.slane %v216_v43, %v1010_v31  ;;  %v234_v48 = vperm.slane %v226_v45, %v1010_v31 }
 0x1ba   :  { %v238_v49 = vsel %vm215_vm3, %v230_v41, %v237_v44  ;;  %v236_v50 = vsel %vm215_vm3, %v235_v46, %v220_v39 }
 0x1bb   :  { %v249_v51 = vrot.slane %v224_v47, 4  ;;  %v247_v52 = vrot.slane %v234_v48, 4  ;;  %v197_v53 = vpop.f32.mrf.mxu2  ;;  %v211_v54 = vpop.f32.mrf.mxu3  ;;  %v1023_v55 = vperm.slane %v238_v49, %v1014_v42  ;;  %v1026_v56 = vperm.slane %v236_v50, %v1014_v42 }
 0x1bc   :  { %v198_v57 = vadd.f32 %v197_v53, %v169_v29  ;;  %v212_v58 = vadd.f32 %v211_v54, %v170_v30  ;;  %v526_v53 = vld [vmem:[#allocation7 + $0xf8] sm:$0xff] }
 0x1bd   :  { %v325_v59 = vsel %vm111_vm0, %v1023_v55, -inf  ;;  %v319_v60 = vsel %vm111_vm0, %v1026_v56, -inf  ;;  %v261_v61 = vrot.slane %v1023_v55, 4  ;;  %v259_v0 = vrot.slane %v1026_v56, 4  ;;  %v604_v54 = vld [vmem:[#allocation8 + $0xf8] sm:$0xff]  ;;  %550 = vmatpush.msrb.mxu1 %v526_v53  ;;  %v515_v53 = vld [vmem:[#allocation7 + $0xa0] sm:$0xff] }
 0x1be   :  { %v267_v62 = vrot.slane %v198_v57, 4  ;;  %v277_v63 = vrot.slane %v212_v58, 4  ;;  %326 = vmax.xlane.f32.xlu2 %v325_v59  ;;  %320 = vmax.xlane.f32.xlu1 %v319_v60  ;;  %v250_v2 = vsel %vm215_vm3, %v234_v48, %v249_v51  ;;  %v248_v3 = vsel %vm215_vm3, %v247_v52, %v224_v47  ;;  %v588_v59 = vld [vmem:[#allocation8 + $0x78] sm:$0xff]  ;;  %v603_v60 = vld [vmem:[#allocation8 + $0xf0] sm:$0xff] }
 0x1bf   :  { %v1035_v1 = vsel %vm215_vm3, 0.0, %v261_v61  ;;  %v1046_v9 = vsel %vm215_vm3, 0.0, %v259_v0  ;;  %v1049_v10 = vperm.slane %v250_v2, %v1014_v42  ;;  %v1052_v11 = vperm.slane %v248_v3, %v1014_v42  ;;  %633 = vmatpush.msrb.mxu3 %v604_v54  ;;  %610 = vmatpush.msrb.mxu2 %v588_v59  ;;  %v509_v61 = vld [vmem:[#allocation7 + $0x70] sm:$0xff]  ;;  %v602_v0 = vld [vmem:[#allocation8 + $0xe8] sm:$0xff]  ;;  %v523_v3 = vld [vmem:[#allocation7 + $0xe0] sm:$0xff] }
 0x1c0   :  { %v268_v4 = vsel %vm215_vm3, 0.0, %v267_v62  ;;  %v278_v5 = vsel %vm215_vm3, 0.0, %v277_v63  ;;  %v328_v8 = vsel %vm111_vm0, %v1035_v1, -inf  ;;  %v272_v12 = vperm.slane %v198_v57, %v1010_v31  ;;  %v510_v57 = vld [vmem:[#allocation7 + $0x78] sm:$0xff]  ;;  %v524_v62 = vld [vmem:[#allocation7 + $0xe8] sm:$0xff]  ;;  %v587_v63 = vld [vmem:[#allocation8 + $0x70] sm:$0xff] }
 0x1c1   :  { %v276_v6 = vperm.slane %v268_v4, %v1010_v31  ;;  %v286_v7 = vperm.slane %v278_v5, %v1010_v31  ;;  %329 = vmax.xlane.f32.xlu0 %v328_v8  ;;  %v322_v15 = vsel %vm111_vm0, %v1046_v9, -inf  ;;  %v337_v16 = vsel %vm111_vm0, %v1049_v10, -inf  ;;  %527 = vmatpush.msrb.mxu0 %v510_v57  ;;  %v508_v2 = vld [vmem:[#allocation7 + $0x68] sm:$0xff]  ;;  %v601_v5 = vld [vmem:[#allocation8 + $0xe0] sm:$0xff] }
 0x1c2   :  { %v263_v18 = vrot.slane %v1052_v11, 4  ;;  %v289_v19 = vrot.slane %v272_v12, 4  ;;  %v282_v21 = vperm.slane %v212_v58, %v1010_v31  ;;  %v331_v22 = vsel %vm111_vm0, %v1052_v11, -inf  ;;  %v525_v58 = vld [vmem:[#allocation7 + $0xf0] sm:$0xff]  ;;  %634 = vmatpush.msrb.mxu3 %v603_v60  ;;  %611 = vmatpush.msrb.mxu2 %v587_v63  ;;  %v586_v4 = vld [vmem:[#allocation8 + $0x68] sm:$0xff]  ;;  %v585_v8 = vld [vmem:[#allocation8 + $0x60] sm:$0xff] }
 0x1c3   :  { %v301_v13 = vrot.slane %v276_v6, 4  ;;  %v299_v14 = vrot.slane %v286_v7, 4  ;;  %v265_v25 = vrot.slane %v1049_v10, 4  ;;  %551 = vmatpush.msrb.mxu1 %v525_v58  ;;  %528 = vmatpush.msrb.mxu0 %v509_v61  ;;  %v578_v54 = vld [vmem:[#allocation8 + $0x28] sm:$0xff]  ;;  %v593_v58 = vld [vmem:[#allocation8 + $0xa0] sm:$0xff]  ;;  %v514_v60 = vld [vmem:[#allocation7 + $0x98] sm:$0xff] }
 0x1c4   :  { %v1069_v24 = vsel %vm215_vm3, 0.0, %v263_v18  ;;  %v290_v27 = vsel %vm215_vm3, %v282_v21, %v289_v19  ;;  %v287_v35 = vrot.slane %v282_v21, 4  ;;  %635 = vmatpush.msrb.mxu3 %v602_v0  ;;  %612 = vmatpush.msrb.mxu2 %v586_v4  ;;  %v520_v18 = vld [vmem:[#allocation7 + $0xc8] sm:$0xff]  ;;  %v583_v19 = vld [vmem:[#allocation8 + $0x50] sm:$0xff]  ;;  %v499_v59 = vld [vmem:[#allocation7 + $0x20] sm:$0xff] }
 0x1c5   :  { %v302_v17 = vsel %vm215_vm3, %v286_v7, %v301_v13  ;;  %v300_v20 = vsel %vm215_vm3, %v299_v14, %v276_v6  ;;  %v334_v29 = vsel %vm111_vm0, %v1069_v24, -inf  ;;  %v1081_v30 = vsel %vm215_vm3, 0.0, %v265_v25  ;;  %552 = vmatpush.msrb.mxu1 %v524_v62  ;;  %529 = vmatpush.msrb.mxu0 %v508_v2  ;;  %v507_v6 = vld [vmem:[#allocation7 + $0x60] sm:$0xff]  ;;  %v522_v7 = vld [vmem:[#allocation7 + $0xd8] sm:$0xff]  ;;  %v521_v14 = vld [vmem:[#allocation7 + $0xd0] sm:$0xff] }
 0x1c6   :  { %323 = vmax.xlane.f32.xlu2 %v322_v15  ;;  %338 = vmax.xlane.f32.xlu1 %v337_v16  ;;  %v1066_v23 = vperm.slane %v302_v17, %v1014_v42  ;;  %v1073_v26 = vperm.slane %v300_v20, %v1014_v42  ;;  %v1086_v34 = vperm.slane %v290_v27, %v1014_v42  ;;  %v340_v36 = vsel %vm111_vm0, %v1081_v30, -inf  ;;  %v506_v13 = vld [vmem:[#allocation7 + $0x58] sm:$0xff]  ;;  %v599_v16 = vld [vmem:[#allocation8 + $0xd0] sm:$0xff]  ;;  %v598_v20 = vld [vmem:[#allocation8 + $0xc8] sm:$0xff] }
 0x1c7   :  { %v288_v40 = vsel %vm215_vm3, %v287_v35, %v272_v12  ;;  %553 = vmatpush.msrb.mxu1 %v523_v3  ;;  %636 = vmatpush.msrb.mxu3 %v601_v5  ;;  %v600_v12 = vld [vmem:[#allocation8 + $0xd8] sm:$0xff]  ;;  %v505_v17 = vld [vmem:[#allocation7 + $0x50] sm:$0xff]  ;;  %v504_v21 = vld [vmem:[#allocation7 + $0x48] sm:$0xff] }
 0x1c8   :  { %v361_v28 = vsel %vm111_vm0, %v1066_v23, -inf  ;;  %v317_v32 = vrot.slane %v1066_v23, 4  ;;  %v315_v33 = vrot.slane %v1073_v26, 4  ;;  %v313_v39 = vrot.slane %v1086_v34, 4  ;;  %530 = vmatpush.msrb.mxu0 %v507_v6  ;;  %613 = vmatpush.msrb.mxu2 %v585_v8  ;;  %v584_v15 = vld [vmem:[#allocation8 + $0x58] sm:$0xff]  ;;  %v582_v25 = vld [vmem:[#allocation8 + $0x48] sm:$0xff] }
 0x1c9   :  { %332 = vmax.xlane.f32.xlu0 %v331_v22  ;;  %v1106_v45 = vperm.slane %v288_v40, %v1014_v42  ;;  %v355_v48 = vsel %vm111_vm0, %v1073_v26, -inf  ;;  %v349_v49 = vsel %vm111_vm0, %v1086_v34, -inf  ;;  %554 = vmatpush.msrb.mxu1 %v522_v7  ;;  %v519_v22 = vld [vmem:[#allocation7 + $0xc0] sm:$0xff]  ;;  %v517_v40 = vld [vmem:[#allocation7 + $0xb0] sm:$0xff]  ;;  %v592_v0 = vld [vmem:[#allocation8 + $0x98] sm:$0xff] }
 0x1ca   :  { %v1091_v37 = vsel %vm215_vm3, 0.0, %v317_v32  ;;  %v1094_v38 = vsel %vm215_vm3, 0.0, %v315_v33  ;;  %v1103_v44 = vsel %vm215_vm3, 0.0, %v313_v39  ;;  %637 = vmatpush.msrb.mxu3 %v600_v12  ;;  %531 = vmatpush.msrb.mxu0 %v506_v13  ;;  %v597_v27 = vld [vmem:[#allocation8 + $0xc0] sm:$0xff]  ;;  %v596_v33 = vld [vmem:[#allocation8 + $0xb8] sm:$0xff]  ;;  %v591_v7 = vld [vmem:[#allocation8 + $0x90] sm:$0xff] }
 0x1cb   :  { %v364_v41 = vsel %vm111_vm0, %v1091_v37, -inf  ;;  %v358_v43 = vsel %vm111_vm0, %v1094_v38, -inf  ;;  %v352_v46 = vsel %vm111_vm0, %v1103_v44, -inf  ;;  %v311_v47 = vrot.slane %v1106_v45, 4  ;;  %555 = vmatpush.msrb.mxu1 %v521_v14  ;;  %614 = vmatpush.msrb.mxu2 %v584_v15  ;;  %v581_v32 = vld [vmem:[#allocation8 + $0x40] sm:$0xff]  ;;  %v502_v39 = vld [vmem:[#allocation7 + $0x38] sm:$0xff] }
 0x1cc   :  { %v343_v52 = vsel %vm111_vm0, %v1106_v45, -inf  ;;  %638 = vmatpush.msrb.mxu3 %v599_v16  ;;  %532 = vmatpush.msrb.mxu0 %v505_v17  ;;  %v577_v61 = vld [vmem:[#allocation8 + $0x20] sm:$0xff]  ;;  %v498_v4 = vld [vmem:[#allocation7 + $0x18] sm:$0xff]  ;;  %v497_v8 = vld [vmem:[#allocation7 + $0x10] sm:$0xff] }
 0x1cd   :  { %v1116_v50 = vsel %vm215_vm3, 0.0, %v311_v47  ;;  %556 = vmatpush.msrb.mxu1 %v520_v18  ;;  %615 = vmatpush.msrb.mxu2 %v583_v19  ;;  %v516_v47 = vld [vmem:[#allocation7 + $0xa8] sm:$0xff]  ;;  %v576_v5 = vld [vmem:[#allocation8 + $0x18] sm:$0xff]  ;;  %v575_v12 = vld [vmem:[#allocation8 + $0x10] sm:$0xff] }
 0x1ce   :  { %362 = vmax.xlane.f32.xlu2 %v361_v28  ;;  %335 = vmax.xlane.f32.xlu1 %v334_v29  ;;  %v346_v51 = vsel %vm111_vm0, %v1116_v50, -inf  ;;  %v503_v28 = vld [vmem:[#allocation7 + $0x40] sm:$0xff]  ;;  %v518_v29 = vld [vmem:[#allocation7 + $0xb8] sm:$0xff]  ;;  %v590_v15 = vld [vmem:[#allocation8 + $0x88] sm:$0xff] }
 0x1cf   :  { %639 = vmatpush.msrb.mxu3 %v598_v20  ;;  %533 = vmatpush.msrb.mxu0 %v504_v21  ;;  %v511_v18 = vld [vmem:[#allocation7 + $0x80] sm:$0xff]  ;;  %v574_v19 = vld [vmem:[#allocation8 + $0x8] sm:$0xff] }
 0x1d0   :  { %557 = vmatpush.msrb.mxu1 %v519_v22  ;;  %616 = vmatpush.msrb.mxu2 %v582_v25  ;;  %v589_v21 = vld [vmem:[#allocation8 + $0x80] sm:$0xff] }
 0x1d1   :  { %341 = vmax.xlane.f32.xlu0 %v340_v36  ;;  %640 = vmatpush.msrb.mxu3 %v597_v27  ;;  %v495_v22 = vld [vmem:[#allocation7] sm:$0xff] }
 0x1d2   :  { %534 = vmatpush.msrb.mxu0 %v503_v28  ;;  %558 = vmatpush.msrb.mxu1 %v518_v29  ;;  %v573_v25 = vld [vmem:[#allocation8] sm:$0xff] }
 0x1d3   :  { %617 = vmatpush.msrb.mxu2 %v581_v32  ;;  %641 = vmatpush.msrb.mxu3 %v596_v33 }
 0x1d4   :  { %535 = vmatpush.msrb.mxu0 %v502_v39  ;;  %559 = vmatpush.msrb.mxu1 %v517_v40 }
 0x1d6   :  { %365 = vmax.xlane.f32.xlu2 %v364_v41  ;;  %359 = vmax.xlane.f32.xlu1 %v358_v43  ;;  %v580_v41 = vld [vmem:[#allocation8 + $0x38] sm:$0xff]  ;;  %v595_v43 = vld [vmem:[#allocation8 + $0xb0] sm:$0xff] }
 0x1d7   :  { %618 = vmatpush.msrb.mxu2 %v580_v41  ;;  %642 = vmatpush.msrb.mxu3 %v595_v43 }
 0x1d8   :  { %560 = vmatpush.msrb.mxu1 %v516_v47 }
 0x1d9   :  { %353 = vmax.xlane.f32.xlu0 %v352_v46  ;;  %v501_v46 = vld [vmem:[#allocation7 + $0x30] sm:$0xff] }
 0x1da   :  { %536 = vmatpush.msrb.mxu0 %v501_v46  ;;  %561 = vmatpush.msrb.mxu1 %v515_v53 }
 0x1dc   :  { %562 = vmatpush.msrb.mxu1 %v514_v60 }
 0x1de   :  { %356 = vmax.xlane.f32.xlu2 %v355_v48  ;;  %350 = vmax.xlane.f32.xlu1 %v349_v49  ;;  %v579_v48 = vld [vmem:[#allocation8 + $0x30] sm:$0xff]  ;;  %v594_v49 = vld [vmem:[#allocation8 + $0xa8] sm:$0xff] }
 0x1df   :  { %619 = vmatpush.msrb.mxu2 %v579_v48  ;;  %643 = vmatpush.msrb.mxu3 %v594_v49 }
 0x1e1   :  { %347 = vmax.xlane.f32.xlu0 %v346_v51  ;;  %620 = vmatpush.msrb.mxu2 %v578_v54 }
 0x1e2   :  { %644 = vmatpush.msrb.mxu3 %v593_v58 }
 0x1e3   :  { %621 = vmatpush.msrb.mxu2 %v577_v61 }
 0x1e4   :  { %645 = vmatpush.msrb.mxu3 %v592_v0 }
 0x1e5   :  { %622 = vmatpush.msrb.mxu2 %v576_v5 }
 0x1e6   :  { %646 = vmatpush.msrb.mxu3 %v591_v7 }
 0x1e7   :  { %623 = vmatpush.msrb.mxu2 %v575_v12 }
 0x1e8   :  { %647 = vmatpush.msrb.mxu3 %v590_v15 }
 0x1e9   :  { %344 = vmax.xlane.f32.xlu0 %v343_v52  ;;  %v500_v52 = vld [vmem:[#allocation7 + $0x28] sm:$0xff]  ;;  %624 = vmatpush.msrb.mxu2 %v574_v19 }
 0x1ea   :  { %537 = vmatpush.msrb.mxu0 %v500_v52  ;;  %648 = vmatpush.msrb.mxu3 %v589_v21 }
 0x1eb   :  { %625 = vmatpush.msrb.mxu2 %v573_v25 }
 0x1ec   :  { %538 = vmatpush.msrb.mxu0 %v499_v59 }
 0x1ee   :  { %539 = vmatpush.msrb.mxu0 %v498_v4 }
 0x1f0   :  { %540 = vmatpush.msrb.mxu0 %v497_v8 }
 0x231   :  { %v327_v35 = vpop.xlane.xlu2 %326  ;;  %v1122_v36 = vpop.xlane.xlu1 %320 }
 0x232   :  { %v369_v62 = vsub.f32 %v1023_v55, %v327_v35  ;;  %v512_v55 = vld [vmem:[#allocation7 + $0x88] sm:$0xff]  ;;  %v367_v20 = vsub.f32 %v1026_v56, %v1122_v36 }
 0x234   :  { %v330_v51 = vpop.xlane.xlu0 %329  ;;  %v387_v13 = vmul.f32 1.442695, %v369_v62  ;;  %v383_v33 = vmul.f32 1.442695, %v367_v20 }
 0x235   :  { %v370_v57 = vsub.f32 %v1035_v1, %v330_v51  ;;  %v513_v1 = vld [vmem:[#allocation7 + $0x90] sm:$0xff] }
 0x236   :  { %563 = vmatpush.msrb.mxu1 %v513_v1 }
 0x237   :  { %v389_v63 = vmul.f32 1.442695, %v370_v57 }
 0x238   :  { %564 = vmatpush.msrb.mxu1 %v512_v55 }
 0x239   :  { %v324_v2 = vpop.xlane.xlu2 %323  ;;  %v339_v3 = vpop.xlane.xlu1 %338  ;;  %746 = vpow2.f32 %v389_v63 }
 0x23a   :  { %v368_v6 = vsub.f32 %v1046_v9, %v324_v2  ;;  %v373_v16 = vsub.f32 %v1049_v10, %v339_v3  ;;  %v496_v9 = vld [vmem:[#allocation7 + $0x8] sm:$0xff]  ;;  %565 = vmatpush.msrb.mxu1 %v511_v18 }
 0x23b   :  { %541 = vmatpush.msrb.mxu0 %v496_v9 }
 0x23c   :  { %v385_v14 = vmul.f32 1.442695, %v368_v6  ;;  %v333_v17 = vpop.xlane.xlu0 %332  ;;  %v395_v10 = vmul.f32 1.442695, %v373_v16 }
 0x23d   :  { %542 = vmatpush.msrb.mxu0 %v495_v22  ;;  %v371_v27 = vsub.f32 %v1052_v11, %v333_v17 }
 0x23e   :  { %748 = vpow2.f32 %v385_v14 }
 0x23f   :  { %750 = vpow2.f32 %v387_v13  ;;  %v747_v32 = vpop.eup %746  ;;  %v391_v39 = vmul.f32 1.442695, %v371_v27 }
 0x240   :  { %v421_v36 = vrot.slane %v747_v32, 4  ;;  %752 = vpow2.f32 %v395_v10 }
 0x241   :  { %v363_v28 = vpop.xlane.xlu2 %362  ;;  %v336_v29 = vpop.xlane.xlu1 %335  ;;  %754 = vpow2.f32 %v383_v33 }
 0x242   :  { %v372_v56 = vsub.f32 %v1069_v24, %v336_v29  ;;  %756 = vpow2.f32 %v391_v39  ;;  %v381_v57 = vsub.f32 %v1066_v23, %v363_v28 }
 0x244   :  { %v749_v35 = vpop.eup %748  ;;  %v342_v40 = vpop.xlane.xlu0 %341  ;;  %v393_v47 = vmul.f32 1.442695, %v372_v56  ;;  %v411_v2 = vmul.f32 1.442695, %v381_v57 }
 0x245   :  { %v751_v41 = vpop.eup %750  ;;  %v374_v43 = vsub.f32 %v1081_v30, %v342_v40  ;;  %v422_v46 = vsel %vm215_vm3, %v421_v36, %v749_v35 }
 0x246   :  { %v415_v48 = vrot.slane %v751_v41, 4  ;;  %v426_v24 = vperm.slane %v422_v46, %v1010_v31  ;;  %v753_v53 = vpop.eup %752 }
 0x247   :  { %v397_v11 = vmul.f32 1.442695, %v374_v43  ;;  %v755_v54 = vpop.eup %754  ;;  %v427_v61 = vrot.slane %v753_v53, 4 }
 0x248   :  { %v416_v60 = vsel %vm215_vm3, %v415_v48, %v755_v54  ;;  %v439_v62 = vrot.slane %v426_v24, 4  ;;  %v757_v63 = vpop.eup %756 }
 0x249   :  { %v366_v49 = vpop.xlane.xlu2 %365  ;;  %v360_v51 = vpop.xlane.xlu1 %359  ;;  %758 = vpow2.f32 %v397_v11  ;;  %v420_v3 = vperm.slane %v416_v60, %v1010_v31 }
 0x24a   :  { %v382_v52 = vsub.f32 %v1091_v37, %v366_v49  ;;  %760 = vpow2.f32 %v393_v47  ;;  %v380_v30 = vsub.f32 %v1094_v38, %v360_v51  ;;  %v428_v38 = vsel %vm215_vm3, %v427_v61, %v757_v63 }
 0x24b   :  { %v440_v7 = vsel %vm215_vm3, %v439_v62, %v420_v3  ;;  %v432_v15 = vperm.slane %v428_v38, %v1010_v31  ;;  %v918_v3 = vmov 0.0  }
 0x24c   :  { %v413_v58 = vmul.f32 1.442695, %v382_v52  ;;  %v354_v59 = vpop.xlane.xlu0 %353  ;;  %v409_v1 = vmul.f32 1.442695, %v380_v30  ;;  %v444_v16 = vperm.slane %v440_v7, %v1014_v42 }
 0x24d   :  { %v378_v37 = vsub.f32 %v1103_v44, %v354_v59 }
 0x24e   :  { %762 = vpow2.f32 %v413_v58  ;;  %v453_v25 = vrot.slane %v444_v16, 4 }
 0x24f   :  { %v759_v0 = vpop.eup %758  ;;  %764 = vpow2.f32 %v411_v2  ;;  %v405_v13 = vmul.f32 1.442695, %v378_v37  ;;  %v605_v2 = vlaneseq }
 0x250   :  { %v433_v4 = vrot.slane %v759_v0, 4  ;;  %v761_v5 = vpop.eup %760  ;;  %766 = vpow2.f32 %v409_v1 }
 0x251   :  { %v357_v23 = vpop.xlane.xlu2 %356  ;;  %v351_v55 = vpop.xlane.xlu1 %350  ;;  %v606_v37 = vand.u32 127, %v605_v2 }
 0x252   :  { %v379_v6 = vsub.f32 %v1073_v26, %v357_v23  ;;  %v434_v8 = vsel %vm215_vm3, %v433_v4, %v761_v5  ;;  %v377_v9 = vsub.f32 %v1086_v34, %v351_v55 }
 0x253   :  { %v438_v12 = vperm.slane %v434_v8, %v1010_v31  ;;  %vm607_vm4 = vcmp.ge.s32.totalorder %v606_v37, 2 }
 0x254   :  { %v407_v44 = vmul.f32 1.442695, %v379_v6  ;;  %v348_v14 = vpop.xlane.xlu0 %347  ;;  %v763_v17 = vpop.eup %762  ;;  %v403_v27 = vmul.f32 1.442695, %v377_v9 }
 0x255   :  { %v445_v26 = vrot.slane %v438_v12, 4  ;;  %v376_v18 = vsub.f32 %v1116_v50, %v348_v14  ;;  %v473_v21 = vrot.slane %v763_v17, 4  ;;  %v765_v10 = vpop.eup %764 }
 0x256   :  { %768 = vpow2.f32 %v407_v44  ;;  %v767_v28 = vpop.eup %766  ;;  %v467_v34 = vrot.slane %v765_v10, 4 }
 0x257   :  { %770 = vpow2.f32 %v405_v13  ;;  %v401_v19 = vmul.f32 1.442695, %v376_v18  ;;  %v446_v20 = vsel %vm215_vm3, %v445_v26, %v432_v15  ;;  %v474_v56 = vsel %vm215_vm3, %v473_v21, %v767_v28 }
 0x258   :  { %v450_v22 = vperm.slane %v446_v20, %v1014_v42  ;;  %v478_v46 = vperm.slane %v474_v56, %v1010_v31 }
 0x259   :  { %772 = vpow2.f32 %v401_v19 }
 0x25a   :  { %v454_v29 = vsel %vm215_vm3, %v450_v22, %v453_v25  ;;  %v451_v32 = vrot.slane %v450_v22, 4  ;;  %774 = vpow2.f32 %v403_v27  ;;  %v485_v51 = vrot.slane %v478_v46, 4 }
 0x25b   :  { %566 = vmatmul.f32.vlgmr.msrb.gmra.mxu1 %v454_v29  ;;  %649 = vmatmul.f32.vlgmr.msrb.gmra.mxu3 %v454_v29 }
 0x25c   :  { %v769_v33 = vpop.eup %768  ;;  %v345_v50 = vpop.xlane.xlu0 %344  ;;  %v452_v35 = vsel %vm215_vm3, %v451_v32, %v444_v16 }
 0x25d   :  { %v771_v36 = vpop.eup %770  ;;  %v375_v39 = vsub.f32 %v1106_v45, %v345_v50  ;;  %543 = vmatmul.f32.vlgmr.msrb.gmra.mxu0 %v452_v35  ;;  %626 = vmatmul.f32.vlgmr.msrb.gmra.mxu2 %v452_v35  ;;  %v468_v40 = vsel %vm215_vm3, %v467_v34, %v769_v33 }
 0x25e   :  { %v461_v47 = vrot.slane %v771_v36, 4  ;;  %v472_v11 = vperm.slane %v468_v40, %v1010_v31 }
 0x25f   :  { %v773_v41 = vpop.eup %772  ;;  %v399_v43 = vmul.f32 1.442695, %v375_v39 }
 0x260   :  { %v462_v48 = vsel %vm215_vm3, %v461_v47, %v773_v41  ;;  %v775_v49 = vpop.eup %774  ;;  %v486_v45 = vsel %vm215_vm3, %v485_v51, %v472_v11 }
 0x261   :  { %776 = vpow2.f32 %v399_v43  ;;  %v466_v52 = vperm.slane %v462_v48, %v1010_v31  ;;  %v455_v24 = vrot.slane %v775_v49, 4  ;;  %v490_v57 = vperm.slane %v486_v45, %v1014_v42 }
 0x263   :  { %v479_v30 = vrot.slane %v466_v52, 4  ;;  %v491_v61 = vrot.slane %v490_v57, 4 }
 0x267   :  { %v777_v53 = vpop.eup %776 }
 0x268   :  { %v456_v54 = vsel %vm215_vm3, %v455_v24, %v777_v53 }
 0x269   :  { %v460_v58 = vperm.slane %v456_v54, %v1010_v31  ;;  %v729_v31 = vsel %vm607_vm4, 1.0, %v918_v3 }
 0x26b   :  { %v480_v59 = vsel %vm215_vm3, %v479_v30, %v460_v58 }
 0x26c   :  { %v484_v60 = vperm.slane %v480_v59, %v1014_v42 }
 0x26e   :  { %v492_v62 = vsel %vm215_vm3, %v491_v61, %v484_v60  ;;  %v493_v63 = vrot.slane %v484_v60, 4 }
 0x26f   :  { %546 = vmatmul.f32.gmra.mxu0 %v492_v62  ;;  %629 = vmatmul.f32.gmra.mxu2 %v492_v62 }
 0x270   :  { %v494_v0 = vsel %vm215_vm3, %v490_v57, %v493_v63 }
 0x271   :  { %569 = vmatmul.f32.gmra.mxu1 %v494_v0  ;;  %652 = vmatmul.f32.gmra.mxu3 %v494_v0 }
 0x2d8   :  { %v567_v14 = vpop.f32.mrf.mxu1 }
 0x2da   :  { %v544_v12 = vpop.f32.mrf.mxu0 }
 0x2db   :  { %v568_v17 = vadd.f32 %v567_v14, %v544_v12 }
 0x2de   :  { %v650_v23 = vpop.f32.mrf.mxu3 }
 0x2e0   :  { %v627_v4 = vpop.f32.mrf.mxu2 }
 0x2e1   :  { %v628_v1 = vadd.f32 %v729_v31, %v627_v4 }
 0x2e3   :  { %v651_v5 = vadd.f32 %v650_v23, %v628_v1 }
 0x2e5   :  { %778 = vrcp.f32 %v651_v5  ;;  %v667_v7 = vand.u32 2147483648, %v651_v5  ;;  %v665_v55 = vand.u32 2147483647, %v651_v5  ;;  %vm661_vm6 = vweird.f32 %v651_v5 }
 0x2e7   :  { %v668_v16 = vor.u32 1.1754944e-38, %v667_v7  ;;  %vm666_vm8 = vcmp.eq.f32.partialorder %v665_v55, 8.507059e+37 }
 0x2eb   :  { %v779_v42 = vpop.eup %778 }
 0x2ec   :  { %v657_v6 = vmul.f32 %v779_v42, %v651_v5  ;;  %vm662_vm5 = vweird.f32 %v779_v42  ;;  %v547_v33 = vpop.f32.mrf.mxu0 }
 0x2ed   :  { %vm663_vm7 = vmor %vm661_vm6, %vm662_vm5 }
 0x2ee   :  { %v658_v38 = vsub.f32 1.0, %v657_v6  ;;  %v570_v29 = vpop.f32.mrf.mxu1 }
 0x2ef   :  { %v571_v50 = vadd.f32 %v570_v29, %v547_v33 }
 0x2f0   :  { %v659_v8 = vmul.f32 %v779_v42, %v658_v38 }
 0x2f2   :  { %v630_v13 = vpop.f32.mrf.mxu2  ;;  %v660_v44 = vadd.f32 %v779_v42, %v659_v8 }
 0x2f3   :  { %v631_v15 = vadd.f32 %v729_v31, %v630_v13 }
 0x2f4   :  { %v653_v26 = vpop.f32.mrf.mxu3  ;;  %v664_v9 = vsel %vm663_vm7, %v779_v42, %v660_v44 }
 0x2f5   :  { %v654_v18 = vadd.f32 %v653_v26, %v631_v15  ;;  %v669_v19 = vsel %vm666_vm8, %v668_v16, %v664_v9 }
 0x2f6   :  { %v670_v20 = vmul.f32 %v669_v19, %v568_v17 }
 0x2f7   :  { %780 = vrcp.f32 %v654_v18  ;;  %v682_v10 = vand.u32 2147483648, %v654_v18  ;;  %v680_v28 = vand.u32 2147483647, %v654_v18  ;;  %vm676_vm10 = vweird.f32 %v654_v18 }
 0x2f8   :  { %686 = vst [vmem:[#allocation10] sm:$0xff] %v670_v20 }
 0x2f9   :  { %v683_v34 = vor.u32 1.1754944e-38, %v682_v10  ;;  %vm681_vm12 = vcmp.eq.f32.partialorder %v680_v28, 8.507059e+37 }
 0x2fd   :  { %v781_v21 = vpop.eup %780 }
 0x2fe   :  { %v672_v22 = vmul.f32 %v781_v21, %v654_v18  ;;  %vm677_vm9 = vweird.f32 %v781_v21 }
 0x2ff   :  { %vm678_vm11 = vmor %vm676_vm10, %vm677_vm9 }
 0x300   :  { %v673_v25 = vsub.f32 1.0, %v672_v22 }
 0x302   :  { %v674_v27 = vmul.f32 %v781_v21, %v673_v25 }
 0x304   :  { %v675_v32 = vadd.f32 %v781_v21, %v674_v27 }
 0x306   :  { %v679_v35 = vsel %vm678_vm11, %v781_v21, %v675_v32 }
 0x307   :  { %v684_v56 = vsel %vm681_vm12, %v683_v34, %v679_v35 }
 0x308   :  { %v685_v36 = vmul.f32 %v684_v56, %v571_v50 }
 0x30a   :  { %687 = vst [vmem:[#allocation10 + $0x8] sm:$0xff] %v685_v36 }
 0x30b   :  { %700 = dma.vmem_to_hbm [thread:$0]  %s693_s6, 256, %s695_s15, [#allocation4], %s911_s17, %s911_s17, %s912_s18  }
 0x30c   :  { %908 = dma.done.wait [#allocation4], 256  }
 0x30d   :  { %909 = vsyncadd [#allocation4], 4294967040 }
 0x30e   :  { %705 = vsyncpa [#allocation3], 1 }
 0x30f   :  { %706 = vsyncpa [#allocation6], 1 }
 0x310   :  { %707 = vsyncpa [#allocation9], 1 }
 0x311   :  { %708 = vsyncpa [#allocation4], 1 }

// kernel: tpu_custom_call.1
= control target key start
LH: loop header
LB: loop body
LE: loop exit
PB: predicated region body
PF: predicated region fallthrough
CT: control target
= control target key end

     0   :  { %14 = vsyncpa [#allocation3], 0  ;;  %s742_s0 = inlined_call_operand.vmem [shape: bf16[16,4], index: 0, kind: input, shape index: {}]   ;;  %s743_s1 = inlined_call_operand.vmem [shape: bf16[4,16], index: 1, kind: input, shape index: {}]   ;;  %s744_s2 = inlined_call_operand.hbm [shape: f32[1,16], index: 2, kind: input, shape index: {}]   ;;  %s745_s3 = inlined_call_operand.vmem [shape: bf16[16,16], index: 3, kind: input, shape index: {}]   ;;  %s746_s4 = inlined_call_operand.vmem [shape: f32[1,16], index: 4, kind: input, shape index: {}]   ;;  %s747_s5 = inlined_call_operand.hbm [shape: bf16[16,256], index: 5, kind: input, shape index: {}]   ;;  %s748_s6 = inlined_call_operand.vmem [shape: f32[1,256], index: 6, kind: input, shape index: {}]   ;;  %s749_s7 = inlined_call_operand.hbm [shape: f32[256,128], index: 7, kind: input, shape index: {}]   ;;  %s750_s8 = inlined_call_operand.hbm [shape: f32[256,128], index: 8, kind: input, shape index: {}]   ;;  %s751_s9 = inlined_call_operand.hbm [shape: f32[16,128], index: 9, kind: output, shape index: {}]  }
   0x1   :  { %15 = vsyncpa [#allocation6], 0 }
   0x2   :  { %16 = vsyncpa [#allocation9], 0  ;;  %s41_s11 = sshll.u32 %s747_s5, 4  ;;  %s42_s11 = int_to_ptr.hbm [resolvable:$true] %s41_s11 }
   0x3   :  { %17 = vsyncpa [#allocation4], 0  ;;  %s623_s12 = smov [#allocation5]   ;;  %s27_s16 = sshll.u32 %s744_s2, 4  ;;  %s28_s16 = int_to_ptr.hbm [resolvable:$true] %s27_s16 }
   0x4   :  { %s43_s13 = sshll.u32 %s623_s12, 4  ;;  %s624_s17 = smov 128   ;;  %s44_s13 = int_to_ptr.vmem [resolvable:$true] %s43_s13 }
   0x5   :  { %s625_s18 = smov 8   ;;  %s626_s19 = smov [#allocation2]  }
   0x6   :  { %49 = dma.hbm_to_vmem [thread:$0]  %s42_s11, 256, %s44_s13, [#allocation6], %s624_s17, %s624_s17, %s625_s18  }
   0x7   :  { %s29_s20 = sshll.u32 %s626_s19, 4  ;;  %s56_s22 = sshll.u32 %s749_s7, 4  ;;  %s30_s20 = int_to_ptr.vmem [resolvable:$true] %s29_s20  ;;  %s57_s22 = int_to_ptr.hbm [resolvable:$true] %s56_s22 }
   0x8   :  { %32 = dma.hbm_to_vmem [thread:$0]  %s28_s16, 16, %s30_s20, [#allocation3]  }
   0x9   :  { %s69_s2 = sshll.u32 %s750_s8, 4  ;;  %s627_s25 = smov [#allocation7]   ;;  %s70_s2 = int_to_ptr.hbm [resolvable:$true] %s69_s2 }
   0xa   :  { %s58_s26 = sshll.u32 %s627_s25, 4  ;;  %s628_s27 = smov [#allocation8]   ;;  %s59_s26 = int_to_ptr.vmem [resolvable:$true] %s58_s26 }
   0xb   :  { %64 = dma.hbm_to_vmem [thread:$0]  %s57_s22, 4096, %s59_s26, [#allocation6], %s624_s17, %s624_s17, %s625_s18  }
   0xc   :  { %s71_s28 = sshll.u32 %s628_s27, 4  ;;  %s72_s28 = int_to_ptr.vmem [resolvable:$true] %s71_s28 }
   0xd   :  { %77 = dma.hbm_to_vmem [thread:$0]  %s70_s2, 4096, %s72_s28, [#allocation9], %s624_s17, %s624_s17, %s625_s18  }
   0xe   :  { %615 = dma.done.wait [#allocation3], 16  }
   0xf   :  { %616 = vsyncadd [#allocation3], 4294967280 }
  0x10   :  { %617 = dma.done.wait [#allocation6], 4352  }
  0x11   :  { %618 = vsyncadd [#allocation6], 4294962944 }
  0x12   :  { %619 = dma.done.wait [#allocation9], 4096  }
  0x13   :  { %620 = vsyncadd [#allocation9], 4294963200  ;;  %vm111_vm0 = vcmask 1041408   ;;  %v97_v0 = vld [vmem:[%s743_s1] sm:$0x3]  ;;  %vm107_vm1 = vcmask 31744  }
  0x14   :  { %v113_v1 = vsel %vm111_vm0, %v97_v0, 0  ;;  %v469_v2 = vld [vmem:[%s742_s0] sm:$0xff]  ;;  %vm144_vm2 = vcmask 130048   ;;  %v472_v13 = vld [vmem:[#allocation5 + $0x4] sm:$0xf0]  ;;  %v246_v34 = vld [vmem:[#allocation7 + $0x60] sm:$0xff] }
  0x15   :  { %122 = vmatpush.bf16.msra.mxu0 %v113_v1  ;;  %v470_v3 = vld [vmem:[%s745_s3] sm:$0xff]  ;;  %v462_v16 = vld [vmem:[#allocation5 + $0x8] sm:$0xf0]  ;;  %v324_v35 = vld [vmem:[#allocation8 + $0x60] sm:$0xff]  ;;  %s433_s15 = sshll.u32 %s751_s9, 4  ;;  %s434_s15 = int_to_ptr.hbm [resolvable:$true] %s433_s15 }
  0x16   :  { %155 = vmatpush.bf16.msra.mxu1 %v470_v3  ;;  %v481_v5 = vld [vmem:[#allocation2] ss:$0 sm:$0xff]  ;;  %v460_v12 = vld [vmem:[#allocation5] sm:$0xf]  ;;  %v471_v14 = vld [vmem:[#allocation5 + $0x4] sm:$0xf] }
  0x17   :  { %v461_v15 = vor.u32 %v472_v13, %v460_v12  ;;  %v465_v17 = vor.u32 %v471_v14, %v462_v16  ;;  %v482_v19 = vld [vmem:[%s746_s4] ss:$0 sm:$0xff]  ;;  %v249_v26 = vld [vmem:[#allocation7 + $0x78] sm:$0xff]  ;;  %v248_v28 = vld [vmem:[#allocation7 + $0x70] sm:$0xff] }
  0x18   :  { %452 = vmatmul.msk.bf16.vlgmr.msra.gmra.mxu0 %vm107_vm1, %v469_v2  ;;  %v327_v27 = vld [vmem:[#allocation8 + $0x78] sm:$0xff]  ;;  %v326_v29 = vld [vmem:[#allocation8 + $0x70] sm:$0xff]  ;;  %v247_v30 = vld [vmem:[#allocation7 + $0x68] sm:$0xff] }
  0x19   :  { %193 = vmatpush.bf16.msra.mxu2 %v461_v15  ;;  %207 = vmatpush.bf16.msra.mxu3 %v465_v17  ;;  %v325_v31 = vld [vmem:[#allocation8 + $0x68] sm:$0xff]  ;;  %v265_v32 = vld [vmem:[#allocation7 + $0xf8] sm:$0xff]  ;;  %v264_v36 = vld [vmem:[#allocation7 + $0xf0] sm:$0xff] }
  0x1a   :  { %266 = vmatpush.msrb.mxu0 %v249_v26  ;;  %v343_v33 = vld [vmem:[#allocation8 + $0xf8] sm:$0xff]  ;;  %289 = vmatpush.msrb.mxu1 %v265_v32  ;;  %v342_v37 = vld [vmem:[#allocation8 + $0xf0] sm:$0xff]  ;;  %v263_v38 = vld [vmem:[#allocation7 + $0xe8] sm:$0xff] }
  0x1b   :  { %v245_v39 = vld [vmem:[#allocation7 + $0x58] sm:$0xff]  ;;  %v341_v41 = vld [vmem:[#allocation8 + $0xe8] sm:$0xff]  ;;  %v262_v43 = vld [vmem:[#allocation7 + $0xe0] sm:$0xff] }
  0x1c   :  { %267 = vmatpush.msrb.mxu0 %v248_v28  ;;  %v323_v40 = vld [vmem:[#allocation8 + $0x58] sm:$0xff]  ;;  %290 = vmatpush.msrb.mxu1 %v264_v36  ;;  %v167_v42 = vld [vmem:[%s748_s6] sm:$0x3]  ;;  %v340_v44 = vld [vmem:[#allocation8 + $0xe0] sm:$0xff]  ;;  %s630_s6 = smov [#allocation10]  }
  0x1d   :  { %349 = vmatpush.msrb.mxu2 %v327_v27  ;;  %372 = vmatpush.msrb.mxu3 %v343_v33  ;;  %v244_v45 = vld [vmem:[#allocation7 + $0x50] sm:$0xff]  ;;  %v261_v47 = vld [vmem:[#allocation7 + $0xd8] sm:$0xff]  ;;  %v169_v49 = vperm.slane %v167_v42, 0  ;;  %v243_v50 = vld [vmem:[#allocation7 + $0x48] sm:$0xff]  ;;  %v170_v63 = vperm.slane %v167_v42, 1  ;;  %s431_s12 = sshll.u32 %s630_s6, 4  ;;  %s432_s12 = int_to_ptr.vmem [resolvable:$true] %s431_s12 }
  0x1e   :  { %268 = vmatpush.msrb.mxu0 %v247_v30  ;;  %v322_v46 = vld [vmem:[#allocation8 + $0x50] sm:$0xff]  ;;  %291 = vmatpush.msrb.mxu1 %v263_v38  ;;  %v339_v48 = vld [vmem:[#allocation8 + $0xd8] sm:$0xff]  ;;  %v321_v51 = vld [vmem:[#allocation8 + $0x48] sm:$0xff] }
  0x1f   :  { %350 = vmatpush.msrb.mxu2 %v326_v29  ;;  %373 = vmatpush.msrb.mxu3 %v342_v37  ;;  %v260_v52 = vld [vmem:[#allocation7 + $0xd0] sm:$0xff]  ;;  %v242_v54 = vld [vmem:[#allocation7 + $0x40] sm:$0xff]  ;;  %v241_v58 = vld [vmem:[#allocation7 + $0x38] sm:$0xff] }
  0x20   :  { %269 = vmatpush.msrb.mxu0 %v246_v34  ;;  %292 = vmatpush.msrb.mxu1 %v262_v43  ;;  %v338_v53 = vld [vmem:[#allocation8 + $0xd0] sm:$0xff]  ;;  %v320_v55 = vld [vmem:[#allocation8 + $0x40] sm:$0xff]  ;;  %v319_v59 = vld [vmem:[#allocation8 + $0x38] sm:$0xff] }
  0x21   :  { %351 = vmatpush.msrb.mxu2 %v325_v31  ;;  %374 = vmatpush.msrb.mxu3 %v341_v41  ;;  %v240_v60 = vld [vmem:[#allocation7 + $0x30] sm:$0xff]  ;;  %v336_v12 = vld [vmem:[#allocation8 + $0xc0] sm:$0xff]  ;;  %v237_v13 = vld [vmem:[#allocation7 + $0x18] sm:$0xff] }
  0x22   :  { %270 = vmatpush.msrb.mxu0 %v245_v39  ;;  %293 = vmatpush.msrb.mxu1 %v261_v47  ;;  %v318_v61 = vld [vmem:[#allocation8 + $0x30] sm:$0xff]  ;;  %v257_v14 = vld [vmem:[#allocation7 + $0xb8] sm:$0xff]  ;;  %v254_v26 = vld [vmem:[#allocation7 + $0xa0] sm:$0xff] }
  0x23   :  { %352 = vmatpush.msrb.mxu2 %v324_v35  ;;  %375 = vmatpush.msrb.mxu3 %v340_v44  ;;  %v315_v15 = vld [vmem:[#allocation8 + $0x18] sm:$0xff]  ;;  %v236_v17 = vld [vmem:[#allocation7 + $0x10] sm:$0xff]  ;;  %v312_v27 = vld [vmem:[#allocation8] sm:$0xff] }
  0x24   :  { %271 = vmatpush.msrb.mxu0 %v244_v45  ;;  %294 = vmatpush.msrb.mxu1 %v260_v52  ;;  %v335_v16 = vld [vmem:[#allocation8 + $0xb8] sm:$0xff]  ;;  %v332_v28 = vld [vmem:[#allocation8 + $0xa0] sm:$0xff]  ;;  %v252_v31 = vld [vmem:[#allocation7 + $0x90] sm:$0xff] }
  0x25   :  { %353 = vmatpush.msrb.mxu2 %v323_v40  ;;  %376 = vmatpush.msrb.mxu3 %v339_v48  ;;  %v253_v29 = vld [vmem:[#allocation7 + $0x98] sm:$0xff]  ;;  %v330_v32 = vld [vmem:[#allocation8 + $0x90] sm:$0xff]  ;;  %v251_v33 = vld [vmem:[#allocation7 + $0x88] sm:$0xff] }
  0x26   :  { %272 = vmatpush.msrb.mxu0 %v243_v50  ;;  %v331_v30 = vld [vmem:[#allocation8 + $0x98] sm:$0xff]  ;;  %v329_v34 = vld [vmem:[#allocation8 + $0x88] sm:$0xff]  ;;  %v250_v35 = vld [vmem:[#allocation7 + $0x80] sm:$0xff] }
  0x27   :  { %354 = vmatpush.msrb.mxu2 %v322_v46  ;;  %377 = vmatpush.msrb.mxu3 %v338_v53  ;;  %v328_v36 = vld [vmem:[#allocation8 + $0x80] sm:$0xff]  ;;  %v344_v53 = vlaneseq }
  0x28   :  { %273 = vmatpush.msrb.mxu0 %v242_v54 }
  0x29   :  { %355 = vmatpush.msrb.mxu2 %v321_v51  ;;  %v345_v54 = vand.u32 127, %v344_v53 }
  0x2a   :  { %274 = vmatpush.msrb.mxu0 %v241_v58 }
  0x2b   :  { %356 = vmatpush.msrb.mxu2 %v320_v55  ;;  %vm346_vm3 = vcmp.ge.s32.totalorder %v345_v54, 2 }
  0x2c   :  { %275 = vmatpush.msrb.mxu0 %v240_v60 }
  0x2d   :  { %357 = vmatpush.msrb.mxu2 %v319_v59 }
  0x2f   :  { %358 = vmatpush.msrb.mxu2 %v318_v61 }
  0x95   :  { %v124_v4 = vpop.f32.mrf.mxu0 }
  0x96   :  { %v125_v6 = vadd.f32 %v481_v5, %v124_v4 }
  0x98   :  { %v129_v9 = vmax.f32 %v125_v6, 0.0  ;;  %v259_v6 = vld [vmem:[#allocation7 + $0xc8] sm:$0xff] }
  0x99   :  { %295 = vmatpush.msrb.mxu1 %v259_v6 }
  0x9d   :  { %v126_v7 = vpop.f32.mrf.mxu0 }
  0x9e   :  { %v127_v8 = vadd.f32 %v481_v5, %v126_v7  ;;  %v239_v5 = vld [vmem:[#allocation7 + $0x28] sm:$0xff] }
  0x9f   :  { %v317_v7 = vld [vmem:[#allocation8 + $0x28] sm:$0xff]  ;;  %276 = vmatpush.msrb.mxu0 %v239_v5 }
  0xa0   :  { %v130_v10 = vmax.f32 %v127_v8, 0.0  ;;  %v337_v8 = vld [vmem:[#allocation8 + $0xc8] sm:$0xff]  ;;  %359 = vmatpush.msrb.mxu2 %v317_v7 }
  0xa1   :  { %378 = vmatpush.msrb.mxu3 %v337_v8 }
  0xa2   :  { %v131_v11 = vpack.c.bf16 %v130_v10, %v129_v9  ;;  %v238_v9 = vld [vmem:[#allocation7 + $0x20] sm:$0xff] }
  0xa3   :  { %v258_v10 = vld [vmem:[#allocation7 + $0xc0] sm:$0xff]  ;;  %277 = vmatpush.msrb.mxu0 %v238_v9  ;;  %379 = vmatpush.msrb.mxu3 %v336_v12 }
  0xa4   :  { %457 = vmatmul.msk.bf16.vlgmr.msra.gmra.mxu1 %vm144_vm2, %v131_v11  ;;  %v316_v11 = vld [vmem:[#allocation8 + $0x20] sm:$0xff] }
  0xa5   :  { %296 = vmatpush.msrb.mxu1 %v258_v10  ;;  %360 = vmatpush.msrb.mxu2 %v316_v11 }
  0xa6   :  { %278 = vmatpush.msrb.mxu0 %v237_v13  ;;  %380 = vmatpush.msrb.mxu3 %v335_v16 }
  0xa7   :  { %297 = vmatpush.msrb.mxu1 %v257_v14  ;;  %361 = vmatpush.msrb.mxu2 %v315_v15 }
  0xa8   :  { %279 = vmatpush.msrb.mxu0 %v236_v17 }
 0x121   :  { %v157_v18 = vpop.f32.mrf.mxu1 }
 0x122   :  { %v158_v20 = vadd.f32 %v482_v19, %v157_v18  ;;  %v256_v18 = vld [vmem:[#allocation7 + $0xb0] sm:$0xff] }
 0x123   :  { %298 = vmatpush.msrb.mxu1 %v256_v18 }
 0x124   :  { %v162_v23 = vmax.f32 %v158_v20, 0.0  ;;  %v334_v20 = vld [vmem:[#allocation8 + $0xb0] sm:$0xff] }
 0x125   :  { %381 = vmatpush.msrb.mxu3 %v334_v20 }
 0x129   :  { %v159_v21 = vpop.f32.mrf.mxu1 }
 0x12a   :  { %v160_v22 = vadd.f32 %v482_v19, %v159_v21  ;;  %v314_v19 = vld [vmem:[#allocation8 + $0x10] sm:$0xff]  ;;  %v235_v21 = vld [vmem:[#allocation7 + $0x8] sm:$0xff] }
 0x12b   :  { %362 = vmatpush.msrb.mxu2 %v314_v19  ;;  %280 = vmatpush.msrb.mxu0 %v235_v21 }
 0x12c   :  { %v163_v24 = vmax.f32 %v160_v22, 0.0  ;;  %v255_v22 = vld [vmem:[#allocation7 + $0xa8] sm:$0xff] }
 0x12d   :  { %299 = vmatpush.msrb.mxu1 %v255_v22 }
 0x12e   :  { %v164_v25 = vpack.c.bf16 %v163_v24, %v162_v23  ;;  %v313_v23 = vld [vmem:[#allocation8 + $0x8] sm:$0xff] }
 0x12f   :  { %v333_v24 = vld [vmem:[#allocation8 + $0xa8] sm:$0xff]  ;;  %363 = vmatpush.msrb.mxu2 %v313_v23  ;;  %300 = vmatpush.msrb.mxu1 %v254_v26 }
 0x130   :  { %466 = vmatmul.msk.bf16.vlgmr.msra.gmra.mxu2 %vm144_vm2, %v164_v25  ;;  %467 = vmatmul.msk.bf16.vlgmr.msra.gmra.mxu3 %vm144_vm2, %v164_v25  ;;  %v234_v25 = vld [vmem:[#allocation7] sm:$0xff] }
 0x131   :  { %382 = vmatpush.msrb.mxu3 %v333_v24  ;;  %281 = vmatpush.msrb.mxu0 %v234_v25 }
 0x132   :  { %364 = vmatpush.msrb.mxu2 %v312_v27  ;;  %301 = vmatpush.msrb.mxu1 %v253_v29 }
 0x133   :  { %383 = vmatpush.msrb.mxu3 %v332_v28 }
 0x134   :  { %302 = vmatpush.msrb.mxu1 %v252_v31 }
 0x135   :  { %384 = vmatpush.msrb.mxu3 %v331_v30 }
 0x136   :  { %303 = vmatpush.msrb.mxu1 %v251_v33 }
 0x137   :  { %385 = vmatpush.msrb.mxu3 %v330_v32 }
 0x138   :  { %304 = vmatpush.msrb.mxu1 %v250_v35 }
 0x139   :  { %386 = vmatpush.msrb.mxu3 %v329_v34 }
 0x13b   :  { %387 = vmatpush.msrb.mxu3 %v328_v36 }
 0x1b3   :  { %v195_v56 = vpop.f32.mrf.mxu2  ;;  %v209_v62 = vpop.f32.mrf.mxu3 }
 0x1b4   :  { %v720_v57 = vadd.f32 %v195_v56, %v169_v49  ;;  %v723_v1 = vadd.f32 %v209_v62, %v170_v63  ;;  %v629_v56 = vmov 0.0  }
 0x1b6   :  { %214 = vmax.xlane.f32.xlu0 %v720_v57 }
 0x1bb   :  { %v197_v0 = vpop.f32.mrf.mxu2  ;;  %v211_v3 = vpop.f32.mrf.mxu3 }
 0x1bc   :  { %v725_v2 = vadd.f32 %v197_v0, %v169_v49  ;;  %v729_v4 = vadd.f32 %v211_v3, %v170_v63 }
 0x1be   :  { %216 = vmax.xlane.f32.xlu1 %v725_v2  ;;  %224 = vmax.xlane.f32.xlu0 %v723_v1 }
 0x1c6   :  { %226 = vmax.xlane.f32.xlu1 %v729_v4 }
 0x229   :  { %v215_v37 = vpop.xlane.xlu0 %214 }
 0x22a   :  { %v218_v38 = vsub.f32 %v720_v57, %v215_v37  ;;  %v468_v57 = vsel %vm346_vm3, 1.0, %v629_v56 }
 0x22c   :  { %v220_v39 = vmul.f32 1.442695, %v218_v38 }
 0x22e   :  { %483 = vpow2.f32 %v220_v39 }
 0x231   :  { %v217_v40 = vpop.xlane.xlu1 %216  ;;  %v225_v41 = vpop.xlane.xlu0 %224 }
 0x232   :  { %v219_v42 = vsub.f32 %v725_v2, %v217_v40  ;;  %v228_v43 = vsub.f32 %v723_v1, %v225_v41 }
 0x234   :  { %v484_v44 = vpop.eup %483  ;;  %v222_v45 = vmul.f32 1.442695, %v219_v42  ;;  %v230_v46 = vmul.f32 1.442695, %v228_v43 }
 0x235   :  { %282 = vmatmul.f32.vlgmr.msrb.gmra.mxu0 %v484_v44  ;;  %365 = vmatmul.f32.vlgmr.msrb.gmra.mxu2 %v484_v44 }
 0x236   :  { %485 = vpow2.f32 %v222_v45 }
 0x237   :  { %487 = vpow2.f32 %v230_v46 }
 0x239   :  { %v227_v47 = vpop.xlane.xlu1 %226 }
 0x23a   :  { %v229_v48 = vsub.f32 %v729_v4, %v227_v47 }
 0x23c   :  { %v486_v49 = vpop.eup %485  ;;  %v232_v50 = vmul.f32 1.442695, %v229_v48 }
 0x23d   :  { %v488_v51 = vpop.eup %487  ;;  %285 = vmatmul.f32.gmra.mxu0 %v486_v49  ;;  %368 = vmatmul.f32.gmra.mxu2 %v486_v49 }
 0x23e   :  { %489 = vpow2.f32 %v232_v50  ;;  %305 = vmatmul.f32.vlgmr.msrb.gmra.mxu1 %v488_v51  ;;  %388 = vmatmul.f32.vlgmr.msrb.gmra.mxu3 %v488_v51 }
 0x244   :  { %v490_v52 = vpop.eup %489 }
 0x246   :  { %308 = vmatmul.f32.gmra.mxu1 %v490_v52  ;;  %391 = vmatmul.f32.gmra.mxu3 %v490_v52 }
 0x2b2   :  { %v283_v8 = vpop.f32.mrf.mxu0 }
 0x2b8   :  { %v366_v55 = vpop.f32.mrf.mxu2 }
 0x2b9   :  { %v367_v58 = vadd.f32 %v468_v57, %v366_v55 }
 0x2ba   :  { %v286_v23 = vpop.f32.mrf.mxu0 }
 0x2bb   :  { %v306_v4 = vpop.f32.mrf.mxu1 }
 0x2bc   :  { %v307_v12 = vadd.f32 %v306_v4, %v283_v8 }
 0x2c0   :  { %v369_v61 = vpop.f32.mrf.mxu2 }
 0x2c1   :  { %v389_v59 = vpop.f32.mrf.mxu3  ;;  %v370_v62 = vadd.f32 %v468_v57, %v369_v61 }
 0x2c2   :  { %v390_v60 = vadd.f32 %v389_v59, %v367_v58 }
 0x2c3   :  { %v309_v21 = vpop.f32.mrf.mxu1 }
 0x2c4   :  { %491 = vrcp.f32 %v390_v60  ;;  %v406_v5 = vand.u32 2147483648, %v390_v60  ;;  %v404_v7 = vand.u32 2147483647, %v390_v60  ;;  %vm400_vm5 = vweird.f32 %v390_v60 }
 0x2c5   :  { %v310_v25 = vadd.f32 %v309_v21, %v286_v23 }
 0x2c6   :  { %v407_v11 = vor.u32 1.1754944e-38, %v406_v5  ;;  %vm405_vm7 = vcmp.eq.f32.partialorder %v404_v7, 8.507059e+37 }
 0x2c9   :  { %v392_v63 = vpop.f32.mrf.mxu3 }
 0x2ca   :  { %v492_v0 = vpop.eup %491  ;;  %v393_v1 = vadd.f32 %v392_v63, %v370_v62 }
 0x2cb   :  { %v396_v2 = vmul.f32 %v492_v0, %v390_v60  ;;  %vm401_vm4 = vweird.f32 %v492_v0 }
 0x2cc   :  { %493 = vrcp.f32 %v393_v1  ;;  %vm402_vm6 = vmor %vm400_vm5, %vm401_vm4  ;;  %v421_v18 = vand.u32 2147483648, %v393_v1  ;;  %v419_v20 = vand.u32 2147483647, %v393_v1  ;;  %vm415_vm9 = vweird.f32 %v393_v1 }
 0x2cd   :  { %v397_v3 = vsub.f32 1.0, %v396_v2 }
 0x2ce   :  { %v422_v24 = vor.u32 1.1754944e-38, %v421_v18  ;;  %vm420_vm11 = vcmp.eq.f32.partialorder %v419_v20, 8.507059e+37 }
 0x2cf   :  { %v398_v6 = vmul.f32 %v492_v0, %v397_v3 }
 0x2d1   :  { %v399_v9 = vadd.f32 %v492_v0, %v398_v6 }
 0x2d2   :  { %v494_v10 = vpop.eup %493 }
 0x2d3   :  { %v411_v13 = vmul.f32 %v494_v10, %v393_v1  ;;  %v403_v14 = vsel %vm402_vm6, %v492_v0, %v399_v9  ;;  %vm416_vm8 = vweird.f32 %v494_v10 }
 0x2d4   :  { %v408_v15 = vsel %vm405_vm7, %v407_v11, %v403_v14  ;;  %vm417_vm10 = vmor %vm415_vm9, %vm416_vm8 }
 0x2d5   :  { %v412_v16 = vsub.f32 1.0, %v411_v13  ;;  %v409_v17 = vmul.f32 %v408_v15, %v307_v12 }
 0x2d7   :  { %v413_v19 = vmul.f32 %v494_v10, %v412_v16  ;;  %425 = vst [vmem:[#allocation10] sm:$0xff] %v409_v17 }
 0x2d9   :  { %v414_v22 = vadd.f32 %v494_v10, %v413_v19 }
 0x2db   :  { %v418_v26 = vsel %vm417_vm10, %v494_v10, %v414_v22 }
 0x2dc   :  { %v423_v27 = vsel %vm420_vm11, %v422_v24, %v418_v26 }
 0x2dd   :  { %v424_v28 = vmul.f32 %v423_v27, %v310_v25 }
 0x2df   :  { %426 = vst [vmem:[#allocation10 + $0x8] sm:$0xff] %v424_v28 }
 0x2e0   :  { %439 = dma.vmem_to_hbm [thread:$0]  %s432_s12, 256, %s434_s15, [#allocation4], %s624_s17, %s624_s17, %s625_s18  }
 0x2e1   :  { %621 = dma.done.wait [#allocation4], 256  }
 0x2e2   :  { %622 = vsyncadd [#allocation4], 4294967040 }
 0x2e3   :  { %444 = vsyncpa [#allocation3], 1 }
 0x2e4   :  { %445 = vsyncpa [#allocation6], 1 }
 0x2e5   :  { %446 = vsyncpa [#allocation9], 1 }
 0x2e6   :  { %447 = vsyncpa [#allocation4], 1 }

// kernel: tpu_custom_call.1
= control target key start
LH: loop header
LB: loop body
LE: loop exit
PB: predicated region body
PF: predicated region fallthrough
CT: control target
= control target key end

     0   :  { %14 = vsyncpa [#allocation3], 0  ;;  %s742_s0 = inlined_call_operand.vmem [shape: bf16[16,4], index: 0, kind: input, shape index: {}]   ;;  %s743_s1 = inlined_call_operand.vmem [shape: bf16[4,16], index: 1, kind: input, shape index: {}]   ;;  %s744_s2 = inlined_call_operand.hbm [shape: f32[1,16], index: 2, kind: input, shape index: {}]   ;;  %s745_s3 = inlined_call_operand.vmem [shape: bf16[16,16], index: 3, kind: input, shape index: {}]   ;;  %s746_s4 = inlined_call_operand.vmem [shape: f32[1,16], index: 4, kind: input, shape index: {}]   ;;  %s747_s5 = inlined_call_operand.hbm [shape: bf16[16,256], index: 5, kind: input, shape index: {}]   ;;  %s748_s6 = inlined_call_operand.vmem [shape: f32[1,256], index: 6, kind: input, shape index: {}]   ;;  %s749_s7 = inlined_call_operand.hbm [shape: f32[256,128], index: 7, kind: input, shape index: {}]   ;;  %s750_s8 = inlined_call_operand.hbm [shape: f32[256,128], index: 8, kind: input, shape index: {}]   ;;  %s751_s9 = inlined_call_operand.hbm [shape: f32[16,128], index: 9, kind: output, shape index: {}]  }
   0x1   :  { %15 = vsyncpa [#allocation6], 0 }
   0x2   :  { %16 = vsyncpa [#allocation9], 0  ;;  %s41_s11 = sshll.u32 %s747_s5, 4  ;;  %s42_s11 = int_to_ptr.hbm [resolvable:$true] %s41_s11 }
   0x3   :  { %17 = vsyncpa [#allocation4], 0  ;;  %s623_s12 = smov [#allocation5]   ;;  %s27_s16 = sshll.u32 %s744_s2, 4  ;;  %s28_s16 = int_to_ptr.hbm [resolvable:$true] %s27_s16 }
   0x4   :  { %s43_s13 = sshll.u32 %s623_s12, 4  ;;  %s624_s17 = smov 128   ;;  %s44_s13 = int_to_ptr.vmem [resolvable:$true] %s43_s13 }
   0x5   :  { %s625_s18 = smov 8   ;;  %s626_s19 = smov [#allocation2]  }
   0x6   :  { %49 = dma.hbm_to_vmem [thread:$0]  %s42_s11, 256, %s44_s13, [#allocation6], %s624_s17, %s624_s17, %s625_s18  }
   0x7   :  { %s29_s20 = sshll.u32 %s626_s19, 4  ;;  %s56_s22 = sshll.u32 %s749_s7, 4  ;;  %s30_s20 = int_to_ptr.vmem [resolvable:$true] %s29_s20  ;;  %s57_s22 = int_to_ptr.hbm [resolvable:$true] %s56_s22 }
   0x8   :  { %32 = dma.hbm_to_vmem [thread:$0]  %s28_s16, 16, %s30_s20, [#allocation3]  }
   0x9   :  { %s69_s2 = sshll.u32 %s750_s8, 4  ;;  %s627_s25 = smov [#allocation7]   ;;  %s70_s2 = int_to_ptr.hbm [resolvable:$true] %s69_s2 }
   0xa   :  { %s58_s26 = sshll.u32 %s627_s25, 4  ;;  %s628_s27 = smov [#allocation8]   ;;  %s59_s26 = int_to_ptr.vmem [resolvable:$true] %s58_s26 }
   0xb   :  { %64 = dma.hbm_to_vmem [thread:$0]  %s57_s22, 4096, %s59_s26, [#allocation6], %s624_s17, %s624_s17, %s625_s18  }
   0xc   :  { %s71_s28 = sshll.u32 %s628_s27, 4  ;;  %s72_s28 = int_to_ptr.vmem [resolvable:$true] %s71_s28 }
   0xd   :  { %77 = dma.hbm_to_vmem [thread:$0]  %s70_s2, 4096, %s72_s28, [#allocation9], %s624_s17, %s624_s17, %s625_s18  }
   0xe   :  { %615 = dma.done.wait [#allocation3], 16  }
   0xf   :  { %616 = vsyncadd [#allocation3], 4294967280 }
  0x10   :  { %617 = dma.done.wait [#allocation6], 4352  }
  0x11   :  { %618 = vsyncadd [#allocation6], 4294962944 }
  0x12   :  { %619 = dma.done.wait [#allocation9], 4096  }
  0x13   :  { %620 = vsyncadd [#allocation9], 4294963200  ;;  %vm111_vm0 = vcmask 1041408   ;;  %v97_v0 = vld [vmem:[%s743_s1] sm:$0x3]  ;;  %vm107_vm1 = vcmask 31744  }
  0x14   :  { %v113_v1 = vsel %vm111_vm0, %v97_v0, 0  ;;  %v469_v2 = vld [vmem:[%s742_s0] sm:$0xff]  ;;  %vm144_vm2 = vcmask 130048   ;;  %v472_v13 = vld [vmem:[#allocation5 + $0x4] sm:$0xf0]  ;;  %v246_v34 = vld [vmem:[#allocation7 + $0x60] sm:$0xff] }
  0x15   :  { %122 = vmatpush.bf16.msra.mxu0 %v113_v1  ;;  %v470_v3 = vld [vmem:[%s745_s3] sm:$0xff]  ;;  %v462_v16 = vld [vmem:[#allocation5 + $0x8] sm:$0xf0]  ;;  %v324_v35 = vld [vmem:[#allocation8 + $0x60] sm:$0xff]  ;;  %s433_s15 = sshll.u32 %s751_s9, 4  ;;  %s434_s15 = int_to_ptr.hbm [resolvable:$true] %s433_s15 }
  0x16   :  { %155 = vmatpush.bf16.msra.mxu1 %v470_v3  ;;  %v481_v5 = vld [vmem:[#allocation2] ss:$0 sm:$0xff]  ;;  %v460_v12 = vld [vmem:[#allocation5] sm:$0xf]  ;;  %v471_v14 = vld [vmem:[#allocation5 + $0x4] sm:$0xf] }
  0x17   :  { %v461_v15 = vor.u32 %v472_v13, %v460_v12  ;;  %v465_v17 = vor.u32 %v471_v14, %v462_v16  ;;  %v482_v19 = vld [vmem:[%s746_s4] ss:$0 sm:$0xff]  ;;  %v249_v26 = vld [vmem:[#allocation7 + $0x78] sm:$0xff]  ;;  %v248_v28 = vld [vmem:[#allocation7 + $0x70] sm:$0xff] }
  0x18   :  { %452 = vmatmul.msk.bf16.vlgmr.msra.gmra.mxu0 %vm107_vm1, %v469_v2  ;;  %v327_v27 = vld [vmem:[#allocation8 + $0x78] sm:$0xff]  ;;  %v326_v29 = vld [vmem:[#allocation8 + $0x70] sm:$0xff]  ;;  %v247_v30 = vld [vmem:[#allocation7 + $0x68] sm:$0xff] }
  0x19   :  { %193 = vmatpush.bf16.msra.mxu2 %v461_v15  ;;  %207 = vmatpush.bf16.msra.mxu3 %v465_v17  ;;  %v325_v31 = vld [vmem:[#allocation8 + $0x68] sm:$0xff]  ;;  %v265_v32 = vld [vmem:[#allocation7 + $0xf8] sm:$0xff]  ;;  %v264_v36 = vld [vmem:[#allocation7 + $0xf0] sm:$0xff] }
  0x1a   :  { %266 = vmatpush.msrb.mxu0 %v249_v26  ;;  %v343_v33 = vld [vmem:[#allocation8 + $0xf8] sm:$0xff]  ;;  %289 = vmatpush.msrb.mxu1 %v265_v32  ;;  %v342_v37 = vld [vmem:[#allocation8 + $0xf0] sm:$0xff]  ;;  %v263_v38 = vld [vmem:[#allocation7 + $0xe8] sm:$0xff] }
  0x1b   :  { %v245_v39 = vld [vmem:[#allocation7 + $0x58] sm:$0xff]  ;;  %v341_v41 = vld [vmem:[#allocation8 + $0xe8] sm:$0xff]  ;;  %v262_v43 = vld [vmem:[#allocation7 + $0xe0] sm:$0xff] }
  0x1c   :  { %267 = vmatpush.msrb.mxu0 %v248_v28  ;;  %v323_v40 = vld [vmem:[#allocation8 + $0x58] sm:$0xff]  ;;  %290 = vmatpush.msrb.mxu1 %v264_v36  ;;  %v167_v42 = vld [vmem:[%s748_s6] sm:$0x3]  ;;  %v340_v44 = vld [vmem:[#allocation8 + $0xe0] sm:$0xff]  ;;  %s630_s6 = smov [#allocation10]  }
  0x1d   :  { %349 = vmatpush.msrb.mxu2 %v327_v27  ;;  %372 = vmatpush.msrb.mxu3 %v343_v33  ;;  %v244_v45 = vld [vmem:[#allocation7 + $0x50] sm:$0xff]  ;;  %v261_v47 = vld [vmem:[#allocation7 + $0xd8] sm:$0xff]  ;;  %v169_v49 = vperm.slane %v167_v42, 0  ;;  %v243_v50 = vld [vmem:[#allocation7 + $0x48] sm:$0xff]  ;;  %v170_v63 = vperm.slane %v167_v42, 1  ;;  %s431_s12 = sshll.u32 %s630_s6, 4  ;;  %s432_s12 = int_to_ptr.vmem [resolvable:$true] %s431_s12 }
  0x1e   :  { %268 = vmatpush.msrb.mxu0 %v247_v30  ;;  %v322_v46 = vld [vmem:[#allocation8 + $0x50] sm:$0xff]  ;;  %291 = vmatpush.msrb.mxu1 %v263_v38  ;;  %v339_v48 = vld [vmem:[#allocation8 + $0xd8] sm:$0xff]  ;;  %v321_v51 = vld [vmem:[#allocation8 + $0x48] sm:$0xff] }
  0x1f   :  { %350 = vmatpush.msrb.mxu2 %v326_v29  ;;  %373 = vmatpush.msrb.mxu3 %v342_v37  ;;  %v260_v52 = vld [vmem:[#allocation7 + $0xd0] sm:$0xff]  ;;  %v242_v54 = vld [vmem:[#allocation7 + $0x40] sm:$0xff]  ;;  %v241_v58 = vld [vmem:[#allocation7 + $0x38] sm:$0xff] }
  0x20   :  { %269 = vmatpush.msrb.mxu0 %v246_v34  ;;  %292 = vmatpush.msrb.mxu1 %v262_v43  ;;  %v338_v53 = vld [vmem:[#allocation8 + $0xd0] sm:$0xff]  ;;  %v320_v55 = vld [vmem:[#allocation8 + $0x40] sm:$0xff]  ;;  %v319_v59 = vld [vmem:[#allocation8 + $0x38] sm:$0xff] }
  0x21   :  { %351 = vmatpush.msrb.mxu2 %v325_v31  ;;  %374 = vmatpush.msrb.mxu3 %v341_v41  ;;  %v240_v60 = vld [vmem:[#allocation7 + $0x30] sm:$0xff]  ;;  %v336_v12 = vld [vmem:[#allocation8 + $0xc0] sm:$0xff]  ;;  %v237_v13 = vld [vmem:[#allocation7 + $0x18] sm:$0xff] }
  0x22   :  { %270 = vmatpush.msrb.mxu0 %v245_v39  ;;  %293 = vmatpush.msrb.mxu1 %v261_v47  ;;  %v318_v61 = vld [vmem:[#allocation8 + $0x30] sm:$0xff]  ;;  %v257_v14 = vld [vmem:[#allocation7 + $0xb8] sm:$0xff]  ;;  %v254_v26 = vld [vmem:[#allocation7 + $0xa0] sm:$0xff] }
  0x23   :  { %352 = vmatpush.msrb.mxu2 %v324_v35  ;;  %375 = vmatpush.msrb.mxu3 %v340_v44  ;;  %v315_v15 = vld [vmem:[#allocation8 + $0x18] sm:$0xff]  ;;  %v236_v17 = vld [vmem:[#allocation7 + $0x10] sm:$0xff]  ;;  %v312_v27 = vld [vmem:[#allocation8] sm:$0xff] }
  0x24   :  { %271 = vmatpush.msrb.mxu0 %v244_v45  ;;  %294 = vmatpush.msrb.mxu1 %v260_v52  ;;  %v335_v16 = vld [vmem:[#allocation8 + $0xb8] sm:$0xff]  ;;  %v332_v28 = vld [vmem:[#allocation8 + $0xa0] sm:$0xff]  ;;  %v252_v31 = vld [vmem:[#allocation7 + $0x90] sm:$0xff] }
  0x25   :  { %353 = vmatpush.msrb.mxu2 %v323_v40  ;;  %376 = vmatpush.msrb.mxu3 %v339_v48  ;;  %v253_v29 = vld [vmem:[#allocation7 + $0x98] sm:$0xff]  ;;  %v330_v32 = vld [vmem:[#allocation8 + $0x90] sm:$0xff]  ;;  %v251_v33 = vld [vmem:[#allocation7 + $0x88] sm:$0xff] }
  0x26   :  { %272 = vmatpush.msrb.mxu0 %v243_v50  ;;  %v331_v30 = vld [vmem:[#allocation8 + $0x98] sm:$0xff]  ;;  %v329_v34 = vld [vmem:[#allocation8 + $0x88] sm:$0xff]  ;;  %v250_v35 = vld [vmem:[#allocation7 + $0x80] sm:$0xff] }
  0x27   :  { %354 = vmatpush.msrb.mxu2 %v322_v46  ;;  %377 = vmatpush.msrb.mxu3 %v338_v53  ;;  %v328_v36 = vld [vmem:[#allocation8 + $0x80] sm:$0xff]  ;;  %v344_v53 = vlaneseq }
  0x28   :  { %273 = vmatpush.msrb.mxu0 %v242_v54 }
  0x29   :  { %355 = vmatpush.msrb.mxu2 %v321_v51  ;;  %v345_v54 = vand.u32 127, %v344_v53 }
  0x2a   :  { %274 = vmatpush.msrb.mxu0 %v241_v58 }
  0x2b   :  { %356 = vmatpush.msrb.mxu2 %v320_v55  ;;  %vm346_vm3 = vcmp.ge.s32.totalorder %v345_v54, 2 }
  0x2c   :  { %275 = vmatpush.msrb.mxu0 %v240_v60 }
  0x2d   :  { %357 = vmatpush.msrb.mxu2 %v319_v59 }
  0x2f   :  { %358 = vmatpush.msrb.mxu2 %v318_v61 }
  0x95   :  { %v124_v4 = vpop.f32.mrf.mxu0 }
  0x96   :  { %v125_v6 = vadd.f32 %v481_v5, %v124_v4 }
  0x98   :  { %v129_v9 = vmax.f32 %v125_v6, 0.0  ;;  %v259_v6 = vld [vmem:[#allocation7 + $0xc8] sm:$0xff] }
  0x99   :  { %295 = vmatpush.msrb.mxu1 %v259_v6 }
  0x9d   :  { %v126_v7 = vpop.f32.mrf.mxu0 }
  0x9e   :  { %v127_v8 = vadd.f32 %v481_v5, %v126_v7  ;;  %v239_v5 = vld [vmem:[#allocation7 + $0x28] sm:$0xff] }
  0x9f   :  { %v317_v7 = vld [vmem:[#allocation8 + $0x28] sm:$0xff]  ;;  %276 = vmatpush.msrb.mxu0 %v239_v5 }
  0xa0   :  { %v130_v10 = vmax.f32 %v127_v8, 0.0  ;;  %v337_v8 = vld [vmem:[#allocation8 + $0xc8] sm:$0xff]  ;;  %359 = vmatpush.msrb.mxu2 %v317_v7 }
  0xa1   :  { %378 = vmatpush.msrb.mxu3 %v337_v8 }
  0xa2   :  { %v131_v11 = vpack.c.bf16 %v130_v10, %v129_v9  ;;  %v238_v9 = vld [vmem:[#allocation7 + $0x20] sm:$0xff] }
  0xa3   :  { %v258_v10 = vld [vmem:[#allocation7 + $0xc0] sm:$0xff]  ;;  %277 = vmatpush.msrb.mxu0 %v238_v9  ;;  %379 = vmatpush.msrb.mxu3 %v336_v12 }
  0xa4   :  { %457 = vmatmul.msk.bf16.vlgmr.msra.gmra.mxu1 %vm144_vm2, %v131_v11  ;;  %v316_v11 = vld [vmem:[#allocation8 + $0x20] sm:$0xff] }
  0xa5   :  { %296 = vmatpush.msrb.mxu1 %v258_v10  ;;  %360 = vmatpush.msrb.mxu2 %v316_v11 }
  0xa6   :  { %278 = vmatpush.msrb.mxu0 %v237_v13  ;;  %380 = vmatpush.msrb.mxu3 %v335_v16 }
  0xa7   :  { %297 = vmatpush.msrb.mxu1 %v257_v14  ;;  %361 = vmatpush.msrb.mxu2 %v315_v15 }
  0xa8   :  { %279 = vmatpush.msrb.mxu0 %v236_v17 }
 0x121   :  { %v157_v18 = vpop.f32.mrf.mxu1 }
 0x122   :  { %v158_v20 = vadd.f32 %v482_v19, %v157_v18  ;;  %v256_v18 = vld [vmem:[#allocation7 + $0xb0] sm:$0xff] }
 0x123   :  { %298 = vmatpush.msrb.mxu1 %v256_v18 }
 0x124   :  { %v162_v23 = vmax.f32 %v158_v20, 0.0  ;;  %v334_v20 = vld [vmem:[#allocation8 + $0xb0] sm:$0xff] }
 0x125   :  { %381 = vmatpush.msrb.mxu3 %v334_v20 }
 0x129   :  { %v159_v21 = vpop.f32.mrf.mxu1 }
 0x12a   :  { %v160_v22 = vadd.f32 %v482_v19, %v159_v21  ;;  %v314_v19 = vld [vmem:[#allocation8 + $0x10] sm:$0xff]  ;;  %v235_v21 = vld [vmem:[#allocation7 + $0x8] sm:$0xff] }
 0x12b   :  { %362 = vmatpush.msrb.mxu2 %v314_v19  ;;  %280 = vmatpush.msrb.mxu0 %v235_v21 }
 0x12c   :  { %v163_v24 = vmax.f32 %v160_v22, 0.0  ;;  %v255_v22 = vld [vmem:[#allocation7 + $0xa8] sm:$0xff] }
 0x12d   :  { %299 = vmatpush.msrb.mxu1 %v255_v22 }
 0x12e   :  { %v164_v25 = vpack.c.bf16 %v163_v24, %v162_v23  ;;  %v313_v23 = vld [vmem:[#allocation8 + $0x8] sm:$0xff] }
 0x12f   :  { %v333_v24 = vld [vmem:[#allocation8 + $0xa8] sm:$0xff]  ;;  %363 = vmatpush.msrb.mxu2 %v313_v23  ;;  %300 = vmatpush.msrb.mxu1 %v254_v26 }
 0x130   :  { %466 = vmatmul.msk.bf16.vlgmr.msra.gmra.mxu2 %vm144_vm2, %v164_v25  ;;  %467 = vmatmul.msk.bf16.vlgmr.msra.gmra.mxu3 %vm144_vm2, %v164_v25  ;;  %v234_v25 = vld [vmem:[#allocation7] sm:$0xff] }
 0x131   :  { %382 = vmatpush.msrb.mxu3 %v333_v24  ;;  %281 = vmatpush.msrb.mxu0 %v234_v25 }
 0x132   :  { %364 = vmatpush.msrb.mxu2 %v312_v27  ;;  %301 = vmatpush.msrb.mxu1 %v253_v29 }
 0x133   :  { %383 = vmatpush.msrb.mxu3 %v332_v28 }
 0x134   :  { %302 = vmatpush.msrb.mxu1 %v252_v31 }
 0x135   :  { %384 = vmatpush.msrb.mxu3 %v331_v30 }
 0x136   :  { %303 = vmatpush.msrb.mxu1 %v251_v33 }
 0x137   :  { %385 = vmatpush.msrb.mxu3 %v330_v32 }
 0x138   :  { %304 = vmatpush.msrb.mxu1 %v250_v35 }
 0x139   :  { %386 = vmatpush.msrb.mxu3 %v329_v34 }
 0x13b   :  { %387 = vmatpush.msrb.mxu3 %v328_v36 }
 0x1b3   :  { %v195_v56 = vpop.f32.mrf.mxu2  ;;  %v209_v62 = vpop.f32.mrf.mxu3 }
 0x1b4   :  { %v720_v57 = vadd.f32 %v195_v56, %v169_v49  ;;  %v723_v1 = vadd.f32 %v209_v62, %v170_v63  ;;  %v629_v56 = vmov 0.0  }
 0x1b6   :  { %214 = vmax.xlane.f32.xlu0 %v720_v57 }
 0x1bb   :  { %v197_v0 = vpop.f32.mrf.mxu2  ;;  %v211_v3 = vpop.f32.mrf.mxu3 }
 0x1bc   :  { %v725_v2 = vadd.f32 %v197_v0, %v169_v49  ;;  %v729_v4 = vadd.f32 %v211_v3, %v170_v63 }
 0x1be   :  { %216 = vmax.xlane.f32.xlu1 %v725_v2  ;;  %224 = vmax.xlane.f32.xlu0 %v723_v1 }
 0x1c6   :  { %226 = vmax.xlane.f32.xlu1 %v729_v4 }
 0x229   :  { %v215_v37 = vpop.xlane.xlu0 %214 }
 0x22a   :  { %v218_v38 = vsub.f32 %v720_v57, %v215_v37  ;;  %v468_v57 = vsel %vm346_vm3, 1.0, %v629_v56 }
 0x22c   :  { %v220_v39 = vmul.f32 1.442695, %v218_v38 }
 0x22e   :  { %483 = vpow2.f32 %v220_v39 }
 0x231   :  { %v217_v40 = vpop.xlane.xlu1 %216  ;;  %v225_v41 = vpop.xlane.xlu0 %224 }
 0x232   :  { %v219_v42 = vsub.f32 %v725_v2, %v217_v40  ;;  %v228_v43 = vsub.f32 %v723_v1, %v225_v41 }
 0x234   :  { %v484_v44 = vpop.eup %483  ;;  %v222_v45 = vmul.f32 1.442695, %v219_v42  ;;  %v230_v46 = vmul.f32 1.442695, %v228_v43 }
 0x235   :  { %282 = vmatmul.f32.vlgmr.msrb.gmra.mxu0 %v484_v44  ;;  %365 = vmatmul.f32.vlgmr.msrb.gmra.mxu2 %v484_v44 }
 0x236   :  { %485 = vpow2.f32 %v222_v45 }
 0x237   :  { %487 = vpow2.f32 %v230_v46 }
 0x239   :  { %v227_v47 = vpop.xlane.xlu1 %226 }
 0x23a   :  { %v229_v48 = vsub.f32 %v729_v4, %v227_v47 }
 0x23c   :  { %v486_v49 = vpop.eup %485  ;;  %v232_v50 = vmul.f32 1.442695, %v229_v48 }
 0x23d   :  { %v488_v51 = vpop.eup %487  ;;  %285 = vmatmul.f32.gmra.mxu0 %v486_v49  ;;  %368 = vmatmul.f32.gmra.mxu2 %v486_v49 }
 0x23e   :  { %489 = vpow2.f32 %v232_v50  ;;  %305 = vmatmul.f32.vlgmr.msrb.gmra.mxu1 %v488_v51  ;;  %388 = vmatmul.f32.vlgmr.msrb.gmra.mxu3 %v488_v51 }
 0x244   :  { %v490_v52 = vpop.eup %489 }
 0x246   :  { %308 = vmatmul.f32.gmra.mxu1 %v490_v52  ;;  %391 = vmatmul.f32.gmra.mxu3 %v490_v52 }
 0x2b2   :  { %v283_v8 = vpop.f32.mrf.mxu0 }
 0x2b8   :  { %v366_v55 = vpop.f32.mrf.mxu2 }
 0x2b9   :  { %v367_v58 = vadd.f32 %v468_v57, %v366_v55 }
 0x2ba   :  { %v286_v23 = vpop.f32.mrf.mxu0 }
 0x2bb   :  { %v306_v4 = vpop.f32.mrf.mxu1 }
 0x2bc   :  { %v307_v12 = vadd.f32 %v306_v4, %v283_v8 }
 0x2c0   :  { %v369_v61 = vpop.f32.mrf.mxu2 }
 0x2c1   :  { %v389_v59 = vpop.f32.mrf.mxu3  ;;  %v370_v62 = vadd.f32 %v468_v57, %v369_v61 }
 0x2c2   :  { %v390_v60 = vadd.f32 %v389_v59, %v367_v58 }
 0x2c3   :  { %v309_v21 = vpop.f32.mrf.mxu1 }
 0x2c4   :  { %491 = vrcp.f32 %v390_v60  ;;  %v406_v5 = vand.u32 2147483648, %v390_v60  ;;  %v404_v7 = vand.u32 2147483647, %v390_v60  ;;  %vm400_vm5 = vweird.f32 %v390_v60 }
 0x2c5   :  { %v310_v25 = vadd.f32 %v309_v21, %v286_v23 }
 0x2c6   :  { %v407_v11 = vor.u32 1.1754944e-38, %v406_v5  ;;  %vm405_vm7 = vcmp.eq.f32.partialorder %v404_v7, 8.507059e+37 }
 0x2c9   :  { %v392_v63 = vpop.f32.mrf.mxu3 }
 0x2ca   :  { %v492_v0 = vpop.eup %491  ;;  %v393_v1 = vadd.f32 %v392_v63, %v370_v62 }
 0x2cb   :  { %v396_v2 = vmul.f32 %v492_v0, %v390_v60  ;;  %vm401_vm4 = vweird.f32 %v492_v0 }
 0x2cc   :  { %493 = vrcp.f32 %v393_v1  ;;  %vm402_vm6 = vmor %vm400_vm5, %vm401_vm4  ;;  %v421_v18 = vand.u32 2147483648, %v393_v1  ;;  %v419_v20 = vand.u32 2147483647, %v393_v1  ;;  %vm415_vm9 = vweird.f32 %v393_v1 }
 0x2cd   :  { %v397_v3 = vsub.f32 1.0, %v396_v2 }
 0x2ce   :  { %v422_v24 = vor.u32 1.1754944e-38, %v421_v18  ;;  %vm420_vm11 = vcmp.eq.f32.partialorder %v419_v20, 8.507059e+37 }
 0x2cf   :  { %v398_v6 = vmul.f32 %v492_v0, %v397_v3 }
 0x2d1   :  { %v399_v9 = vadd.f32 %v492_v0, %v398_v6 }
 0x2d2   :  { %v494_v10 = vpop.eup %493 }
 0x2d3   :  { %v411_v13 = vmul.f32 %v494_v10, %v393_v1  ;;  %v403_v14 = vsel %vm402_vm6, %v492_v0, %v399_v9  ;;  %vm416_vm8 = vweird.f32 %v494_v10 }
 0x2d4   :  { %v408_v15 = vsel %vm405_vm7, %v407_v11, %v403_v14  ;;  %vm417_vm10 = vmor %vm415_vm9, %vm416_vm8 }
 0x2d5   :  { %v412_v16 = vsub.f32 1.0, %v411_v13  ;;  %v409_v17 = vmul.f32 %v408_v15, %v307_v12 }
 0x2d7   :  { %v413_v19 = vmul.f32 %v494_v10, %v412_v16  ;;  %425 = vst [vmem:[#allocation10] sm:$0xff] %v409_v17 }
 0x2d9   :  { %v414_v22 = vadd.f32 %v494_v10, %v413_v19 }
 0x2db   :  { %v418_v26 = vsel %vm417_vm10, %v494_v10, %v414_v22 }
 0x2dc   :  { %v423_v27 = vsel %vm420_vm11, %v422_v24, %v418_v26 }
 0x2dd   :  { %v424_v28 = vmul.f32 %v423_v27, %v310_v25 }
 0x2df   :  { %426 = vst [vmem:[#allocation10 + $0x8] sm:$0xff] %v424_v28 }
 0x2e0   :  { %439 = dma.vmem_to_hbm [thread:$0]  %s432_s12, 256, %s434_s15, [#allocation4], %s624_s17, %s624_s17, %s625_s18  }
 0x2e1   :  { %621 = dma.done.wait [#allocation4], 256  }
 0x2e2   :  { %622 = vsyncadd [#allocation4], 4294967040 }
 0x2e3   :  { %444 = vsyncpa [#allocation3], 1 }
 0x2e4   :  { %445 = vsyncpa [#allocation6], 1 }
 0x2e5   :  { %446 = vsyncpa [#allocation9], 1 }
 0x2e6   :  { %447 = vsyncpa [#allocation4], 1 }

</bundles_post_ra>
